<compile_context>
chip_gen: v5e
topology: v5e:2x2
jax: 0.10.0
libtpu: 0.0.40
codegen_flags: <defaults>
</compile_context>

<pallas_src>
import math
from functools import partial

import jax
import jax.numpy as jnp
from jax.experimental import pallas as pl
from jax.experimental.pallas import tpu as pltpu


def _conv_bn_relu_kernel(x_ref, w_ref, b_ref, o_ref, acc_ref, *,
                         kh, kw, stride, dilation, ot, ow):
    """One grid step = all KH*KW taps for one (batch, OH tile, C_out tile).

    x_ref:   (stride*stride, HS, WS, C_in)  space-to-batch'ed padded input, bf16
    w_ref:   (KH*KW, C_in, TN)              BN-scaled conv weight, bf16
    b_ref:   (1, TN)                        fused bias (f32)
    o_ref:   (1, OT, OW, TN)                output tile (f32, lane-dense TN)
    acc_ref: (OT*OW, TN)                    f32 VMEM accumulator
    """
    r_base = pl.program_id(1) * ot
    acc_ref[...] = jnp.zeros_like(acc_ref)

    for ki in range(kh):
        p = (ki * dilation) % stride                    # input-row parity plane
        r0 = r_base + (ki * dilation) // stride         # dynamic, major dim only
        for kj in range(kw):
            q = (kj * dilation) % stride                # input-col parity plane
            c0 = (kj * dilation) // stride              # static sublane offset
            win = x_ref[p * stride + q, pl.ds(r0, ot), pl.ds(c0, ow), :]
            lhs = win.reshape(ot * ow, win.shape[-1])   # (OT*OW, C_in) bf16
            acc_ref[...] += jnp.dot(lhs, w_ref[ki * kw + kj],
                                    preferred_element_type=jnp.float32)

    # epilogue: fused bias + ReLU (BN scale already folded into the weight)
    y = jnp.maximum(acc_ref[...] + b_ref[...], 0.0)
    o_ref[...] = y.reshape(o_ref.shape).astype(o_ref.dtype)


def conv2d_bn_relu(x_nchw, conv_w, conv_b, gamma, beta, run_mean, run_var,
                   *, stride=1, padding=0, dilation=1, eps=1e-5,
                   tn=128, rows_per_tile=256):
    n, c_in, h, w = x_nchw.shape
    c_out, _, kh, kw = conv_w.shape
    s, d = stride, dilation

    # ---- output geometry --------------------------------------------------
    hp, wp = h + 2 * padding, w + 2 * padding
    oh = (hp - d * (kh - 1) - 1) // s + 1
    ow = (wp - d * (kw - 1) - 1) // s + 1

    # output-row tiling: bounds the f32 accumulator / output block in VMEM
    ot = max(1, min(oh, rows_per_tile // max(ow, 1)))
    oh_pad = pl.cdiv(oh, ot) * ot

    # ---- input prep: NHWC, spatial zero-pad, space-to-batch for stride ----
    x = jnp.transpose(x_nchw, (0, 2, 3, 1))                         # NHWC
    x = jnp.pad(x, ((0, 0), (padding, padding), (padding, padding), (0, 0)))
    hs = oh_pad + ((kh - 1) * d) // s        # per-plane rows the kernel touches
    ws = ow + ((kw - 1) * d) // s            # per-plane cols the kernel touches
    hx, wx = hs * s, ws * s                  # exact extent needed for reshape
    x = x[:, :hx, :wx, :]
    x = jnp.pad(x, ((0, 0), (0, hx - x.shape[1]), (0, wx - x.shape[2]), (0, 0)))
    # (N, hx, wx, C) -> (N, s, s, hs, ws, C) -> (N*s*s, hs, ws, C)
    x = x.reshape(n, hs, s, ws, s, c_in).transpose(0, 2, 4, 1, 3, 5)
    x = x.reshape(n * s * s, hs, ws, c_in).astype(jnp.bfloat16)

    # ---- weights: fold BN scale, pad C_out to a lane-dense multiple -------
    c_out_p = pl.cdiv(c_out, tn) * tn
    scale = gamma / jnp.sqrt(run_var + eps)                          # (C_out,)
    w_mat = jnp.transpose(conv_w, (2, 3, 1, 0)).reshape(kh * kw, c_in, c_out)
    w_mat = w_mat * scale[None, None, :]
    w_mat = jnp.pad(w_mat, ((0, 0), (0, 0), (0, c_out_p - c_out)))
    w_mat = w_mat.astype(jnp.bfloat16)
    fused_bias = (conv_b - run_mean) * scale + beta                  # (C_out,)
    fused_bias = jnp.pad(fused_bias, (0, c_out_p - c_out))
    fused_bias = fused_bias.reshape(1, c_out_p).astype(jnp.float32)

    grid = (n, oh_pad // ot, c_out_p // tn)
    kernel = partial(_conv_bn_relu_kernel, kh=kh, kw=kw, stride=s,
                     dilation=d, ot=ot, ow=ow)

    flops = 2 * n * oh * ow * kh * kw * c_in * c_out
    bytes_accessed = (x.size * 2 + w_mat.size * 2 + fused_bias.size * 4
                      + n * oh_pad * ow * c_out_p * 4)

    out = pl.pallas_call(
        kernel,
        out_shape=jax.ShapeDtypeStruct((n, oh_pad, ow, c_out_p), jnp.float32),
        grid_spec=pltpu.PrefetchScalarGridSpec(
            num_scalar_prefetch=0,
            grid=grid,
            in_specs=[
                # full (space-to-batch'ed) image for this batch element;
                # block index is constant across the inner grid axes, so it is
                # DMA'd once per batch element (no 9x patch blow-up).
                pl.BlockSpec((s * s, hs, ws, c_in), lambda b, r, c: (b, 0, 0, 0)),
                pl.BlockSpec((kh * kw, c_in, tn), lambda b, r, c: (0, 0, c)),
                pl.BlockSpec((1, tn), lambda b, r, c: (0, c)),
            ],
            out_specs=pl.BlockSpec((1, ot, ow, tn), lambda b, r, c: (b, r, 0, c)),
            scratch_shapes=[pltpu.VMEM((ot * ow, tn), jnp.float32)],
        ),
        compiler_params=pltpu.CompilerParams(
            dimension_semantics=("parallel", "parallel", "parallel"),
            vmem_limit_bytes=48 * 1024 * 1024,
        ),
        cost_estimate=pl.CostEstimate(flops=flops, transcendentals=0,
                                      bytes_accessed=bytes_accessed),
    )(x, w_mat, fused_bias)

    out = out[:, :oh, :, :c_out]                  # drop OH / C_out padding
    return jnp.transpose(out, (0, 3, 1, 2))       # NHWC -> NCHW module boundary


def _reference(x, conv_w, conv_b, gamma, beta, run_mean, run_var,
               *, stride, padding, dilation, eps=1e-5):
    y = jax.lax.conv_general_dilated(
        x, conv_w, window_strides=(stride, stride),
        padding=[(padding, padding), (padding, padding)],
        rhs_dilation=(dilation, dilation),
        dimension_numbers=("NCHW", "OIHW", "NCHW"))
    y = y + conv_b.reshape(1, -1, 1, 1)
    y = (y - run_mean.reshape(1, -1, 1, 1)) / jnp.sqrt(run_var.reshape(1, -1, 1, 1) + eps)
    y = y * gamma.reshape(1, -1, 1, 1) + beta.reshape(1, -1, 1, 1)
    return jnp.maximum(y, 0.0)


if __name__ == "__main__":
    # small shapes consistent with an SSD-MobileNet conv block
    N, C_IN, H, W = 2, 4, 16, 16
    C_OUT, KSIZE = 8, 3

    key = jax.random.PRNGKey(0)
    k1, k2, k3, k4, k5, k6, k7 = jax.random.split(key, 7)

    x = jax.random.normal(k1, (N, C_IN, H, W), dtype=jnp.float32)

    fan_in = C_IN * KSIZE * KSIZE
    bound = 1.0 / math.sqrt(fan_in)
    conv_w = jax.random.uniform(k2, (C_OUT, C_IN, KSIZE, KSIZE),
                                minval=-bound, maxval=bound, dtype=jnp.float32)
    conv_b = jax.random.uniform(k3, (C_OUT,), minval=-bound, maxval=bound,
                                dtype=jnp.float32)
    gamma = 1.0 + 0.1 * jax.random.normal(k4, (C_OUT,), dtype=jnp.float32)
    beta = 0.1 * jax.random.normal(k5, (C_OUT,), dtype=jnp.float32)
    run_mean = 0.1 * jax.random.normal(k6, (C_OUT,), dtype=jnp.float32)
    run_var = jnp.abs(1.0 + 0.1 * jax.random.normal(k7, (C_OUT,), dtype=jnp.float32))

    configs = [
        dict(stride=1, padding=1, dilation=1),   # 3x3 "same" conv
        dict(stride=2, padding=1, dilation=1),   # strided downsampling conv
    ]
    for cfg in configs:
        fn = jax.jit(partial(conv2d_bn_relu, **cfg))
        out = jax.block_until_ready(fn(x, conv_w, conv_b, gamma, beta,
                                       run_mean, run_var))
        ref = _reference(x, conv_w, conv_b, gamma, beta, run_mean, run_var, **cfg)
        assert out.shape == ref.shape, (out.shape, ref.shape)
        # bf16 matmul inputs with f32 accumulation -> ~1e-2 scale tolerance
        assert jnp.allclose(out, ref, atol=3e-2, rtol=3e-2), (
            cfg, float(jnp.max(jnp.abs(out - ref))))

    print("KERNEL_OK")
</pallas_src>

<mosaic_0001>
module attributes {stable_mosaic.version = 11 : i64} {
  func.func @_conv_bn_relu_kernel(%arg0: i32, %arg1: i32, %arg2: i32, %arg3: memref<1x18x18x4xbf16, #tpu.memory_space<vmem>>, %arg4: memref<9x4x128xbf16, #tpu.memory_space<vmem>>, %arg5: memref<1x128xf32, #tpu.memory_space<vmem>>, %arg6: memref<1x16x16x128xf32, #tpu.memory_space<vmem>>, %arg7: memref<256x128xf32, #tpu.memory_space<vmem>>) attributes {dimension_semantics = [#tpu.dimension_semantics<parallel>, #tpu.dimension_semantics<parallel>, #tpu.dimension_semantics<parallel>], iteration_bounds = array<i64: 2, 1, 1>, scalar_prefetch = 0 : i64, scratch_operands = 1 : i64, tpu.core_type = #tpu.core_type<tc>, window_params = [{transform_indices = @transform_0, window_bounds = array<i64: 1, 18, 18, 4>}, {transform_indices = @transform_1, window_bounds = array<i64: 9, 4, 128>}, {transform_indices = @transform_2, window_bounds = array<i64: 1, 128>}, {transform_indices = @transform_3, window_bounds = array<i64: 1, 16, 16, 128>}]} {
    %c16_i32 = arith.constant 16 : i32
    %0 = arith.muli %arg1, %c16_i32 : i32
    %cst = arith.constant 0.000000e+00 : f32
    %1 = vector.broadcast %cst : f32 to vector<256x128xf32>
    %c0 = arith.constant 0 : index
    %c0_0 = arith.constant 0 : index
    %2 = vector.load %arg7[%c0, %c0_0] : memref<256x128xf32, #tpu.memory_space<vmem>>, vector<256x128xf32>
    tpu.vector_store %arg7[%c0, %c0_0], %1 {strides = array<i32>} : memref<256x128xf32, #tpu.memory_space<vmem>>, vector<256x128xf32>,
    %c0_i32 = arith.constant 0 : i32
    %3 = arith.addi %0, %c0_i32 : i32
    %c0_1 = arith.constant 0 : index
    %4 = arith.index_cast %3 : i32 to index
    %c0_2 = arith.constant 0 : index
    %c0_3 = arith.constant 0 : index
    %5 = vector.load %arg3[%c0_1, %4, %c0_2, %c0_3] : memref<1x18x18x4xbf16, #tpu.memory_space<vmem>>, vector<1x16x16x4xbf16>
    %6 = vector.shape_cast %5 : vector<1x16x16x4xbf16> to vector<16x16x4xbf16>
    %7 = vector.shape_cast %6 : vector<16x16x4xbf16> to vector<256x4xbf16>
    %c0_4 = arith.constant 0 : index
    %c0_5 = arith.constant 0 : index
    %8 = vector.load %arg7[%c0_4, %c0_5] : memref<256x128xf32, #tpu.memory_space<vmem>>, vector<256x128xf32>
    %c0_6 = arith.constant 0 : index
    %c0_7 = arith.constant 0 : index
    %c0_8 = arith.constant 0 : index
    %9 = vector.load %arg4[%c0_6, %c0_7, %c0_8] : memref<9x4x128xbf16, #tpu.memory_space<vmem>>, vector<1x4x128xbf16>
    %10 = vector.shape_cast %9 : vector<1x4x128xbf16> to vector<4x128xbf16>
    %cst_9 = arith.constant dense<0.000000e+00> : vector<256x128xf32>
    %11 = tpu.matmul %7, %10, %cst_9 {dimension_numbers = #tpu.dot_dimension_numbers<[1], [0], [0], [1], [0, 0, 1, 1], [], []>} : vector<256x4xbf16>, vector<4x128xbf16>, vector<256x128xf32> -> vector<256x128xf32>
    %12 = arith.addf %8, %11 : vector<256x128xf32>
    %c0_10 = arith.constant 0 : index
    %c0_11 = arith.constant 0 : index
    %13 = vector.load %arg7[%c0_10, %c0_11] : memref<256x128xf32, #tpu.memory_space<vmem>>, vector<256x128xf32>
    tpu.vector_store %arg7[%c0_10, %c0_11], %12 {strides = array<i32>} : memref<256x128xf32, #tpu.memory_space<vmem>>, vector<256x128xf32>,
    %c0_12 = arith.constant 0 : index
    %14 = arith.index_cast %3 : i32 to index
    %c1 = arith.constant 1 : index
    %c0_13 = arith.constant 0 : index
    %15 = vector.load %arg3[%c0_12, %14, %c1, %c0_13] : memref<1x18x18x4xbf16, #tpu.memory_space<vmem>>, vector<1x16x16x4xbf16>
    %16 = vector.shape_cast %15 : vector<1x16x16x4xbf16> to vector<16x16x4xbf16>
    %17 = vector.shape_cast %16 : vector<16x16x4xbf16> to vector<256x4xbf16>
    %c0_14 = arith.constant 0 : index
    %c0_15 = arith.constant 0 : index
    %18 = vector.load %arg7[%c0_14, %c0_15] : memref<256x128xf32, #tpu.memory_space<vmem>>, vector<256x128xf32>
    %c1_16 = arith.constant 1 : index
    %c0_17 = arith.constant 0 : index
    %c0_18 = arith.constant 0 : index
    %19 = vector.load %arg4[%c1_16, %c0_17, %c0_18] : memref<9x4x128xbf16, #tpu.memory_space<vmem>>, vector<1x4x128xbf16>
    %20 = vector.shape_cast %19 : vector<1x4x128xbf16> to vector<4x128xbf16>
    %cst_19 = arith.constant dense<0.000000e+00> : vector<256x128xf32>
    %21 = tpu.matmul %17, %20, %cst_19 {dimension_numbers = #tpu.dot_dimension_numbers<[1], [0], [0], [1], [0, 0, 1, 1], [], []>} : vector<256x4xbf16>, vector<4x128xbf16>, vector<256x128xf32> -> vector<256x128xf32>
    %22 = arith.addf %18, %21 : vector<256x128xf32>
    %c0_20 = arith.constant 0 : index
    %c0_21 = arith.constant 0 : index
    %23 = vector.load %arg7[%c0_20, %c0_21] : memref<256x128xf32, #tpu.memory_space<vmem>>, vector<256x128xf32>
    tpu.vector_store %arg7[%c0_20, %c0_21], %22 {strides = array<i32>} : memref<256x128xf32, #tpu.memory_space<vmem>>, vector<256x128xf32>,
    %c0_22 = arith.constant 0 : index
    %24 = arith.index_cast %3 : i32 to index
    %c2 = arith.constant 2 : index
    %c0_23 = arith.constant 0 : index
    %25 = vector.load %arg3[%c0_22, %24, %c2, %c0_23] : memref<1x18x18x4xbf16, #tpu.memory_space<vmem>>, vector<1x16x16x4xbf16>
    %26 = vector.shape_cast %25 : vector<1x16x16x4xbf16> to vector<16x16x4xbf16>
    %27 = vector.shape_cast %26 : vector<16x16x4xbf16> to vector<256x4xbf16>
    %c0_24 = arith.constant 0 : index
    %c0_25 = arith.constant 0 : index
    %28 = vector.load %arg7[%c0_24, %c0_25] : memref<256x128xf32, #tpu.memory_space<vmem>>, vector<256x128xf32>
    %c2_26 = arith.constant 2 : index
    %c0_27 = arith.constant 0 : index
    %c0_28 = arith.constant 0 : index
    %29 = vector.load %arg4[%c2_26, %c0_27, %c0_28] : memref<9x4x128xbf16, #tpu.memory_space<vmem>>, vector<1x4x128xbf16>
    %30 = vector.shape_cast %29 : vector<1x4x128xbf16> to vector<4x128xbf16>
    %cst_29 = arith.constant dense<0.000000e+00> : vector<256x128xf32>
    %31 = tpu.matmul %27, %30, %cst_29 {dimension_numbers = #tpu.dot_dimension_numbers<[1], [0], [0], [1], [0, 0, 1, 1], [], []>} : vector<256x4xbf16>, vector<4x128xbf16>, vector<256x128xf32> -> vector<256x128xf32>
    %32 = arith.addf %28, %31 : vector<256x128xf32>
    %c0_30 = arith.constant 0 : index
    %c0_31 = arith.constant 0 : index
    %33 = vector.load %arg7[%c0_30, %c0_31] : memref<256x128xf32, #tpu.memory_space<vmem>>, vector<256x128xf32>
    tpu.vector_store %arg7[%c0_30, %c0_31], %32 {strides = array<i32>} : memref<256x128xf32, #tpu.memory_space<vmem>>, vector<256x128xf32>,
    %c1_i32 = arith.constant 1 : i32
    %34 = arith.addi %0, %c1_i32 : i32
    %c0_32 = arith.constant 0 : index
    %35 = arith.index_cast %34 : i32 to index
    %c0_33 = arith.constant 0 : index
    %c0_34 = arith.constant 0 : index
    %36 = vector.load %arg3[%c0_32, %35, %c0_33, %c0_34] : memref<1x18x18x4xbf16, #tpu.memory_space<vmem>>, vector<1x16x16x4xbf16>
    %37 = vector.shape_cast %36 : vector<1x16x16x4xbf16> to vector<16x16x4xbf16>
    %38 = vector.shape_cast %37 : vector<16x16x4xbf16> to vector<256x4xbf16>
    %c0_35 = arith.constant 0 : index
    %c0_36 = arith.constant 0 : index
    %39 = vector.load %arg7[%c0_35, %c0_36] : memref<256x128xf32, #tpu.memory_space<vmem>>, vector<256x128xf32>
    %c3 = arith.constant 3 : index
    %c0_37 = arith.constant 0 : index
    %c0_38 = arith.constant 0 : index
    %40 = vector.load %arg4[%c3, %c0_37, %c0_38] : memref<9x4x128xbf16, #tpu.memory_space<vmem>>, vector<1x4x128xbf16>
    %41 = vector.shape_cast %40 : vector<1x4x128xbf16> to vector<4x128xbf16>
    %cst_39 = arith.constant dense<0.000000e+00> : vector<256x128xf32>
    %42 = tpu.matmul %38, %41, %cst_39 {dimension_numbers = #tpu.dot_dimension_numbers<[1], [0], [0], [1], [0, 0, 1, 1], [], []>} : vector<256x4xbf16>, vector<4x128xbf16>, vector<256x128xf32> -> vector<256x128xf32>
    %43 = arith.addf %39, %42 : vector<256x128xf32>
    %c0_40 = arith.constant 0 : index
    %c0_41 = arith.constant 0 : index
    %44 = vector.load %arg7[%c0_40, %c0_41] : memref<256x128xf32, #tpu.memory_space<vmem>>, vector<256x128xf32>
    tpu.vector_store %arg7[%c0_40, %c0_41], %43 {strides = array<i32>} : memref<256x128xf32, #tpu.memory_space<vmem>>, vector<256x128xf32>,
    %c0_42 = arith.constant 0 : index
    %45 = arith.index_cast %34 : i32 to index
    %c1_43 = arith.constant 1 : index
    %c0_44 = arith.constant 0 : index
    %46 = vector.load %arg3[%c0_42, %45, %c1_43, %c0_44] : memref<1x18x18x4xbf16, #tpu.memory_space<vmem>>, vector<1x16x16x4xbf16>
    %47 = vector.shape_cast %46 : vector<1x16x16x4xbf16> to vector<16x16x4xbf16>
    %48 = vector.shape_cast %47 : vector<16x16x4xbf16> to vector<256x4xbf16>
    %c0_45 = arith.constant 0 : index
    %c0_46 = arith.constant 0 : index
    %49 = vector.load %arg7[%c0_45, %c0_46] : memref<256x128xf32, #tpu.memory_space<vmem>>, vector<256x128xf32>
    %c4 = arith.constant 4 : index
    %c0_47 = arith.constant 0 : index
    %c0_48 = arith.constant 0 : index
    %50 = vector.load %arg4[%c4, %c0_47, %c0_48] : memref<9x4x128xbf16, #tpu.memory_space<vmem>>, vector<1x4x128xbf16>
    %51 = vector.shape_cast %50 : vector<1x4x128xbf16> to vector<4x128xbf16>
    %cst_49 = arith.constant dense<0.000000e+00> : vector<256x128xf32>
    %52 = tpu.matmul %48, %51, %cst_49 {dimension_numbers = #tpu.dot_dimension_numbers<[1], [0], [0], [1], [0, 0, 1, 1], [], []>} : vector<256x4xbf16>, vector<4x128xbf16>, vector<256x128xf32> -> vector<256x128xf32>
    %53 = arith.addf %49, %52 : vector<256x128xf32>
    %c0_50 = arith.constant 0 : index
    %c0_51 = arith.constant 0 : index
    %54 = vector.load %arg7[%c0_50, %c0_51] : memref<256x128xf32, #tpu.memory_space<vmem>>, vector<256x128xf32>
    tpu.vector_store %arg7[%c0_50, %c0_51], %53 {strides = array<i32>} : memref<256x128xf32, #tpu.memory_space<vmem>>, vector<256x128xf32>,
    %c0_52 = arith.constant 0 : index
    %55 = arith.index_cast %34 : i32 to index
    %c2_53 = arith.constant 2 : index
    %c0_54 = arith.constant 0 : index
    %56 = vector.load %arg3[%c0_52, %55, %c2_53, %c0_54] : memref<1x18x18x4xbf16, #tpu.memory_space<vmem>>, vector<1x16x16x4xbf16>
    %57 = vector.shape_cast %56 : vector<1x16x16x4xbf16> to vector<16x16x4xbf16>
    %58 = vector.shape_cast %57 : vector<16x16x4xbf16> to vector<256x4xbf16>
    %c0_55 = arith.constant 0 : index
    %c0_56 = arith.constant 0 : index
    %59 = vector.load %arg7[%c0_55, %c0_56] : memref<256x128xf32, #tpu.memory_space<vmem>>, vector<256x128xf32>
    %c5 = arith.constant 5 : index
    %c0_57 = arith.constant 0 : index
    %c0_58 = arith.constant 0 : index
    %60 = vector.load %arg4[%c5, %c0_57, %c0_58] : memref<9x4x128xbf16, #tpu.memory_space<vmem>>, vector<1x4x128xbf16>
    %61 = vector.shape_cast %60 : vector<1x4x128xbf16> to vector<4x128xbf16>
    %cst_59 = arith.constant dense<0.000000e+00> : vector<256x128xf32>
    %62 = tpu.matmul %58, %61, %cst_59 {dimension_numbers = #tpu.dot_dimension_numbers<[1], [0], [0], [1], [0, 0, 1, 1], [], []>} : vector<256x4xbf16>, vector<4x128xbf16>, vector<256x128xf32> -> vector<256x128xf32>
    %63 = arith.addf %59, %62 : vector<256x128xf32>
    %c0_60 = arith.constant 0 : index
    %c0_61 = arith.constant 0 : index
    %64 = vector.load %arg7[%c0_60, %c0_61] : memref<256x128xf32, #tpu.memory_space<vmem>>, vector<256x128xf32>
    tpu.vector_store %arg7[%c0_60, %c0_61], %63 {strides = array<i32>} : memref<256x128xf32, #tpu.memory_space<vmem>>, vector<256x128xf32>,
    %c2_i32 = arith.constant 2 : i32
    %65 = arith.addi %0, %c2_i32 : i32
    %c0_62 = arith.constant 0 : index
    %66 = arith.index_cast %65 : i32 to index
    %c0_63 = arith.constant 0 : index
    %c0_64 = arith.constant 0 : index
    %67 = vector.load %arg3[%c0_62, %66, %c0_63, %c0_64] : memref<1x18x18x4xbf16, #tpu.memory_space<vmem>>, vector<1x16x16x4xbf16>
    %68 = vector.shape_cast %67 : vector<1x16x16x4xbf16> to vector<16x16x4xbf16>
    %69 = vector.shape_cast %68 : vector<16x16x4xbf16> to vector<256x4xbf16>
    %c0_65 = arith.constant 0 : index
    %c0_66 = arith.constant 0 : index
    %70 = vector.load %arg7[%c0_65, %c0_66] : memref<256x128xf32, #tpu.memory_space<vmem>>, vector<256x128xf32>
    %c6 = arith.constant 6 : index
    %c0_67 = arith.constant 0 : index
    %c0_68 = arith.constant 0 : index
    %71 = vector.load %arg4[%c6, %c0_67, %c0_68] : memref<9x4x128xbf16, #tpu.memory_space<vmem>>, vector<1x4x128xbf16>
    %72 = vector.shape_cast %71 : vector<1x4x128xbf16> to vector<4x128xbf16>
    %cst_69 = arith.constant dense<0.000000e+00> : vector<256x128xf32>
    %73 = tpu.matmul %69, %72, %cst_69 {dimension_numbers = #tpu.dot_dimension_numbers<[1], [0], [0], [1], [0, 0, 1, 1], [], []>} : vector<256x4xbf16>, vector<4x128xbf16>, vector<256x128xf32> -> vector<256x128xf32>
    %74 = arith.addf %70, %73 : vector<256x128xf32>
    %c0_70 = arith.constant 0 : index
    %c0_71 = arith.constant 0 : index
    %75 = vector.load %arg7[%c0_70, %c0_71] : memref<256x128xf32, #tpu.memory_space<vmem>>, vector<256x128xf32>
    tpu.vector_store %arg7[%c0_70, %c0_71], %74 {strides = array<i32>} : memref<256x128xf32, #tpu.memory_space<vmem>>, vector<256x128xf32>,
    %c0_72 = arith.constant 0 : index
    %76 = arith.index_cast %65 : i32 to index
    %c1_73 = arith.constant 1 : index
    %c0_74 = arith.constant 0 : index
    %77 = vector.load %arg3[%c0_72, %76, %c1_73, %c0_74] : memref<1x18x18x4xbf16, #tpu.memory_space<vmem>>, vector<1x16x16x4xbf16>
    %78 = vector.shape_cast %77 : vector<1x16x16x4xbf16> to vector<16x16x4xbf16>
    %79 = vector.shape_cast %78 : vector<16x16x4xbf16> to vector<256x4xbf16>
    %c0_75 = arith.constant 0 : index
    %c0_76 = arith.constant 0 : index
    %80 = vector.load %arg7[%c0_75, %c0_76] : memref<256x128xf32, #tpu.memory_space<vmem>>, vector<256x128xf32>
    %c7 = arith.constant 7 : index
    %c0_77 = arith.constant 0 : index
    %c0_78 = arith.constant 0 : index
    %81 = vector.load %arg4[%c7, %c0_77, %c0_78] : memref<9x4x128xbf16, #tpu.memory_space<vmem>>, vector<1x4x128xbf16>
    %82 = vector.shape_cast %81 : vector<1x4x128xbf16> to vector<4x128xbf16>
    %cst_79 = arith.constant dense<0.000000e+00> : vector<256x128xf32>
    %83 = tpu.matmul %79, %82, %cst_79 {dimension_numbers = #tpu.dot_dimension_numbers<[1], [0], [0], [1], [0, 0, 1, 1], [], []>} : vector<256x4xbf16>, vector<4x128xbf16>, vector<256x128xf32> -> vector<256x128xf32>
    %84 = arith.addf %80, %83 : vector<256x128xf32>
    %c0_80 = arith.constant 0 : index
    %c0_81 = arith.constant 0 : index
    %85 = vector.load %arg7[%c0_80, %c0_81] : memref<256x128xf32, #tpu.memory_space<vmem>>, vector<256x128xf32>
    tpu.vector_store %arg7[%c0_80, %c0_81], %84 {strides = array<i32>} : memref<256x128xf32, #tpu.memory_space<vmem>>, vector<256x128xf32>,
    %c0_82 = arith.constant 0 : index
    %86 = arith.index_cast %65 : i32 to index
    %c2_83 = arith.constant 2 : index
    %c0_84 = arith.constant 0 : index
    %87 = vector.load %arg3[%c0_82, %86, %c2_83, %c0_84] : memref<1x18x18x4xbf16, #tpu.memory_space<vmem>>, vector<1x16x16x4xbf16>
    %88 = vector.shape_cast %87 : vector<1x16x16x4xbf16> to vector<16x16x4xbf16>
    %89 = vector.shape_cast %88 : vector<16x16x4xbf16> to vector<256x4xbf16>
    %c0_85 = arith.constant 0 : index
    %c0_86 = arith.constant 0 : index
    %90 = vector.load %arg7[%c0_85, %c0_86] : memref<256x128xf32, #tpu.memory_space<vmem>>, vector<256x128xf32>
    %c8 = arith.constant 8 : index
    %c0_87 = arith.constant 0 : index
    %c0_88 = arith.constant 0 : index
    %91 = vector.load %arg4[%c8, %c0_87, %c0_88] : memref<9x4x128xbf16, #tpu.memory_space<vmem>>, vector<1x4x128xbf16>
    %92 = vector.shape_cast %91 : vector<1x4x128xbf16> to vector<4x128xbf16>
    %cst_89 = arith.constant dense<0.000000e+00> : vector<256x128xf32>
    %93 = tpu.matmul %89, %92, %cst_89 {dimension_numbers = #tpu.dot_dimension_numbers<[1], [0], [0], [1], [0, 0, 1, 1], [], []>} : vector<256x4xbf16>, vector<4x128xbf16>, vector<256x128xf32> -> vector<256x128xf32>
    %94 = arith.addf %90, %93 : vector<256x128xf32>
    %c0_90 = arith.constant 0 : index
    %c0_91 = arith.constant 0 : index
    %95 = vector.load %arg7[%c0_90, %c0_91] : memref<256x128xf32, #tpu.memory_space<vmem>>, vector<256x128xf32>
    tpu.vector_store %arg7[%c0_90, %c0_91], %94 {strides = array<i32>} : memref<256x128xf32, #tpu.memory_space<vmem>>, vector<256x128xf32>,
    %c0_92 = arith.constant 0 : index
    %c0_93 = arith.constant 0 : index
    %96 = vector.load %arg7[%c0_92, %c0_93] : memref<256x128xf32, #tpu.memory_space<vmem>>, vector<256x128xf32>
    %c0_94 = arith.constant 0 : index
    %c0_95 = arith.constant 0 : index
    %97 = vector.load %arg5[%c0_94, %c0_95] : memref<1x128xf32, #tpu.memory_space<vmem>>, vector<1x128xf32>
    %98 = vector.broadcast %97 : vector<1x128xf32> to vector<256x128xf32>
    %99 = arith.addf %96, %98 : vector<256x128xf32>
    %cst_96 = arith.constant 0.000000e+00 : f32
    %100 = vector.broadcast %cst_96 : f32 to vector<256x128xf32>
    %101 = arith.maximumf %99, %100 : vector<256x128xf32>
    %102 = vector.shape_cast %101 : vector<256x128xf32> to vector<1x16x16x128xf32>
    %c0_97 = arith.constant 0 : index
    %c0_98 = arith.constant 0 : index
    %c0_99 = arith.constant 0 : index
    %c0_100 = arith.constant 0 : index
    %103 = vector.load %arg6[%c0_97, %c0_98, %c0_99, %c0_100] : memref<1x16x16x128xf32, #tpu.memory_space<vmem>>, vector<1x16x16x128xf32>
    tpu.vector_store %arg6[%c0_97, %c0_98, %c0_99, %c0_100], %102 {strides = array<i32>} : memref<1x16x16x128xf32, #tpu.memory_space<vmem>>, vector<1x16x16x128xf32>,
    return
  }
  func.func @transform_0(%arg0: i32, %arg1: i32, %arg2: i32) -> (i32, i32, i32, i32) {
    %c0_i32 = arith.constant 0 : i32
    %c0_i32_0 = arith.constant 0 : i32
    %c0_i32_1 = arith.constant 0 : i32
    %c0_i32_2 = arith.constant 0 : i32
    return %arg0, %c0_i32, %c0_i32_0, %c0_i32_1 : i32, i32, i32, i32
  }
  func.func @transform_1(%arg0: i32, %arg1: i32, %arg2: i32) -> (i32, i32, i32) {
    %c0_i32 = arith.constant 0 : i32
    %c0_i32_0 = arith.constant 0 : i32
    %c0_i32_1 = arith.constant 0 : i32
    return %c0_i32, %c0_i32_0, %arg2 : i32, i32, i32
  }
  func.func @transform_2(%arg0: i32, %arg1: i32, %arg2: i32) -> (i32, i32) {
    %c0_i32 = arith.constant 0 : i32
    %c0_i32_0 = arith.constant 0 : i32
    return %c0_i32, %arg2 : i32, i32
  }
  func.func @transform_3(%arg0: i32, %arg1: i32, %arg2: i32) -> (i32, i32, i32, i32) {
    %c0_i32 = arith.constant 0 : i32
    %c0_i32_0 = arith.constant 0 : i32
    return %arg0, %arg1, %c0_i32, %arg2 : i32, i32, i32, i32
  }
}

</mosaic_0001>

<bundles_post_ra>
// kernel: conv2d_bn_relu.1
= control target key start
LH: loop header
LB: loop body
LE: loop exit
PB: predicated region body
PF: predicated region fallthrough
CT: control target
= control target key end

     0   :  { %s6032_s12 = smov 0   ;;  %s6034_s13 = smov 0   ;;  %s7404_s0 = inlined_call_operand.vmem [shape: bf16[2,18,18,4], index: 0, kind: input, shape index: {}]   ;;  %s7405_s1 = inlined_call_operand.vmem [shape: bf16[9,4,128], index: 1, kind: input, shape index: {}]   ;;  %s7406_s2 = inlined_call_operand.vmem [shape: f32[1,128], index: 2, kind: input, shape index: {}]   ;;  %s7407_s3 = inlined_call_operand.vmem [shape: f32[2,16,16,128], index: 3, kind: output, shape index: {}]  }
   0x1   :  { %s6036_s14 = smov 0  }
   0x2 LB: > { %s32_s15 = sadd.s32 1, %s6006_s13  ;;  %p5255_p0 = scmp.ge.s32.totalorder %s6010_s14, 1  ;;  %s6010_s14 = sphi %s6036_s14, %s13_s14   ;;  %s6006_s13 = sphi %s6034_s13, %s7437_s13   ;;  %s6002_s12 = sphi %s6032_s12, %s7436_s12  }
   0x3   : > { %p34_p1 = scmp.ge.s32.totalorder %s32_s15, 2  ;;  %p177_p2 = scmp.lt.s32.totalorder %s6010_s14, 3 }
   0x5   : > { %s7439_s15 = smov (%p34_p1, %s32_s15), 0  ;;  %p178_p3 = pnand %p5255_p0, %p177_p2 }
   0x7   : > { %181 = sbr.rel (%p178_p3) target bundleno = 731 (0x2db), region = 32 }
   0xc   : > { %v343_v0 = vld [vmem:[%s7405_s1] sm:$0x3]  ;;  %vm473_vm0 = vcmask 1041408   ;;  %p216_p4 = scmp.lt.s32.totalorder %s6002_s12, 1  ;;  %v5372_v2 = vld [vmem:[%s7405_s1 + $0x4] sm:$0x3] }
   0xd   : > { %v475_v1 = vsel %vm473_vm0, %v343_v0, 0  ;;  %v5421_v3 = vld [vmem:[%s7405_s1 + $0x6] sm:$0x3]  ;;  %v1693_v4 = vsel %vm473_vm0, %v5372_v2, 0  ;;  %v5339_v6 = vld [vmem:[%s7405_s1 + $0x2] sm:$0x3] }
   0xe   : > { %5958 = vmatpush.bf16.msra.mxu1 %v475_v1  ;;  %5959 = vmatpush.bf16.msra.mxu2 %v475_v1  ;;  %s7441_s12 = smov (!%p216_p4, %s6002_s12), 1  ;;  %v2047_v5 = vsel %vm473_vm0, %v5421_v3, 0  ;;  %v1196_v7 = vsel %vm473_vm0, %v5339_v6, 0  ;;  %v5550_v8 = vld [vmem:[%s7405_s1 + $0x8] sm:$0x3]  ;;  %vm424_vm1 = vcmask 31744  }
   0xf   : > { %5960 = vmatpush.bf16.msra.mxu3 %v475_v1  ;;  %484 = vmatpush.bf16.msra.mxu0 %v475_v1  ;;  %s5961_s26 = smul.u32 216, %s7441_s12  ;;  %v2765_v9 = vsel %vm473_vm0, %v5550_v8, 0  ;;  %v5680_v28 = vld [vmem:[%s7405_s1 + $0xc] sm:$0x3]  ;;  %v5809_v29 = vld [vmem:[%s7405_s1 + $0xe] sm:$0x3] }
  0x10   : > { %v3613_v30 = vsel %vm473_vm0, %v5680_v28, 0  ;;  %v4331_v31 = vsel %vm473_vm0, %v5809_v29, 0  ;;  %v5631_v32 = vld [vmem:[%s7405_s1 + $0xa] sm:$0x3]  ;;  %v5890_v33 = vld [vmem:[%s7405_s1 + $0x10] sm:$0x3] }
  0x11   : > { %s6076_s29 = scalar_lea.vmem %s7404_s0, %s5961_s26  ;;  %v3259_v36 = vsel %vm473_vm0, %v5631_v32, 0  ;;  %v4825_v37 = vsel %vm473_vm0, %v5890_v33, 0  ;;  %vm678_vm2 = vsmask.f32 3328  ;;  %vm679_vm3 = vsmask.f32 7440 }
  0x12   : > { %1702 = vmatpush.bf16.msrb.mxu2 %v1693_v4  ;;  %1205 = vmatpush.bf16.msrb.mxu1 %v1196_v7  ;;  %v5914_v10 = vld [vmem:[%s6076_s29 + $0x30] sm:$0xff]  ;;  %v5918_v11 = vld [vmem:[%s6076_s29 + $0x60] sm:$0xff]  ;;  %v5916_v18 = vld [vmem:[%s6076_s29 + $0x48] sm:$0xff]  ;;  %vm1447_vm4 = vcmask 1042432   ;;  %vm1448_vm5 = vcmask 1046532   ;;  %s5909_s17 = sshll.u32 %s7441_s12, 8 }
  0x13   : > { %2056 = vmatpush.bf16.msrb.mxu3 %v2047_v5  ;;  %2774 = vmatpush.bf16.msrb.mxu0 %v2765_v9  ;;  %v5922_v12 = vld [vmem:[%s6076_s29 + $0x90] sm:$0xff]  ;;  %v5910_v13 = vld [vmem:[%s6076_s29] sm:$0xff]  ;;  %v5920_v19 = vld [vmem:[%s6076_s29 + $0x78] sm:$0xff]  ;;  %s7121_s12 = scalar_lea.vmem %s7407_s3, %s5909_s17 }
  0x14   : > { %5327 = vmatmul.msk.bf16.vlgmr.msra.gmra.mxu1 %vm424_vm1, %v5914_v10  ;;  %5331 = vmatmul.msk.bf16.vlgmr.msra.gmra.mxu2 %vm424_vm1, %v5918_v11  ;;  %v5915_v14 = vld [vmem:[%s6076_s29 + $0x3c] sm:$0xff]  ;;  %v5919_v15 = vld [vmem:[%s6076_s29 + $0x6c] sm:$0xff]  ;;  %v631_v23 = vld [vmem:[%s6076_s29 + $0x4] sm:$0xf] }
  0x15   : > { %5335 = vmatmul.msk.bf16.vlgmr.msra.gmra.mxu3 %vm424_vm1, %v5922_v12  ;;  %5323 = vmatmul.msk.bf16.vlgmr.msra.gmra.mxu0 %vm424_vm1, %v5910_v13  ;;  %v5923_v16 = vld [vmem:[%s6076_s29 + $0x9c] sm:$0xff]  ;;  %v5911_v17 = vld [vmem:[%s6076_s29 + $0xc] sm:$0xff]  ;;  %v691_v26 = vshll.u32 %v631_v23, 16  ;;  %v695_v27 = vshrl.u32 %v631_v23, 16  ;;  %v632_v38 = vld [vmem:[%s6076_s29 + $0x8] sm:$0x1] }
  0x16   : > { %v5924_v20 = vld [vmem:[%s6076_s29 + $0xa8] sm:$0xff]  ;;  %v5912_v21 = vld [vmem:[%s6076_s29 + $0x18] sm:$0xff]  ;;  %v630_v22 = vld [vmem:[%s6076_s29] sm:$0xf]  ;;  %3622 = vmatpush.bf16.msra.mxu2 %v3613_v30  ;;  %3268 = vmatpush.bf16.msra.mxu1 %v3259_v36  ;;  %v701_v48 = vshll.u32 %v632_v38, 16 }
  0x17   : > { %v682_v24 = vshrl.u32 %v630_v22, 16  ;;  %v685_v25 = vshll.u32 %v630_v22, 16  ;;  %v5502_v34 = vld [vmem:[%s6076_s29 + $0xc] sm:$0xf]  ;;  %v5503_v35 = vld [vmem:[%s6076_s29 + $0x10] sm:$0xf]  ;;  %4340 = vmatpush.bf16.msra.mxu3 %v4331_v31  ;;  %4834 = vmatpush.bf16.msra.mxu0 %v4825_v37  ;;  %vm6133_vm6 = vmor %vm678_vm2, %vm679_vm3 }
  0x18   : > { %v693_v41 = vrot.slane %v691_v26, 5  ;;  %v697_v42 = vrot.slane %v695_v27, 4  ;;  %v1352_v43 = vld [vmem:[%s6076_s29 + $0x4] sm:$0xf]  ;;  %v2251_v44 = vshrl.u32 %v5502_v34, 16  ;;  %v2254_v45 = vshll.u32 %v5502_v34, 16  ;;  %vm6137_vm7 = vmor %vm1447_vm4, %vm1448_vm5 }
  0x19   : > { %v684_v39 = vrot.slane %v682_v24, 4  ;;  %v687_v40 = vrot.slane %v685_v25, 5  ;;  %v2260_v46 = vshll.u32 %v5503_v35, 16  ;;  %v2264_v47 = vshrl.u32 %v5503_v35, 16  ;;  %v1351_v52 = vld [vmem:[%s6076_s29] sm:$0xe] }
  0x1a   : > { %v698_v50 = vor.u32 %v697_v42, %v693_v41  ;;  %v1452_v51 = vrot.slane %v1352_v43, 5  ;;  %v2253_v53 = vrot.slane %v2251_v44, 4  ;;  %v2256_v54 = vrot.slane %v2254_v45, 5  ;;  %v1353_v57 = vld [vmem:[%s6076_s29 + $0x8] sm:$0x1]  ;;  %v5917_v59 = vld [vmem:[%s6076_s29 + $0x54] sm:$0xff] }
  0x1b   : > { %v688_v49 = vor.u32 %v687_v40, %v684_v39  ;;  %v2262_v55 = vrot.slane %v2260_v46, 5  ;;  %v2266_v56 = vrot.slane %v2264_v47, 4  ;;  %v5504_v58 = vld [vmem:[%s6076_s29 + $0x14] sm:$0x1]  ;;  %v5921_v60 = vld [vmem:[%s6076_s29 + $0x84] sm:$0xff]  ;;  %v703_v61 = vrot.slane %v701_v48, 5 }
  0x1c   : > { %v5925_v62 = vld [vmem:[%s6076_s29 + $0xb4] sm:$0xff]  ;;  %v5913_v63 = vld [vmem:[%s6076_s29 + $0x24] sm:$0xff]  ;;  %v699_v2 = vrot.slane %v698_v50, 4  ;;  %v5356_v3 = vrot.slane %v1351_v52, 9  ;;  %v1454_v4 = vrot.slane %v1452_v51, 4  ;;  %v1455_v6 = vrot.slane %v1353_v57, 5 }
  0x1d   : > { %v689_v1 = vrot.slane %v688_v49, 4  ;;  %v2257_v7 = vor.u32 %v2256_v54, %v2253_v53  ;;  %v2267_v8 = vor.u32 %v2266_v56, %v2262_v55  ;;  %v2270_v9 = vshll.u32 %v5504_v58, 16  ;;  %v633_v10 = vld [vmem:[%s6076_s29 + $0xc] sm:$0xf]  ;;  %v634_v11 = vld [vmem:[%s6076_s29 + $0x10] sm:$0xf] }
  0x1e   : > { %v704_v13 = vsel %vm6133_vm6, %v699_v2, %v703_v61  ;;  %v709_v22 = vshll.u32 %v633_v10, 16  ;;  %v715_v23 = vshll.u32 %v634_v11, 16  ;;  %v719_v24 = vshrl.u32 %v634_v11, 16  ;;  %v635_v35 = vld [vmem:[%s6076_s29 + $0x14] sm:$0x1]  ;;  %v5957_v5 = vld [vmem:[%s6076_s29 + $0xcc] sm:$0xff] }
  0x1f   : > { %v694_v12 = vsel %vm6133_vm6, %v689_v1, %v693_v41  ;;  %v1100_v30 = vunpack.c.l.b16 %v704_v13  ;;  %v1355_v40 = vld [vmem:[%s6076_s29 + $0x10] sm:$0xf]  ;;  %v5507_v47 = vld [vmem:[%s6076_s29 + $0x20] sm:$0x1]  ;;  %v725_v48 = vshll.u32 %v635_v35, 16 }
  0x20   : > { %v1099_v29 = vunpack.c.l.b16 %v694_v12  ;;  %v711_v37 = vrot.slane %v709_v22, 5  ;;  %v717_v38 = vrot.slane %v715_v23, 5  ;;  %v721_v39 = vrot.slane %v719_v24, 4  ;;  %v1354_v54 = vld [vmem:[%s6076_s29 + $0xc] sm:$0xe] }
  0x21   : > { %v1459_v52 = vrot.slane %v1355_v40, 5  ;;  %v2294_v58 = vshll.u32 %v5507_v47, 16  ;;  %v727_v61 = vrot.slane %v725_v48, 5  ;;  %v5357_v2 = vrot.slane %v1354_v54, 9  ;;  %v1358_v40 = vld [vmem:[%s6076_s29 + $0x1c] sm:$0xf] }
  0x22   : > { %v1131_v49 = vpack.c.b16 %v1100_v30, %v1099_v29  ;;  %v722_v53 = vor.u32 %v721_v39, %v717_v38  ;;  %v5927_v48 = vld [vmem:[%s6076_s29 + $0x18] sm:$0xff] }
  0x23   : > { %v1357_v54 = vld [vmem:[%s6076_s29 + $0x18] sm:$0xe] }
  0x24   : > { %5328 = vmatmul.msk.bf16.gmra.mxu1 %vm424_vm1, %v5915_v14  ;;  %5332 = vmatmul.msk.bf16.gmra.mxu2 %vm424_vm1, %v5919_v15  ;;  %v1453_v14 = vsel %vm6137_vm7, %v5356_v3, %v1452_v51  ;;  %v5505_v15 = vld [vmem:[%s6076_s29 + $0x18] sm:$0xf]  ;;  %v1461_v3 = vrot.slane %v1459_v52, 4 }
  0x25   : > { %5336 = vmatmul.msk.bf16.gmra.mxu3 %vm424_vm1, %v5923_v16  ;;  %5324 = vmatmul.msk.bf16.gmra.mxu0 %vm424_vm1, %v5911_v17  ;;  %v5506_v16 = vld [vmem:[%s6076_s29 + $0x1c] sm:$0xf]  ;;  %v1456_v17 = vsel %vm6137_vm7, %v1454_v4, %v1455_v6  ;;  %v2275_v25 = vshrl.u32 %v5505_v15, 16  ;;  %v2278_v26 = vshll.u32 %v5505_v15, 16  ;;  %v1596_v31 = vunpack.c.l.b16 %v1453_v14 }
  0x26   : > { %v2284_v27 = vshll.u32 %v5506_v16, 16  ;;  %v2288_v28 = vshrl.u32 %v5506_v16, 16  ;;  %v1597_v32 = vunpack.c.l.b16 %v1456_v17  ;;  %v723_v6 = vrot.slane %v722_v53, 4  ;;  %v5508_v16 = vld [vmem:[%s6076_s29 + $0x24] sm:$0xf] }
  0x27   : > { %v2277_v41 = vrot.slane %v2275_v25, 4  ;;  %v2280_v42 = vrot.slane %v2278_v26, 5  ;;  %v1460_v15 = vsel %vm6137_vm7, %v5357_v2, %v1459_v52  ;;  %v5509_v17 = vld [vmem:[%s6076_s29 + $0x28] sm:$0xf]  ;;  %v638_v26 = vld [vmem:[%s6076_s29 + $0x20] sm:$0x1] }
  0x28   : > { %v2286_v43 = vrot.slane %v2284_v27, 5  ;;  %v2290_v44 = vrot.slane %v2288_v28, 4  ;;  %v1628_v50 = vpack.c.b16 %v1597_v32, %v1596_v31  ;;  %v2299_v27 = vshrl.u32 %v5508_v16, 16  ;;  %v5511_v2 = vld [vmem:[%s6076_s29 + $0x30] sm:$0xf] }
  0x29   : > { %v2281_v56 = vor.u32 %v2280_v42, %v2277_v41  ;;  %v2302_v28 = vshll.u32 %v5508_v16, 16  ;;  %v2308_v29 = vshll.u32 %v5509_v17, 16  ;;  %v2312_v30 = vshrl.u32 %v5509_v17, 16 }
  0x2a   : > { %v2291_v57 = vor.u32 %v2290_v44, %v2286_v43  ;;  %v749_v39 = vshll.u32 %v638_v26, 16  ;;  %v2301_v41 = vrot.slane %v2299_v27, 4  ;;  %v1466_v52 = vrot.slane %v1358_v40, 5 }
  0x2b   : > { %v2304_v42 = vrot.slane %v2302_v28, 5  ;;  %v2314_v44 = vrot.slane %v2312_v30, 4 }
  0x34   : > { %5329 = vmatmul.msk.bf16.gmra.mxu1 %vm424_vm1, %v5916_v18  ;;  %5333 = vmatmul.msk.bf16.gmra.mxu2 %vm424_vm1, %v5920_v19  ;;  %v2258_v18 = vrot.slane %v2257_v7, 4  ;;  %v2268_v19 = vrot.slane %v2267_v8, 4  ;;  %v2282_v7 = vrot.slane %v2281_v56, 4  ;;  %v2292_v8 = vrot.slane %v2291_v57, 4 }
  0x35   : > { %5337 = vmatmul.msk.bf16.gmra.mxu3 %vm424_vm1, %v5924_v20  ;;  %5325 = vmatmul.msk.bf16.gmra.mxu0 %vm424_vm1, %v5912_v21  ;;  %v2272_v20 = vrot.slane %v2270_v9, 5  ;;  %v706_v21 = vshrl.u32 %v633_v10, 16  ;;  %v2296_v9 = vrot.slane %v2294_v58, 5  ;;  %v2305_v56 = vor.u32 %v2304_v42, %v2301_v41 }
  0x36   : > { %v2263_v33 = vsel %vm6133_vm6, %v2258_v18, %v2262_v55  ;;  %v1356_v55 = vld [vmem:[%s6076_s29 + $0x14] sm:$0x1]  ;;  %v728_v18 = vsel %vm6133_vm6, %v723_v6, %v727_v61 }
  0x37   : > { %v2273_v34 = vsel %vm6133_vm6, %v2268_v19, %v2272_v20  ;;  %v708_v36 = vrot.slane %v706_v21, 4  ;;  %v2668_v45 = vunpack.c.l.b16 %v2263_v33  ;;  %v1462_v4 = vrot.slane %v1356_v55, 5  ;;  %v1359_v55 = vld [vmem:[%s6076_s29 + $0x20] sm:$0x1] }
  0x38   : > { %v2669_v46 = vunpack.c.l.b16 %v2273_v34  ;;  %v2287_v20 = vsel %vm6133_vm6, %v2282_v7, %v2286_v43  ;;  %v2297_v21 = vsel %vm6133_vm6, %v2292_v8, %v2296_v9  ;;  %v1102_v32 = vunpack.c.l.b16 %v728_v18  ;;  %v5512_v8 = vld [vmem:[%s6076_s29 + $0x34] sm:$0xf] }
  0x39   : > { %v712_v51 = vor.u32 %v711_v37, %v708_v36  ;;  %v1463_v19 = vsel %vm6137_vm7, %v1461_v3, %v1462_v4  ;;  %v1598_v33 = vunpack.c.l.b16 %v1460_v15  ;;  %v2670_v35 = vunpack.c.l.b16 %v2287_v20 }
  0x3a   : > { %v1599_v34 = vunpack.c.l.b16 %v1463_v19  ;;  %v2671_v36 = vunpack.c.l.b16 %v2297_v21  ;;  %v2310_v43 = vrot.slane %v2308_v29, 5  ;;  %v2306_v4 = vrot.slane %v2305_v56, 4  ;;  %v641_v29 = vld [vmem:[%s6076_s29 + $0x2c] sm:$0x1] }
  0x3b   : > { %v713_v1 = vrot.slane %v712_v51, 4  ;;  %v751_v51 = vrot.slane %v749_v39, 5  ;;  %v2332_v17 = vshll.u32 %v5512_v8, 16  ;;  %v2336_v18 = vshrl.u32 %v5512_v8, 16 }
  0x3c   : > { %v1629_v47 = vpack.c.b16 %v1599_v34, %v1598_v33  ;;  %v2315_v57 = vor.u32 %v2314_v44, %v2310_v43  ;;  %v2311_v21 = vsel %vm6133_vm6, %v2306_v4, %v2310_v43  ;;  %v1361_v34 = vld [vmem:[%s6076_s29 + $0x28] sm:$0xf]  ;;  %v773_v40 = vshll.u32 %v641_v29, 16  ;;  %v5515_v4 = vld [vmem:[%s6076_s29 + $0x40] sm:$0xf] }
  0x3d   : > { %v718_v14 = vsel %vm6133_vm6, %v713_v1, %v717_v38  ;;  %v1469_v1 = vrot.slane %v1359_v55, 5  ;;  %v1473_v43 = vrot.slane %v1361_v34, 5  ;;  %v1363_v29 = vld [vmem:[%s6076_s29 + $0x30] sm:$0xe] }
  0x3e   : > { %v1101_v31 = vunpack.c.l.b16 %v718_v14  ;;  %v2316_v6 = vrot.slane %v2315_v57, 4  ;;  %v2326_v14 = vshll.u32 %v5511_v2, 16 }
  0x3f   : > { %v1475_v56 = vrot.slane %v1473_v43, 4 }
  0x44   : > { %5330 = vmatmul.msk.bf16.gmra.mxu1 %vm424_vm1, %v5917_v59  ;;  %5334 = vmatmul.msk.bf16.gmra.mxu2 %vm424_vm1, %v5921_v60  ;;  %v5926_v59 = vld [vmem:[%s6076_s29 + $0xc] sm:$0xff]  ;;  %v2700_v60 = vpack.c.b16 %v2669_v46, %v2668_v45  ;;  %v1132_v46 = vpack.c.b16 %v1102_v32, %v1101_v31  ;;  %v2328_v31 = vrot.slane %v2326_v14, 5  ;;  %v2672_v32 = vunpack.c.l.b16 %v2311_v21 }
  0x45   : > { %5338 = vmatmul.msk.bf16.gmra.mxu3 %vm424_vm1, %v5925_v62  ;;  %5326 = vmatmul.msk.bf16.gmra.mxu0 %vm424_vm1, %v5913_v63  ;;  %v636_v62 = vld [vmem:[%s6076_s29 + $0x18] sm:$0xf]  ;;  %v637_v63 = vld [vmem:[%s6076_s29 + $0x1c] sm:$0xf]  ;;  %v5510_v45 = vld [vmem:[%s6076_s29 + $0x2c] sm:$0x1] }
  0x46   : > { %v730_v10 = vshrl.u32 %v636_v62, 16  ;;  %v733_v11 = vshll.u32 %v636_v62, 16  ;;  %v739_v12 = vshll.u32 %v637_v63, 16  ;;  %v743_v13 = vshrl.u32 %v637_v63, 16 }
  0x47   : > { %v2318_v58 = vshll.u32 %v5510_v45, 16  ;;  %v5358_v62 = vrot.slane %v1357_v54, 9  ;;  %v1468_v63 = vrot.slane %v1466_v52, 4  ;;  %v5928_v45 = vld [vmem:[%s6076_s29 + $0x24] sm:$0xff]  ;;  %v775_v54 = vrot.slane %v773_v40, 5 }
  0x48   : > { %v732_v22 = vrot.slane %v730_v10, 4  ;;  %v735_v23 = vrot.slane %v733_v11, 5  ;;  %v741_v24 = vrot.slane %v739_v12, 5  ;;  %v745_v25 = vrot.slane %v743_v13, 4  ;;  %v1365_v40 = vld [vmem:[%s6076_s29 + $0x38] sm:$0x1] }
  0x49   : > { %v2320_v7 = vrot.slane %v2318_v58, 5  ;;  %v2323_v13 = vshrl.u32 %v5511_v2, 16  ;;  %v1467_v15 = vsel %vm6137_vm7, %v5358_v62, %v1466_v52  ;;  %v1470_v16 = vsel %vm6137_vm7, %v1468_v63, %v1469_v1 }
  0x4a   : > { %v736_v37 = vor.u32 %v735_v23, %v732_v22  ;;  %v746_v38 = vor.u32 %v745_v25, %v741_v24  ;;  %v1600_v27 = vunpack.c.l.b16 %v1467_v15  ;;  %v1601_v28 = vunpack.c.l.b16 %v1470_v16 }
  0x4b   : > { %v2321_v22 = vsel %vm6133_vm6, %v2316_v6, %v2320_v7  ;;  %v2325_v30 = vrot.slane %v2323_v13, 4  ;;  %v2356_v16 = vshll.u32 %v5515_v4, 16 }
  0x4c   : > { %v747_v53 = vrot.slane %v746_v38, 4  ;;  %v2673_v33 = vunpack.c.l.b16 %v2321_v22  ;;  %v1630_v42 = vpack.c.b16 %v1601_v28, %v1600_v27 }
  0x4d   : > { %v2329_v44 = vor.u32 %v2328_v31, %v2325_v30  ;;  %v5516_v30 = vld [vmem:[%s6076_s29 + $0x44] sm:$0x1] }
  0x4e   : > { %v752_v3 = vsel %vm6133_vm6, %v747_v53, %v751_v51  ;;  %v642_v51 = vld [vmem:[%s6076_s29 + $0x30] sm:$0xf] }
  0x4f   : > { %v1104_v20 = vunpack.c.l.b16 %v752_v3  ;;  %v2330_v58 = vrot.slane %v2329_v44, 4  ;;  %v778_v62 = vshrl.u32 %v642_v51, 16  ;;  %v781_v63 = vshll.u32 %v642_v51, 16  ;;  %v5514_v3 = vld [vmem:[%s6076_s29 + $0x3c] sm:$0xf] }
  0x50   : > { %v2347_v14 = vshrl.u32 %v5514_v3, 16  ;;  %v2350_v15 = vshll.u32 %v5514_v3, 16  ;;  %v5360_v44 = vrot.slane %v1363_v29, 9  ;;  %v1483_v51 = vrot.slane %v1365_v40, 5  ;;  %v5930_v40 = vld [vmem:[%s6076_s29 + $0x3c] sm:$0xff] }
  0x51   : > { %v783_v13 = vrot.slane %v781_v63, 5 }
  0x52   : > { %v2349_v31 = vrot.slane %v2347_v14, 4 }
  0x54   : > { %5340 = vmatmul.msk.bf16.vlgmr.msrb.gmra.mxu1 %vm424_vm1, %v1131_v49  ;;  %5373 = vmatmul.msk.bf16.vlgmr.msrb.gmra.mxu2 %vm424_vm1, %v1628_v50  ;;  %v2701_v49 = vpack.c.b16 %v2671_v36, %v2670_v35  ;;  %v737_v50 = vrot.slane %v736_v37, 4  ;;  %v2334_v35 = vrot.slane %v2332_v17, 5  ;;  %v2338_v36 = vrot.slane %v2336_v18, 4  ;;  %v5513_v37 = vld [vmem:[%s6076_s29 + $0x38] sm:$0x1] }
  0x55   : > { %5486 = vmatmul.msk.bf16.vlgmr.msrb.gmra.mxu3 %vm424_vm1, %v5926_v59  ;;  %5551 = vmatmul.msk.bf16.vlgmr.msrb.gmra.mxu0 %vm424_vm1, %v2700_v60  ;;  %v639_v59 = vld [vmem:[%s6076_s29 + $0x24] sm:$0xf]  ;;  %v640_v60 = vld [vmem:[%s6076_s29 + $0x28] sm:$0xf]  ;;  %v2360_v17 = vshrl.u32 %v5515_v4, 16 }
  0x56   : > { %v742_v61 = vsel %vm6133_vm6, %v737_v50, %v741_v24  ;;  %v754_v9 = vshrl.u32 %v639_v59, 16  ;;  %v757_v10 = vshll.u32 %v639_v59, 16  ;;  %v763_v11 = vshll.u32 %v640_v60, 16  ;;  %v643_v59 = vld [vmem:[%s6076_s29 + $0x34] sm:$0xf] }
  0x57   : > { %v767_v12 = vshrl.u32 %v640_v60, 16  ;;  %v1103_v19 = vunpack.c.l.b16 %v742_v61  ;;  %v2342_v50 = vshll.u32 %v5513_v37, 16  ;;  %v787_v1 = vshll.u32 %v643_v59, 16 }
  0x58   : > { %v756_v23 = vrot.slane %v754_v9, 4  ;;  %v759_v24 = vrot.slane %v757_v10, 5  ;;  %v765_v25 = vrot.slane %v763_v11, 5  ;;  %v791_v2 = vshrl.u32 %v643_v59, 16 }
  0x59   : > { %v769_v26 = vrot.slane %v767_v12, 4  ;;  %v1133_v41 = vpack.c.b16 %v1104_v20, %v1103_v19  ;;  %v2344_v61 = vrot.slane %v2342_v50, 5  ;;  %v2335_v10 = vsel %vm6133_vm6, %v2330_v58, %v2334_v35  ;;  %v5518_v58 = vld [vmem:[%s6076_s29 + $0x4c] sm:$0xf] }
  0x5a   : > { %v760_v38 = vor.u32 %v759_v24, %v756_v23  ;;  %v780_v12 = vrot.slane %v778_v62, 4  ;;  %v789_v18 = vrot.slane %v787_v1, 5  ;;  %v793_v19 = vrot.slane %v791_v2, 4  ;;  %v644_v24 = vld [vmem:[%s6076_s29 + $0x38] sm:$0x1] }
  0x5b   : > { %v770_v39 = vor.u32 %v769_v26, %v765_v25  ;;  %v2674_v26 = vunpack.c.l.b16 %v2335_v10  ;;  %v2362_v34 = vrot.slane %v2360_v17, 4  ;;  %v647_v17 = vld [vmem:[%s6076_s29 + $0x44] sm:$0x1] }
  0x5c   : > { %v761_v52 = vrot.slane %v760_v38, 4  ;;  %v784_v28 = vor.u32 %v783_v13, %v780_v12 }
  0x5d   : > { %v771_v53 = vrot.slane %v770_v39, 4 }
  0x5e   : > { %v766_v6 = vsel %vm6133_vm6, %v761_v52, %v765_v25  ;;  %v1364_v25 = vld [vmem:[%s6076_s29 + $0x34] sm:$0xf]  ;;  %v645_v52 = vld [vmem:[%s6076_s29 + $0x3c] sm:$0xf] }
  0x5f   : > { %v776_v7 = vsel %vm6133_vm6, %v771_v53, %v775_v54  ;;  %v1105_v20 = vunpack.c.l.b16 %v766_v6  ;;  %v1480_v37 = vrot.slane %v1364_v25, 5  ;;  %v646_v53 = vld [vmem:[%s6076_s29 + $0x40] sm:$0xf]  ;;  %v805_v62 = vshll.u32 %v645_v52, 16 }
  0x60   : > { %v1106_v21 = vunpack.c.l.b16 %v776_v7  ;;  %v811_v2 = vshll.u32 %v646_v53, 16  ;;  %v815_v3 = vshrl.u32 %v646_v53, 16  ;;  %v2380_v7 = vshll.u32 %v5518_v58, 16  ;;  %v649_v53 = vld [vmem:[%s6076_s29 + $0x4c] sm:$0xf] }
  0x61   : > { %v1482_v50 = vrot.slane %v1480_v37, 4  ;;  %v807_v14 = vrot.slane %v805_v62, 5 }
  0x62   : > { %v1134_v38 = vpack.c.b16 %v1106_v21, %v1105_v20  ;;  %v1367_v20 = vld [vmem:[%s6076_s29 + $0x40] sm:$0xf] }
  0x63   : > { %v1484_v1 = vsel %vm6137_vm7, %v1482_v50, %v1483_v51 }
  0x64   : > { %5341 = vmatmul.msk.bf16.gmra.mxu1 %vm424_vm1, %v1132_v46  ;;  %5374 = vmatmul.msk.bf16.gmra.mxu2 %vm424_vm1, %v1629_v47  ;;  %v2702_v46 = vpack.c.b16 %v2673_v33, %v2672_v32  ;;  %v1360_v47 = vld [vmem:[%s6076_s29 + $0x24] sm:$0xe]  ;;  %v2352_v32 = vrot.slane %v2350_v15, 5  ;;  %v2358_v33 = vrot.slane %v2356_v16, 5  ;;  %v1605_v16 = vunpack.c.l.b16 %v1484_v1 }
  0x65   : > { %5487 = vmatmul.msk.bf16.gmra.mxu3 %vm424_vm1, %v5927_v48  ;;  %5552 = vmatmul.msk.bf16.gmra.mxu0 %vm424_vm1, %v2701_v49  ;;  %v1362_v48 = vld [vmem:[%s6076_s29 + $0x2c] sm:$0x1]  ;;  %v2339_v49 = vor.u32 %v2338_v36, %v2334_v35  ;;  %v5359_v55 = vrot.slane %v1360_v47, 9  ;;  %v794_v35 = vor.u32 %v793_v19, %v789_v18  ;;  %v797_v36 = vshll.u32 %v644_v24, 16 }
  0x66   : > { %v1476_v57 = vrot.slane %v1362_v48, 5  ;;  %v2363_v47 = vor.u32 %v2362_v34, %v2358_v33  ;;  %v817_v19 = vrot.slane %v815_v3, 4  ;;  %v835_v3 = vshll.u32 %v649_v53, 16 }
  0x67   : > { %v2340_v60 = vrot.slane %v2339_v49, 4  ;;  %v1474_v8 = vsel %vm6137_vm7, %v5359_v55, %v1473_v43  ;;  %v785_v43 = vrot.slane %v784_v28, 4  ;;  %v795_v48 = vrot.slane %v794_v35, 4  ;;  %v1368_v35 = vld [vmem:[%s6076_s29 + $0x44] sm:$0x1] }
  0x68   : > { %v1477_v9 = vsel %vm6137_vm7, %v1475_v56, %v1476_v57  ;;  %v1602_v22 = vunpack.c.l.b16 %v1474_v8  ;;  %v799_v49 = vrot.slane %v797_v36, 5  ;;  %v1481_v55 = vsel %vm6137_vm7, %v5360_v44, %v1480_v37  ;;  %v5517_v57 = vld [vmem:[%s6076_s29 + $0x48] sm:$0xf] }
  0x69   : > { %v2345_v11 = vsel %vm6133_vm6, %v2340_v60, %v2344_v61  ;;  %v1603_v23 = vunpack.c.l.b16 %v1477_v9  ;;  %v790_v54 = vsel %vm6133_vm6, %v785_v43, %v789_v18  ;;  %v2364_v60 = vrot.slane %v2363_v47, 4 }
  0x6a   : > { %v2675_v27 = vunpack.c.l.b16 %v2345_v11  ;;  %v802_v61 = vshrl.u32 %v645_v52, 16  ;;  %v800_v63 = vsel %vm6133_vm6, %v795_v48, %v799_v49  ;;  %v2371_v4 = vshrl.u32 %v5517_v57, 16  ;;  %v648_v52 = vld [vmem:[%s6076_s29 + $0x48] sm:$0xf] }
  0x6b   : > { %v1631_v39 = vpack.c.b16 %v1603_v23, %v1602_v22  ;;  %v2374_v6 = vshll.u32 %v5517_v57, 16  ;;  %v2384_v8 = vshrl.u32 %v5518_v58, 16  ;;  %v1107_v9 = vunpack.c.l.b16 %v790_v54  ;;  %v5521_v57 = vld [vmem:[%s6076_s29 + $0x58] sm:$0xf] }
  0x6c   : > { %v1604_v10 = vunpack.c.l.b16 %v1481_v55  ;;  %v804_v13 = vrot.slane %v802_v61, 4  ;;  %v1108_v15 = vunpack.c.l.b16 %v800_v63  ;;  %v813_v18 = vrot.slane %v811_v2, 5 }
  0x6d   : > { %v2373_v21 = vrot.slane %v2371_v4, 4  ;;  %v2376_v22 = vrot.slane %v2374_v6, 5  ;;  %v2382_v23 = vrot.slane %v2380_v7, 5  ;;  %v2386_v24 = vrot.slane %v2384_v8, 4 }
  0x6e   : > { %v808_v28 = vor.u32 %v807_v14, %v804_v13  ;;  %v1135_v29 = vpack.c.b16 %v1108_v15, %v1107_v9  ;;  %v1632_v34 = vpack.c.b16 %v1605_v16, %v1604_v10  ;;  %v1490_v48 = vrot.slane %v1368_v35, 5 }
  0x6f   : > { %v2377_v36 = vor.u32 %v2376_v22, %v2373_v21  ;;  %v2387_v37 = vor.u32 %v2386_v24, %v2382_v23  ;;  %v826_v61 = vshrl.u32 %v648_v52, 16  ;;  %v829_v62 = vshll.u32 %v648_v52, 16  ;;  %v5522_v24 = vld [vmem:[%s6076_s29 + $0x5c] sm:$0x1] }
  0x70   : > { %v809_v43 = vrot.slane %v808_v28, 4  ;;  %v839_v4 = vshrl.u32 %v649_v53, 16  ;;  %v2404_v9 = vshll.u32 %v5521_v57, 16  ;;  %v2408_v10 = vshrl.u32 %v5521_v57, 16 }
  0x71   : > { %v2378_v49 = vrot.slane %v2377_v36, 4  ;;  %v2388_v50 = vrot.slane %v2387_v37, 4  ;;  %v828_v16 = vrot.slane %v826_v61, 4  ;;  %v6304_v21 = vrot.slane %v835_v3, 5  ;;  %v1369_v36 = vld [vmem:[%s6076_s29 + $0x48] sm:$0xe] }
  0x72   : > { %v814_v54 = vsel %vm6133_vm6, %v809_v43, %v813_v18  ;;  %v841_v22 = vrot.slane %v839_v4, 4  ;;  %v2410_v28 = vrot.slane %v2408_v10, 4  ;;  %v5523_v3 = vld [vmem:[%s6076_s29 + $0x60] sm:$0xf]  ;;  %v5524_v4 = vld [vmem:[%s6076_s29 + $0x64] sm:$0xf] }
  0x73   : > { %v2383_v1 = vsel %vm6133_vm6, %v2378_v49, %v2382_v23  ;;  %v1370_v23 = vld [vmem:[%s6076_s29 + $0x4c] sm:$0xf] }
  0x74   : > { %5342 = vmatmul.msk.bf16.gmra.mxu1 %vm424_vm1, %v1133_v41  ;;  %5375 = vmatmul.msk.bf16.gmra.mxu2 %vm424_vm1, %v1630_v42  ;;  %v5929_v41 = vld [vmem:[%s6076_s29 + $0x30] sm:$0xff]  ;;  %v2703_v42 = vpack.c.b16 %v2675_v27, %v2674_v26  ;;  %v842_v35 = vor.u32 %v841_v22, %v6304_v21  ;;  %v1494_v37 = vrot.slane %v1370_v23, 5  ;;  %v2432_v22 = vshrl.u32 %v5524_v4, 16 }
  0x75   : > { %5488 = vmatmul.msk.bf16.gmra.mxu3 %vm424_vm1, %v5928_v45  ;;  %5553 = vmatmul.msk.bf16.gmra.mxu0 %vm424_vm1, %v2702_v46  ;;  %v2366_v45 = vshll.u32 %v5516_v30, 16  ;;  %v2353_v46 = vor.u32 %v2352_v32, %v2349_v31  ;;  %v5519_v27 = vld [vmem:[%s6076_s29 + $0x50] sm:$0x1]  ;;  %v818_v30 = vor.u32 %v817_v19, %v813_v18  ;;  %v821_v31 = vshll.u32 %v647_v17, 16  ;;  %v1366_v32 = vld [vmem:[%s6076_s29 + $0x3c] sm:$0xe] }
  0x76   : > { %v5361_v44 = vrot.slane %v1366_v32, 9  ;;  %v831_v17 = vrot.slane %v829_v62, 5  ;;  %v2678_v18 = vunpack.c.l.b16 %v2383_v1  ;;  %v843_v52 = vrot.slane %v842_v35, 4 }
  0x77   : > { %v2368_v56 = vrot.slane %v2366_v45, 5  ;;  %v2354_v59 = vrot.slane %v2353_v46, 4  ;;  %v819_v45 = vrot.slane %v818_v30, 4  ;;  %v823_v46 = vrot.slane %v821_v31, 5 }
  0x78   : > { %v832_v31 = vor.u32 %v831_v17, %v828_v16  ;;  %v1496_v53 = vrot.slane %v1494_v37, 4 }
  0x79   : > { %v2359_v11 = vsel %vm6133_vm6, %v2354_v59, %v2358_v33  ;;  %v2369_v12 = vsel %vm6133_vm6, %v2364_v60, %v2368_v56  ;;  %v1487_v33 = vrot.slane %v1367_v20, 5  ;;  %v5520_v56 = vld [vmem:[%s6076_s29 + $0x54] sm:$0xf]  ;;  %v824_v59 = vsel %vm6133_vm6, %v819_v45, %v823_v46  ;;  %v650_v20 = vld [vmem:[%s6076_s29 + $0x50] sm:$0x1] }
  0x7a   : > { %v2676_v25 = vunpack.c.l.b16 %v2359_v11  ;;  %v2677_v26 = vunpack.c.l.b16 %v2369_v12  ;;  %v2395_v7 = vshrl.u32 %v5520_v56, 16  ;;  %v2398_v8 = vshll.u32 %v5520_v56, 16  ;;  %v652_v56 = vld [vmem:[%s6076_s29 + $0x58] sm:$0xf] }
  0x7b   : > { %v1489_v47 = vrot.slane %v1487_v33, 4  ;;  %v1488_v55 = vsel %vm6137_vm7, %v5361_v44, %v1487_v33  ;;  %v1109_v12 = vunpack.c.l.b16 %v814_v54  ;;  %v1110_v14 = vunpack.c.l.b16 %v824_v59  ;;  %v1371_v44 = vld [vmem:[%s6076_s29 + $0x50] sm:$0x1] }
  0x7c   : > { %v1606_v13 = vunpack.c.l.b16 %v1488_v55  ;;  %v845_v32 = vshll.u32 %v650_v20, 16  ;;  %v833_v49 = vrot.slane %v832_v31, 4  ;;  %v1497_v54 = vrot.slane %v1371_v44, 5  ;;  %v1373_v31 = vld [vmem:[%s6076_s29 + $0x58] sm:$0xf] }
  0x7d   : > { %v1491_v60 = vsel %vm6137_vm7, %v1489_v47, %v1490_v48  ;;  %v1136_v30 = vpack.c.b16 %v1110_v14, %v1109_v12  ;;  %v651_v48 = vld [vmem:[%s6076_s29 + $0x54] sm:$0xf]  ;;  %v859_v1 = vshll.u32 %v652_v56, 16  ;;  %v2422_v20 = vshll.u32 %v5523_v3, 16 }
  0x7e   : > { %v1607_v15 = vunpack.c.l.b16 %v1491_v60  ;;  %v850_v60 = vshrl.u32 %v651_v48, 16  ;;  %v853_v61 = vshll.u32 %v651_v48, 16  ;;  %v1498_v12 = vsel %vm6137_vm7, %v1496_v53, %v1497_v54  ;;  %v1374_v53 = vld [vmem:[%s6076_s29 + $0x5c] sm:$0x1] }
  0x7f   : > { %v6353_v23 = vrot.slane %v859_v1, 5  ;;  %v2434_v44 = vrot.slane %v2432_v22, 4 }
  0x80   : > { %v852_v16 = vrot.slane %v850_v60, 4  ;;  %v855_v17 = vrot.slane %v853_v61, 5 }
  0x82   : > { %v856_v35 = vor.u32 %v855_v17, %v852_v16  ;;  %v5526_v17 = vld [vmem:[%s6076_s29 + $0x6c] sm:$0xf] }
  0x84   : > { %5343 = vmatmul.msk.bf16.gmra.mxu1 %vm424_vm1, %v1134_v38  ;;  %5376 = vmatmul.msk.bf16.gmra.mxu2 %vm424_vm1, %v1631_v39  ;;  %v2390_v38 = vshll.u32 %v5519_v27, 16  ;;  %v6308_v27 = vrot.slane %v2404_v9, 5 }
  0x85   : > { %5489 = vmatmul.msk.bf16.gmra.mxu3 %vm424_vm1, %v5929_v41  ;;  %5554 = vmatmul.msk.bf16.gmra.mxu0 %vm424_vm1, %v2703_v42  ;;  %v2704_v41 = vpack.c.b16 %v2677_v26, %v2676_v25  ;;  %v2397_v25 = vrot.slane %v2395_v7, 4  ;;  %v2400_v26 = vrot.slane %v2398_v8, 5  ;;  %v838_v8 = vsel %vm6133_vm6, %v833_v49, %v6304_v21 }
  0x86   : > { %v2392_v51 = vrot.slane %v2390_v38, 5  ;;  %v2414_v38 = vshll.u32 %v5522_v24, 16  ;;  %v2411_v46 = vor.u32 %v2410_v28, %v6308_v27  ;;  %v2428_v21 = vshll.u32 %v5524_v4, 16 }
  0x87   : > { %v2401_v45 = vor.u32 %v2400_v26, %v2397_v25  ;;  %v1111_v25 = vunpack.c.l.b16 %v838_v8  ;;  %v1609_v28 = vunpack.c.l.b16 %v1498_v12  ;;  %v1501_v49 = vrot.slane %v1373_v31, 5  ;;  %v655_v12 = vld [vmem:[%s6076_s29 + $0x64] sm:$0xf] }
  0x88   : > { %v2393_v2 = vsel %vm6133_vm6, %v2388_v50, %v2392_v51  ;;  %v847_v50 = vrot.slane %v845_v32, 5  ;;  %v5362_v51 = vrot.slane %v1369_v36, 9  ;;  %v2416_v55 = vrot.slane %v2414_v38, 5  ;;  %v1372_v36 = vld [vmem:[%s6076_s29 + $0x54] sm:$0xe] }
  0x89   : > { %v2679_v19 = vunpack.c.l.b16 %v2393_v2  ;;  %v2402_v57 = vrot.slane %v2401_v45, 4  ;;  %v2412_v59 = vrot.slane %v2411_v46, 4  ;;  %v863_v2 = vshrl.u32 %v652_v56, 16 }
  0x8a   : > { %v848_v9 = vsel %vm6133_vm6, %v843_v52, %v847_v50  ;;  %v1495_v10 = vsel %vm6137_vm7, %v5362_v51, %v1494_v37  ;;  %v5525_v37 = vld [vmem:[%s6076_s29 + $0x68] sm:$0x1]  ;;  %v1503_v8 = vrot.slane %v1501_v49, 4  ;;  %v2443_v31 = vshrl.u32 %v5526_v17, 16 }
  0x8b   : > { %v2705_v43 = vpack.c.b16 %v2679_v19, %v2678_v18  ;;  %v2407_v14 = vsel %vm6133_vm6, %v2402_v57, %v6308_v27  ;;  %v2419_v19 = vshrl.u32 %v5523_v3, 16  ;;  %v865_v24 = vrot.slane %v863_v2, 4 }
  0x8c   : > { %v1112_v26 = vunpack.c.l.b16 %v848_v9  ;;  %v1608_v27 = vunpack.c.l.b16 %v1495_v10  ;;  %v2680_v32 = vunpack.c.l.b16 %v2407_v14  ;;  %v857_v57 = vrot.slane %v856_v35, 4  ;;  %v654_v10 = vld [vmem:[%s6076_s29 + $0x60] sm:$0xf] }
  0x8d   : > { %v2421_v38 = vrot.slane %v2419_v19, 4  ;;  %v866_v46 = vor.u32 %v865_v24, %v6353_v23  ;;  %v2438_v60 = vshll.u32 %v5525_v37, 16  ;;  %v1504_v9 = vrot.slane %v1374_v53, 5  ;;  %v5527_v19 = vld [vmem:[%s6076_s29 + $0x70] sm:$0xf] }
  0x8e   : > { %v1137_v51 = vpack.c.b16 %v1112_v26, %v1111_v25  ;;  %v1634_v52 = vpack.c.b16 %v1609_v28, %v1608_v27  ;;  %v862_v14 = vsel %vm6133_vm6, %v857_v57, %v6353_v23  ;;  %v874_v22 = vshrl.u32 %v654_v10, 16  ;;  %v656_v53 = vld [vmem:[%s6076_s29 + $0x68] sm:$0x1]  ;;  %v1376_v57 = vld [vmem:[%s6076_s29 + $0x64] sm:$0xf] }
  0x8f   : > { %v867_v3 = vrot.slane %v866_v46, 4  ;;  %v2440_v16 = vrot.slane %v2438_v60, 5  ;;  %v877_v24 = vshll.u32 %v654_v10, 16  ;;  %v1505_v27 = vsel %vm6137_vm7, %v1503_v8, %v1504_v9 }
  0x90   : > { %v883_v28 = vshll.u32 %v655_v12, 16  ;;  %v887_v23 = vshrl.u32 %v655_v12, 16  ;;  %v2456_v35 = vshrl.u32 %v5527_v19, 16  ;;  %v1113_v37 = vunpack.c.l.b16 %v862_v14 }
  0x91   : > { %v6270_v39 = vpop.f32.mrf.mxu1  ;;  %v893_v14 = vshll.u32 %v656_v53, 16 }
  0x92   : > { %v6273_v42 = vpop.f32.mrf.mxu0 }
  0x94   : > { %5344 = vmatmul.msk.bf16.gmra.mxu1 %vm424_vm1, %v1135_v29  ;;  %5377 = vmatmul.msk.bf16.gmra.mxu2 %vm424_vm1, %v1632_v34  ;;  %v1633_v34 = vpack.c.b16 %v1607_v15, %v1606_v13  ;;  %v2417_v15 = vsel %vm6133_vm6, %v2412_v59, %v2416_v55  ;;  %v5932_v55 = vld [vmem:[%s6076_s29 + $0x54] sm:$0xff]  ;;  %v5363_v59 = vrot.slane %v1372_v36, 9 }
  0x95   : > { %5490 = vmatmul.msk.bf16.gmra.mxu3 %vm424_vm1, %v5930_v40  ;;  %5555 = vmatmul.msk.bf16.gmra.mxu0 %vm424_vm1, %v2704_v41  ;;  %v5931_v41 = vld [vmem:[%s6076_s29 + $0x48] sm:$0xff] }
  0x97   : > { %v6287_v58 = vpop.f32.mrf.mxu2 }
  0x98   : > { %v6293_v63 = vpop.f32.mrf.mxu3 }
  0x99   : > { %v6299_v6 = vpop.f32.mrf.mxu1 }
  0x9a   : > { %v6301_v11 = vpop.f32.mrf.mxu0 }
  0x9f   : > { %v6310_v29 = vpop.f32.mrf.mxu2 }
  0xa0   : > { %v6312_v33 = vpop.f32.mrf.mxu3 }
  0xa1   : > { %7412 = vst [vmem:[#allocation3_spill] sm:$0xff] %v6312_v33  ;;  %v6316_v40 = vpop.f32.mrf.mxu1 }
  0xa2   : > { %v6321_v47 = vpop.f32.mrf.mxu0 }
  0xa4   : > { %5345 = vmatmul.msk.bf16.gmra.mxu1 %vm424_vm1, %v1136_v30  ;;  %5378 = vmatmul.msk.bf16.gmra.mxu2 %vm424_vm1, %v1633_v34  ;;  %v653_v30 = vld [vmem:[%s6076_s29 + $0x5c] sm:$0x1]  ;;  %v2681_v34 = vunpack.c.l.b16 %v2417_v15  ;;  %v1502_v15 = vsel %vm6137_vm7, %v5363_v59, %v1501_v49  ;;  %v879_v49 = vrot.slane %v877_v24, 5  ;;  %v2445_v59 = vrot.slane %v2443_v31, 4 }
  0xa5   : > { %5491 = vmatmul.msk.bf16.gmra.mxu3 %vm424_vm1, %v5931_v41  ;;  %5556 = vmatmul.msk.bf16.gmra.mxu0 %vm424_vm1, %v2705_v43  ;;  %v2424_v41 = vrot.slane %v2422_v20, 5  ;;  %v6359_v43 = vrot.slane %v2428_v21, 5  ;;  %v869_v48 = vshll.u32 %v653_v30, 16 }
  0xa6   : > { %v2706_v56 = vpack.c.b16 %v2681_v34, %v2680_v32  ;;  %v2446_v32 = vshll.u32 %v5526_v17, 16  ;;  %v2452_v34 = vshll.u32 %v5527_v19, 16  ;;  %v1375_v19 = vld [vmem:[%s6076_s29 + $0x60] sm:$0xe] }
  0xa7   : > { %v6329_v62 = vpop.f32.mrf.mxu2  ;;  %v2425_v1 = vor.u32 %v2424_v41, %v2421_v38  ;;  %v2435_v2 = vor.u32 %v2434_v44, %v6359_v43  ;;  %v871_v4 = vrot.slane %v869_v48, 5  ;;  %v1610_v38 = vunpack.c.l.b16 %v1502_v15 }
  0xa8   : > { %v6333_v7 = vpop.f32.mrf.mxu3  ;;  %v876_v48 = vrot.slane %v874_v22, 4  ;;  %v2448_v60 = vrot.slane %v2446_v32, 5  ;;  %v1508_v15 = vrot.slane %v1376_v57, 5  ;;  %v5530_v57 = vld [vmem:[%s6076_s29 + $0x7c] sm:$0xf] }
  0xa9   : > { %7413 = vst [vmem:[#allocation4_spill] sm:$0xff] %v6333_v7  ;;  %v6344_v13 = vpop.f32.mrf.mxu1  ;;  %v2426_v20 = vrot.slane %v2425_v1, 4  ;;  %v2436_v21 = vrot.slane %v2435_v2, 4  ;;  %v872_v26 = vsel %vm6133_vm6, %v867_v3, %v871_v4  ;;  %v6407_v1 = vrot.slane %v2452_v34, 5  ;;  %v5528_v4 = vld [vmem:[%s6076_s29 + $0x74] sm:$0x1] }
  0xaa   : > { %v6351_v18 = vpop.f32.mrf.mxu0  ;;  %v2458_v2 = vrot.slane %v2456_v35, 4  ;;  %v880_v8 = vor.u32 %v879_v49, %v876_v48  ;;  %v2462_v22 = vshll.u32 %v5528_v4, 16  ;;  %v895_v34 = vrot.slane %v893_v14, 5  ;;  %v663_v7 = vld [vmem:[%s6076_s29 + $0x84] sm:$0xf] }
  0xab   : > { %v2431_v44 = vsel %vm6133_vm6, %v2426_v20, %v6359_v43  ;;  %v2441_v46 = vsel %vm6133_vm6, %v2436_v21, %v2440_v16  ;;  %v2449_v20 = vor.u32 %v2448_v60, %v2445_v59  ;;  %v5364_v35 = vrot.slane %v1375_v19, 9 }
  0xac   : > { %v2682_v43 = vunpack.c.l.b16 %v2431_v44  ;;  %v2683_v3 = vunpack.c.l.b16 %v2441_v46  ;;  %v2459_v21 = vor.u32 %v2458_v2, %v6407_v1  ;;  %v881_v31 = vrot.slane %v880_v8, 4 }
  0xad   : > { %v2450_v46 = vrot.slane %v2449_v20, 4  ;;  %v2464_v49 = vrot.slane %v2462_v22, 5  ;;  %v1509_v2 = vsel %vm6137_vm7, %v5364_v35, %v1508_v15  ;;  %v2476_v19 = vshll.u32 %v5530_v57, 16 }
  0xae   : > { %v2460_v48 = vrot.slane %v2459_v21, 4  ;;  %v2480_v20 = vshrl.u32 %v5530_v57, 16 }
  0xaf   : > { %v6361_v45 = vpop.f32.mrf.mxu2 }
  0xb0   : > { %v6364_v50 = vpop.f32.mrf.mxu3 }
  0xb1   : > { %7414 = vst [vmem:[#allocation5_spill] sm:$0xff] %v6364_v50  ;;  %v6367_v54 = vpop.f32.mrf.mxu1  ;;  %v1383_v50 = vld [vmem:[%s6076_s29 + $0x80] sm:$0x1] }
  0xb2   : > { %v6370_v61 = vpop.f32.mrf.mxu0 }
  0xb4   : > { %5346 = vmatmul.msk.bf16.gmra.mxu1 %vm424_vm1, %v1137_v51  ;;  %5379 = vmatmul.msk.bf16.gmra.mxu2 %vm424_vm1, %v1634_v52  ;;  %v1114_v51 = vunpack.c.l.b16 %v872_v26  ;;  %v1611_v52 = vunpack.c.l.b16 %v1505_v27  ;;  %v5933_v26 = vld [vmem:[%s6076_s29 + $0x60] sm:$0xff]  ;;  %v2707_v27 = vpack.c.b16 %v2683_v3, %v2682_v43 }
  0xb5   : > { %5492 = vmatmul.msk.bf16.gmra.mxu3 %vm424_vm1, %v5932_v55  ;;  %5557 = vmatmul.msk.bf16.gmra.mxu0 %vm424_vm1, %v2706_v56  ;;  %v6404_v55 = vrot.slane %v883_v28, 5  ;;  %v889_v56 = vrot.slane %v887_v23, 4  ;;  %v1377_v28 = vld [vmem:[%s6076_s29 + $0x68] sm:$0x1] }
  0xb6   : > { %v1138_v10 = vpack.c.b16 %v1114_v51, %v1113_v37  ;;  %v1635_v17 = vpack.c.b16 %v1611_v52, %v1610_v38  ;;  %v1510_v37 = vrot.slane %v1508_v15, 4  ;;  %v657_v38 = vld [vmem:[%s6076_s29 + $0x6c] sm:$0xf]  ;;  %v1511_v44 = vrot.slane %v1377_v28, 5  ;;  %v658_v51 = vld [vmem:[%s6076_s29 + $0x70] sm:$0xf] }
  0xb7   : > { %v6386_v25 = vpop.f32.mrf.mxu2  ;;  %v890_v12 = vor.u32 %v889_v56, %v6404_v55  ;;  %v898_v52 = vshrl.u32 %v657_v38, 16  ;;  %v901_v53 = vshll.u32 %v657_v38, 16  ;;  %v5529_v56 = vld [vmem:[%s6076_s29 + $0x78] sm:$0xf]  ;;  %v886_v60 = vsel %vm6133_vm6, %v881_v31, %v6404_v55  ;;  %v659_v38 = vld [vmem:[%s6076_s29 + $0x74] sm:$0x1] }
  0xb8   : > { %v6392_v30 = vpop.f32.mrf.mxu3  ;;  %v907_v43 = vshll.u32 %v658_v51, 16  ;;  %v911_v3 = vshrl.u32 %v658_v51, 16  ;;  %v2465_v55 = vsel %vm6133_vm6, %v2460_v48, %v2464_v49  ;;  %v2467_v15 = vshrl.u32 %v5529_v56, 16 }
  0xb9   : > { %7415 = vst [vmem:[#allocation6_spill] sm:$0xff] %v6392_v30  ;;  %v6394_v36 = vpop.f32.mrf.mxu1  ;;  %v891_v32 = vrot.slane %v890_v12, 4  ;;  %v2455_v12 = vsel %vm6133_vm6, %v2450_v46, %v6407_v1  ;;  %v900_v22 = vrot.slane %v898_v52, 4  ;;  %v1612_v28 = vunpack.c.l.b16 %v1509_v2  ;;  %v5531_v46 = vld [vmem:[%s6076_s29 + $0x80] sm:$0x1] }
  0xba   : > { %v6396_v41 = vpop.f32.mrf.mxu0  ;;  %v6453_v31 = vrot.slane %v907_v43, 5  ;;  %v913_v1 = vrot.slane %v911_v3, 4  ;;  %v2684_v35 = vunpack.c.l.b16 %v2455_v12  ;;  %v2469_v48 = vrot.slane %v2467_v15, 4  ;;  %v5934_v15 = vld [vmem:[%s6076_s29 + $0x6c] sm:$0xff] }
  0xbb   : > { %v896_v8 = vsel %vm6133_vm6, %v891_v32, %v895_v34  ;;  %v6458_v51 = vrot.slane %v2476_v19, 5  ;;  %v2482_v52 = vrot.slane %v2480_v20, 4  ;;  %v2486_v12 = vshll.u32 %v5531_v46, 16  ;;  %v1380_v19 = vld [vmem:[%s6076_s29 + $0x74] sm:$0x1] }
  0xbc   : > { %v1116_v32 = vunpack.c.l.b16 %v896_v8  ;;  %v914_v57 = vor.u32 %v913_v1, %v6453_v31  ;;  %v661_v46 = vld [vmem:[%s6076_s29 + $0x7c] sm:$0xf] }
  0xbf   : > { %v6410_v9 = vpop.f32.mrf.mxu2 }
  0xc0   : > { %v6413_v16 = vpop.f32.mrf.mxu3 }
  0xc1   : > { %7416 = vst [vmem:[#allocation7_spill] sm:$0xff] %v6413_v16  ;;  %v6417_v24 = vpop.f32.mrf.mxu1 }
  0xc2   : > { %v6421_v23 = vpop.f32.mrf.mxu0 }
  0xc4   : > { %5347 = vmatmul.msk.bf16.gmra.mxu1 %vm424_vm1, %v1138_v10  ;;  %5380 = vmatmul.msk.bf16.gmra.mxu2 %vm424_vm1, %v1635_v17  ;;  %v1512_v10 = vsel %vm6137_vm7, %v1510_v37, %v1511_v44  ;;  %v2470_v17 = vshll.u32 %v5529_v56, 16  ;;  %v2685_v37 = vunpack.c.l.b16 %v2465_v55  ;;  %v1379_v44 = vld [vmem:[%s6076_s29 + $0x70] sm:$0xf] }
  0xc5   : > { %5493 = vmatmul.msk.bf16.gmra.mxu3 %vm424_vm1, %v5933_v26  ;;  %5558 = vmatmul.msk.bf16.gmra.mxu0 %vm424_vm1, %v2707_v27  ;;  %v903_v26 = vrot.slane %v901_v53, 5  ;;  %v1115_v27 = vunpack.c.l.b16 %v886_v60  ;;  %v1613_v34 = vunpack.c.l.b16 %v1512_v10  ;;  %v917_v60 = vshll.u32 %v659_v38, 16  ;;  %v1378_v10 = vld [vmem:[%s6076_s29 + $0x6c] sm:$0xe] }
  0xc6   : > { %v2472_v49 = vrot.slane %v2470_v17, 5  ;;  %v1515_v2 = vrot.slane %v1379_v44, 5  ;;  %v2708_v17 = vpack.c.b16 %v2685_v37, %v2684_v35  ;;  %v660_v44 = vld [vmem:[%s6076_s29 + $0x78] sm:$0xf]  ;;  %v1518_v35 = vrot.slane %v1380_v19, 5 }
  0xc7   : > { %v6431_v59 = vpop.f32.mrf.mxu2  ;;  %v904_v53 = vor.u32 %v903_v26, %v900_v22  ;;  %v1139_v3 = vpack.c.b16 %v1116_v32, %v1115_v27  ;;  %v1636_v8 = vpack.c.b16 %v1613_v34, %v1612_v28  ;;  %v2483_v22 = vor.u32 %v2482_v52, %v6458_v51 }
  0xc8   : > { %v6438_v4 = vpop.f32.mrf.mxu3  ;;  %v2473_v20 = vor.u32 %v2472_v49, %v2469_v48  ;;  %v915_v27 = vrot.slane %v914_v57, 4  ;;  %v919_v28 = vrot.slane %v917_v60, 5  ;;  %v5365_v32 = vrot.slane %v1378_v10, 9  ;;  %v5532_v48 = vld [vmem:[%s6076_s29 + $0x84] sm:$0xf] }
  0xc9   : > { %7417 = vst [vmem:[#allocation8_spill] sm:$0xff] %v6438_v4  ;;  %v6449_v14 = vpop.f32.mrf.mxu1  ;;  %v905_v38 = vrot.slane %v904_v53, 4  ;;  %v1517_v34 = vrot.slane %v1515_v2, 4  ;;  %v2488_v37 = vrot.slane %v2486_v12, 5  ;;  %v5533_v49 = vld [vmem:[%s6076_s29 + $0x88] sm:$0xf] }
  0xca   : > { %v6451_v21 = vpop.f32.mrf.mxu0  ;;  %v2484_v52 = vrot.slane %v2483_v22, 4  ;;  %v922_v53 = vshrl.u32 %v660_v44, 16  ;;  %v925_v57 = vshll.u32 %v660_v44, 16  ;;  %v931_v10 = vshll.u32 %v661_v46, 16 }
  0xcb   : > { %v910_v60 = vsel %vm6133_vm6, %v905_v38, %v6453_v31  ;;  %v2494_v19 = vshll.u32 %v5532_v48, 16  ;;  %v2500_v12 = vshll.u32 %v5533_v49, 16  ;;  %v1519_v31 = vsel %vm6137_vm7, %v1517_v34, %v1518_v35  ;;  %v1382_v34 = vld [vmem:[%s6076_s29 + $0x7c] sm:$0xf] }
  0xcc   : > { %v2489_v44 = vsel %vm6133_vm6, %v2484_v52, %v2488_v37  ;;  %v1522_v30 = vrot.slane %v1382_v34, 5 }
  0xcd   : > { %v6499_v16 = vrot.slane %v2500_v12, 5 }
  0xcf   : > { %v6460_v56 = vpop.f32.mrf.mxu2 }
  0xd0   : > { %v6463_v43 = vpop.f32.mrf.mxu3 }
  0xd1   : > { %7418 = vst [vmem:[#allocation9_spill] sm:$0xff] %v6463_v43  ;;  %v1207_v55 = vpop.f32.mrf.mxu1  ;;  %v2504_v43 = vshrl.u32 %v5533_v49, 16  ;;  %v662_v49 = vld [vmem:[%s6076_s29 + $0x80] sm:$0x1] }
  0xd2   : > { %v1287_v26 = vadd.f32 %v1207_v55, %v6273_v42  ;;  %v6470_v1 = vpop.f32.mrf.mxu0  ;;  %v2474_v42 = vrot.slane %v2473_v20, 4  ;;  %v1516_v20 = vsel %vm6137_vm7, %v5365_v32, %v1515_v2  ;;  %v6496_v2 = vrot.slane %v931_v10, 5 }
  0xd3   : > { %v1614_v52 = vunpack.c.l.b16 %v1516_v20  ;;  %v941_v10 = vshll.u32 %v662_v49, 16 }
  0xd4   : > { %5348 = vmatmul.msk.bf16.gmra.mxu1 %vm424_vm1, %v1139_v3  ;;  %5381 = vmatmul.msk.bf16.gmra.mxu2 %vm424_vm1, %v1636_v8  ;;  %v935_v3 = vshrl.u32 %v661_v46, 16  ;;  %v2491_v8 = vshrl.u32 %v5532_v48, 16  ;;  %v2479_v38 = vsel %vm6133_vm6, %v2474_v42, %v6458_v51  ;;  %v927_v46 = vrot.slane %v925_v57, 5  ;;  %v5534_v57 = vld [vmem:[%s6076_s29 + $0x8c] sm:$0x1] }
  0xd5   : > { %5494 = vmatmul.msk.bf16.gmra.mxu3 %vm424_vm1, %v5934_v15  ;;  %5559 = vmatmul.msk.bf16.gmra.mxu0 %vm424_vm1, %v2708_v17  ;;  %v920_v17 = vsel %vm6133_vm6, %v915_v27, %v919_v28  ;;  %v2506_v51 = vrot.slane %v2504_v43, 4  ;;  %v1117_v42 = vunpack.c.l.b16 %v910_v60  ;;  %v2510_v60 = vshll.u32 %v5534_v57, 16 }
  0xd6   : > { %v937_v32 = vrot.slane %v935_v3, 4  ;;  %v2493_v35 = vrot.slane %v2491_v8, 4  ;;  %v1118_v37 = vunpack.c.l.b16 %v920_v17  ;;  %v943_v49 = vrot.slane %v941_v10, 5 }
  0xd7   : > { %v1704_v55 = vpop.f32.mrf.mxu2  ;;  %v2507_v43 = vor.u32 %v2506_v51, %v6499_v16  ;;  %v1524_v51 = vrot.slane %v1522_v30, 4  ;;  %v946_v57 = vshrl.u32 %v663_v7, 16 }
  0xd8   : > { %v1784_v4 = vadd.f32 %v1704_v55, %v1287_v26  ;;  %v2058_v15 = vpop.f32.mrf.mxu3  ;;  %v924_v26 = vrot.slane %v922_v53, 4  ;;  %v2496_v55 = vrot.slane %v2494_v19, 5  ;;  %v1615_v53 = vunpack.c.l.b16 %v1519_v31 }
  0xd9   : > { %v1209_v22 = vpop.f32.mrf.mxu1  ;;  %v938_v3 = vor.u32 %v937_v32, %v6496_v2  ;;  %v1140_v20 = vpack.c.b16 %v1118_v37, %v1117_v42  ;;  %v2508_v37 = vrot.slane %v2507_v43, 4 }
  0xda   : > { %v2138_v48 = vadd.f32 %v2058_v15, %v1784_v4  ;;  %v1288_v27 = vadd.f32 %v1209_v22, %v6301_v11  ;;  %v2778_v28 = vpop.f32.mrf.mxu0  ;;  %v2686_v4 = vunpack.c.l.b16 %v2479_v38  ;;  %v2687_v11 = vunpack.c.l.b16 %v2489_v44  ;;  %v1381_v22 = vld [vmem:[%s6076_s29 + $0x78] sm:$0xe] }
  0xdb   : > { %v928_v15 = vor.u32 %v927_v46, %v924_v26  ;;  %v2497_v19 = vor.u32 %v2496_v55, %v2493_v35  ;;  %v1637_v31 = vpack.c.b16 %v1615_v53, %v1614_v52  ;;  %v5935_v44 = vld [vmem:[%s6076_s29 + $0x78] sm:$0xff]  ;;  %v5366_v32 = vrot.slane %v1381_v22, 9  ;;  %v664_v53 = vld [vmem:[%s6076_s29 + $0x88] sm:$0xf]  ;;  %v5536_v22 = vld [vmem:[%s6076_s29 + $0x94] sm:$0xf] }
  0xdc   : > { %v2709_v26 = vpack.c.b16 %v2687_v11, %v2686_v4  ;;  %v939_v55 = vrot.slane %v938_v3, 4  ;;  %v2512_v52 = vrot.slane %v2510_v60, 5  ;;  %v949_v4 = vshll.u32 %v663_v7, 16  ;;  %v5535_v3 = vld [vmem:[%s6076_s29 + $0x90] sm:$0xf] }
  0xdd   : > { %v929_v46 = vrot.slane %v928_v15, 4  ;;  %v2498_v42 = vrot.slane %v2497_v19, 4  ;;  %v6515_v11 = vadd.f32 %v6470_v1, %v2138_v48  ;;  %v955_v15 = vshll.u32 %v664_v53, 16 }
  0xde   : > { %v959_v10 = vshrl.u32 %v664_v53, 16  ;;  %v944_v7 = vsel %vm6133_vm6, %v939_v55, %v943_v49  ;;  %v1523_v1 = vsel %vm6137_vm7, %v5366_v32, %v1522_v30  ;;  %v2513_v43 = vsel %vm6133_vm6, %v2508_v37, %v2512_v52  ;;  %v1385_v52 = vld [vmem:[%s6076_s29 + $0x88] sm:$0xf] }
  0xdf   : > { %v1706_v8 = vpop.f32.mrf.mxu2  ;;  %v948_v60 = vrot.slane %v946_v57, 4  ;;  %v2524_v30 = vshll.u32 %v5536_v22, 16  ;;  %v6539_v32 = vrot.slane %v955_v15, 5  ;;  %v1616_v55 = vunpack.c.l.b16 %v1523_v1 }
  0xe0   : > { %v1785_v12 = vadd.f32 %v1706_v8, %v1288_v27  ;;  %v2060_v17 = vpop.f32.mrf.mxu3  ;;  %v1525_v27 = vrot.slane %v1383_v50, 5  ;;  %v934_v50 = vsel %vm6133_vm6, %v929_v46, %v6496_v2 }
  0xe1   : > { %v1212_v38 = vpop.f32.mrf.mxu1 }
  0xe2   : > { %v2139_v34 = vadd.f32 %v2060_v17, %v1785_v12  ;;  %v1289_v33 = vadd.f32 %v1212_v38, %v6321_v47  ;;  %v6509_v35 = vpop.f32.mrf.mxu0  ;;  %v1526_v48 = vsel %vm6137_vm7, %v1524_v51, %v1525_v27  ;;  %v951_v12 = vrot.slane %v949_v4, 5 }
  0xe3   : > { %v2518_v38 = vshll.u32 %v5535_v3, 16  ;;  %v1617_v51 = vunpack.c.l.b16 %v1526_v48  ;;  %v6542_v4 = vrot.slane %v2524_v30, 5 }
  0xe4   : > { %5349 = vmatmul.msk.bf16.gmra.mxu1 %vm424_vm1, %v1140_v20  ;;  %5382 = vmatmul.msk.bf16.gmra.mxu2 %vm424_vm1, %v1637_v31  ;;  %v6517_v47 = vadd.f32 %v2778_v28, %v2139_v34  ;;  %v2503_v28 = vsel %vm6133_vm6, %v2498_v42, %v6499_v16  ;;  %v665_v20 = vld [vmem:[%s6076_s29 + $0x8c] sm:$0x1]  ;;  %v2515_v31 = vshrl.u32 %v5535_v3, 16  ;;  %v1119_v16 = vunpack.c.l.b16 %v934_v50 }
  0xe5   : > { %5495 = vmatmul.msk.bf16.gmra.mxu3 %vm424_vm1, %v5935_v44  ;;  %5560 = vmatmul.msk.bf16.gmra.mxu0 %vm424_vm1, %v2709_v26  ;;  %v2528_v44 = vshrl.u32 %v5536_v22, 16  ;;  %v1120_v34 = vunpack.c.l.b16 %v944_v7  ;;  %v2688_v27 = vunpack.c.l.b16 %v2503_v28  ;;  %v2689_v42 = vunpack.c.l.b16 %v2513_v43  ;;  %v5537_v22 = vld [vmem:[%s6076_s29 + $0x98] sm:$0x1] }
  0xe6   : > { %v965_v37 = vshll.u32 %v665_v20, 16  ;;  %v2517_v53 = vrot.slane %v2515_v31, 4  ;;  %v2520_v57 = vrot.slane %v2518_v38, 5  ;;  %v952_v15 = vor.u32 %v951_v12, %v948_v60  ;;  %v1386_v20 = vld [vmem:[%s6076_s29 + $0x8c] sm:$0x1] }
  0xe7   : > { %v1709_v8 = vpop.f32.mrf.mxu2  ;;  %v1638_v7 = vpack.c.b16 %v1617_v51, %v1616_v55  ;;  %v2710_v28 = vpack.c.b16 %v2689_v42, %v2688_v27  ;;  %v2534_v38 = vshll.u32 %v5537_v22, 16  ;;  %v1532_v51 = vrot.slane %v1386_v20, 5  ;;  %v667_v27 = vld [vmem:[%s6076_s29 + $0x94] sm:$0xf]  ;;  %v5538_v42 = vld [vmem:[%s6076_s29 + $0x9c] sm:$0xf] }
  0xe8   : > { %v1786_v2 = vadd.f32 %v1709_v8, %v1289_v33  ;;  %v2063_v19 = vpop.f32.mrf.mxu3  ;;  %v961_v33 = vrot.slane %v959_v10, 4  ;;  %v1384_v10 = vld [vmem:[%s6076_s29 + $0x84] sm:$0xe]  ;;  %v1141_v8 = vpack.c.b16 %v1120_v34, %v1119_v16  ;;  %v2521_v60 = vor.u32 %v2520_v57, %v2517_v53  ;;  %v666_v34 = vld [vmem:[%s6076_s29 + $0x90] sm:$0xf] }
  0xe9   : > { %v1214_v17 = vpop.f32.mrf.mxu1  ;;  %v5367_v31 = vrot.slane %v1384_v10, 9  ;;  %v979_v22 = vshll.u32 %v667_v27, 16 }
  0xea   : > { %v2140_v26 = vadd.f32 %v2063_v19, %v1786_v2  ;;  %v1290_v46 = vadd.f32 %v1214_v17, %v6351_v18  ;;  %v2783_v49 = vpop.f32.mrf.mxu0  ;;  %v2530_v18 = vrot.slane %v2528_v44, 4  ;;  %v962_v3 = vor.u32 %v961_v33, %v6539_v32  ;;  %v5936_v17 = vld [vmem:[%s6076_s29 + $0x84] sm:$0xff] }
  0xeb   : > { %v967_v2 = vrot.slane %v965_v37, 5  ;;  %v1529_v19 = vrot.slane %v1385_v52, 5  ;;  %v2522_v53 = vrot.slane %v2521_v60, 4 }
  0xec   : > { %v2531_v12 = vor.u32 %v2530_v18, %v6542_v4  ;;  %v963_v16 = vrot.slane %v962_v3, 4  ;;  %v6559_v37 = vadd.f32 %v6509_v35, %v2140_v26  ;;  %v2536_v18 = vrot.slane %v2534_v38, 5 }
  0xed   : > { %v1531_v55 = vrot.slane %v1529_v19, 4  ;;  %v970_v26 = vshrl.u32 %v666_v34, 16 }
  0xee   : > { %v2532_v57 = vrot.slane %v2531_v12, 4  ;;  %v968_v35 = vsel %vm6133_vm6, %v963_v16, %v967_v2  ;;  %v2527_v2 = vsel %vm6133_vm6, %v2522_v53, %v6542_v4  ;;  %v6582_v16 = vrot.slane %v979_v22, 5  ;;  %v1387_v22 = vld [vmem:[%s6076_s29 + $0x90] sm:$0xe] }
  0xef   : > { %v1711_v50 = vpop.f32.mrf.mxu2  ;;  %v1122_v20 = vunpack.c.l.b16 %v968_v35 }
  0xf0   : > { %v1787_v1 = vadd.f32 %v1711_v50, %v1290_v46  ;;  %v2065_v48 = vpop.f32.mrf.mxu3  ;;  %v953_v46 = vrot.slane %v952_v15, 4  ;;  %v5539_v15 = vld [vmem:[%s6076_s29 + $0xa0] sm:$0xf]  ;;  %v983_v50 = vshrl.u32 %v667_v27, 16 }
  0xf1   : > { %v1217_v43 = vpop.f32.mrf.mxu1 }
  0xf2   : > { %v2141_v30 = vadd.f32 %v2065_v48, %v1787_v1  ;;  %v1291_v44 = vadd.f32 %v1217_v43, %v6370_v61  ;;  %v6551_v33 = vpop.f32.mrf.mxu0  ;;  %v1530_v61 = vsel %vm6137_vm7, %v5367_v31, %v1529_v19  ;;  %v958_v3 = vsel %vm6133_vm6, %v953_v46, %v6539_v32 }
  0xf3   : > { %v2548_v19 = vshll.u32 %v5539_v15, 16  ;;  %v2552_v43 = vshrl.u32 %v5539_v15, 16  ;;  %v1121_v32 = vunpack.c.l.b16 %v958_v3  ;;  %v2537_v31 = vsel %vm6133_vm6, %v2532_v57, %v2536_v18  ;;  %v5540_v3 = vld [vmem:[%s6076_s29 + $0xa4] sm:$0x1] }
  0xf4   : > { %5350 = vmatmul.msk.bf16.gmra.mxu1 %vm424_vm1, %v1141_v8  ;;  %5383 = vmatmul.msk.bf16.gmra.mxu2 %vm424_vm1, %v1638_v7  ;;  %v6561_v52 = vadd.f32 %v2783_v49, %v2141_v30  ;;  %v973_v49 = vshll.u32 %v666_v34, 16  ;;  %v2539_v8 = vshrl.u32 %v5538_v42, 16  ;;  %v2542_v7 = vshll.u32 %v5538_v42, 16  ;;  %v668_v30 = vld [vmem:[%s6076_s29 + $0x98] sm:$0x1] }
  0xf5   : > { %5496 = vmatmul.msk.bf16.gmra.mxu3 %vm424_vm1, %v5936_v17  ;;  %5561 = vmatmul.msk.bf16.gmra.mxu0 %vm424_vm1, %v2710_v28  ;;  %v1533_v28 = vsel %vm6137_vm7, %v1531_v55, %v1532_v51  ;;  %v985_v34 = vrot.slane %v983_v50, 4  ;;  %v1618_v27 = vunpack.c.l.b16 %v1530_v61  ;;  %v1388_v42 = vld [vmem:[%s6076_s29 + $0x94] sm:$0xf]  ;;  %v6585_v53 = vrot.slane %v2548_v19, 5  ;;  %v1389_v50 = vld [vmem:[%s6076_s29 + $0x98] sm:$0x1] }
  0xf6   : > { %v975_v46 = vrot.slane %v973_v49, 5  ;;  %v2541_v55 = vrot.slane %v2539_v8, 4  ;;  %v2544_v51 = vrot.slane %v2542_v7, 5  ;;  %v1619_v4 = vunpack.c.l.b16 %v1533_v28 }
  0xf7   : > { %v1714_v10 = vpop.f32.mrf.mxu2  ;;  %v2554_v57 = vrot.slane %v2552_v43, 4  ;;  %v2690_v18 = vunpack.c.l.b16 %v2527_v2  ;;  %v989_v15 = vshll.u32 %v668_v30, 16  ;;  %v1142_v35 = vpack.c.b16 %v1122_v20, %v1121_v32 }
  0xf8   : > { %v1788_v1 = vadd.f32 %v1714_v10, %v1291_v44  ;;  %v2068_v48 = vpop.f32.mrf.mxu3  ;;  %v972_v44 = vrot.slane %v970_v26, 4  ;;  %v986_v10 = vor.u32 %v985_v34, %v6582_v16  ;;  %v1536_v8 = vrot.slane %v1388_v42, 5  ;;  %v669_v34 = vld [vmem:[%s6076_s29 + $0x9c] sm:$0xf] }
  0xf9   : > { %v1219_v17 = vpop.f32.mrf.mxu1  ;;  %v2545_v61 = vor.u32 %v2544_v51, %v2541_v55  ;;  %v2555_v28 = vor.u32 %v2554_v57, %v6585_v53  ;;  %v2558_v19 = vshll.u32 %v5540_v3, 16 }
  0xfa   : > { %v2142_v60 = vadd.f32 %v2068_v48, %v1788_v1  ;;  %v1292_v12 = vadd.f32 %v1219_v17, %v6396_v41  ;;  %v2788_v38 = vpop.f32.mrf.mxu0  ;;  %v2691_v41 = vunpack.c.l.b16 %v2537_v31  ;;  %v976_v49 = vor.u32 %v975_v46, %v972_v44  ;;  %v5937_v17 = vld [vmem:[%s6076_s29 + $0x90] sm:$0xff] }
  0xfb   : > { %v1639_v48 = vpack.c.b16 %v1619_v4, %v1618_v27  ;;  %v991_v31 = vrot.slane %v989_v15, 5  ;;  %v5368_v44 = vrot.slane %v1387_v22, 9  ;;  %v1539_v46 = vrot.slane %v1389_v50, 5 }
  0xfc   : > { %v2711_v2 = vpack.c.b16 %v2691_v41, %v2690_v18  ;;  %v977_v55 = vrot.slane %v976_v49, 4  ;;  %v1538_v51 = vrot.slane %v1536_v8, 4  ;;  %v2546_v27 = vrot.slane %v2545_v61, 4  ;;  %v670_v18 = vld [vmem:[%s6076_s29 + $0xa0] sm:$0xf] }
  0xfd   : > { %v2556_v4 = vrot.slane %v2555_v28, 4  ;;  %v2560_v42 = vrot.slane %v2558_v19, 5  ;;  %v994_v41 = vshrl.u32 %v669_v34, 16  ;;  %v997_v15 = vshll.u32 %v669_v34, 16 }
  0xfe   : > { %v1537_v3 = vsel %vm6137_vm7, %v5368_v44, %v1536_v8  ;;  %v982_v49 = vsel %vm6133_vm6, %v977_v55, %v6582_v16  ;;  %v1003_v61 = vshll.u32 %v670_v18, 16 }
  0xff   : > { %v1716_v26 = vpop.f32.mrf.mxu2  ;;  %v2561_v8 = vsel %vm6133_vm6, %v2556_v4, %v2560_v42  ;;  %v996_v16 = vrot.slane %v994_v41, 4  ;;  %v1620_v44 = vunpack.c.l.b16 %v1537_v3  ;;  %v1391_v42 = vld [vmem:[%s6076_s29 + $0xa0] sm:$0xf] }
 0x100   : > { %v1789_v7 = vadd.f32 %v1716_v26, %v1292_v12  ;;  %v2070_v1 = vpop.f32.mrf.mxu3  ;;  %v987_v12 = vrot.slane %v986_v10, 4  ;;  %v5542_v10 = vld [vmem:[%s6076_s29 + $0xac] sm:$0xf]  ;;  %v6624_v34 = vrot.slane %v1003_v61, 5 }
 0x101   : > { %v1222_v43 = vpop.f32.mrf.mxu1 }
 0x102   : > { %v2143_v32 = vadd.f32 %v2070_v1, %v1789_v7  ;;  %v1293_v20 = vadd.f32 %v1222_v43, %v6421_v23  ;;  %v6594_v30 = vpop.f32.mrf.mxu0  ;;  %v6600_v23 = vadd.f32 %v6551_v33, %v2142_v60  ;;  %v992_v33 = vsel %vm6133_vm6, %v987_v12, %v991_v31 }
 0x103   : > { %v1540_v60 = vsel %vm6137_vm7, %v1538_v51, %v1539_v46  ;;  %v1007_v7 = vshrl.u32 %v670_v18, 16  ;;  %v2576_v31 = vshrl.u32 %v5542_v10, 16  ;;  %v2693_v51 = vunpack.c.l.b16 %v2561_v8  ;;  %v1390_v18 = vld [vmem:[%s6076_s29 + $0x9c] sm:$0xe] }
 0x104   : > { %5351 = vmatmul.msk.bf16.gmra.mxu1 %vm424_vm1, %v1142_v35  ;;  %5384 = vmatmul.msk.bf16.gmra.mxu2 %vm424_vm1, %v1639_v48  ;;  %v6602_v57 = vadd.f32 %v2788_v38, %v2143_v32  ;;  %v5541_v35 = vld [vmem:[%s6076_s29 + $0xa8] sm:$0xf]  ;;  %v2551_v38 = vsel %vm6133_vm6, %v2546_v27, %v6585_v53  ;;  %v999_v48 = vrot.slane %v997_v15, 5  ;;  %v1123_v32 = vunpack.c.l.b16 %v982_v49  ;;  %v671_v27 = vld [vmem:[%s6076_s29 + $0xa4] sm:$0x1]  ;;  %v5938_v8 = vld [vmem:[%s6076_s29 + $0x9c] sm:$0xff] }
 0x105   : > { %5497 = vmatmul.msk.bf16.gmra.mxu3 %vm424_vm1, %v5937_v17  ;;  %5562 = vmatmul.msk.bf16.gmra.mxu0 %vm424_vm1, %v2711_v2  ;;  %v2563_v28 = vshrl.u32 %v5541_v35, 16  ;;  %v2566_v19 = vshll.u32 %v5541_v35, 16  ;;  %v2572_v2 = vshll.u32 %v5542_v10, 16  ;;  %v1621_v46 = vunpack.c.l.b16 %v1540_v60  ;;  %v5543_v49 = vld [vmem:[%s6076_s29 + $0xb0] sm:$0x1] }
 0x106   : > { %v1009_v55 = vrot.slane %v1007_v7, 4  ;;  %v2692_v12 = vunpack.c.l.b16 %v2551_v38  ;;  %v1000_v4 = vor.u32 %v999_v48, %v996_v16  ;;  %v2578_v35 = vrot.slane %v2576_v31, 4 }
 0x107   : > { %v1719_v26 = vpop.f32.mrf.mxu2  ;;  %v2565_v41 = vrot.slane %v2563_v28, 4  ;;  %v6629_v15 = vrot.slane %v2572_v2, 5  ;;  %v1640_v10 = vpack.c.b16 %v1621_v46, %v1620_v44  ;;  %v1543_v16 = vrot.slane %v1391_v42, 5  ;;  %v672_v44 = vld [vmem:[%s6076_s29 + $0xa8] sm:$0xf] }
 0x108   : > { %v1790_v22 = vadd.f32 %v1719_v26, %v1293_v20  ;;  %v2073_v50 = vpop.f32.mrf.mxu3  ;;  %v1124_v20 = vunpack.c.l.b16 %v992_v33  ;;  %v1010_v38 = vor.u32 %v1009_v55, %v6624_v34  ;;  %v2712_v61 = vpack.c.b16 %v2693_v51, %v2692_v12  ;;  %v673_v46 = vld [vmem:[%s6076_s29 + $0xac] sm:$0xf] }
 0x109   : > { %v1224_v1 = vpop.f32.mrf.mxu1  ;;  %v1001_v7 = vrot.slane %v1000_v4, 4  ;;  %v2582_v31 = vshll.u32 %v5543_v49, 16  ;;  %v1545_v4 = vrot.slane %v1543_v16, 4  ;;  %v1027_v49 = vshll.u32 %v673_v46, 16 }
 0x10a   : > { %v2144_v43 = vadd.f32 %v2073_v50, %v1790_v22  ;;  %v1294_v17 = vadd.f32 %v1224_v1, %v6451_v21  ;;  %v2793_v53 = vpop.f32.mrf.mxu0  ;;  %v2568_v21 = vrot.slane %v2566_v19, 5  ;;  %v1143_v3 = vpack.c.b16 %v1124_v20, %v1123_v32  ;;  %v1392_v19 = vld [vmem:[%s6076_s29 + $0xa4] sm:$0x1] }
 0x10b   : > { %v1013_v22 = vshll.u32 %v671_v27, 16  ;;  %v5369_v1 = vrot.slane %v1390_v18, 9  ;;  %v1011_v32 = vrot.slane %v1010_v38, 4  ;;  %v1006_v51 = vsel %vm6133_vm6, %v1001_v7, %v6624_v34  ;;  %v5544_v18 = vld [vmem:[%s6076_s29 + $0xb4] sm:$0xf] }
 0x10c   : > { %v2569_v2 = vor.u32 %v2568_v21, %v2565_v41  ;;  %v6643_v55 = vadd.f32 %v6594_v30, %v2144_v43  ;;  %v1546_v42 = vrot.slane %v1392_v19, 5  ;;  %v5545_v21 = vld [vmem:[%s6076_s29 + $0xb8] sm:$0xf]  ;;  %v2587_v38 = vshrl.u32 %v5544_v18, 16 }
 0x10d   : > { %v1015_v20 = vrot.slane %v1013_v22, 5  ;;  %v1544_v27 = vsel %vm6137_vm7, %v5369_v1, %v1543_v16  ;;  %v2590_v22 = vshll.u32 %v5544_v18, 16  ;;  %v2600_v7 = vshrl.u32 %v5545_v21, 16 }
 0x10e   : > { %v2570_v30 = vrot.slane %v2569_v2, 4 }
 0x10f   : > { %v1721_v26 = vpop.f32.mrf.mxu2 }
 0x110   : > { %v1791_v33 = vadd.f32 %v1721_v26, %v1294_v17  ;;  %v2075_v60 = vpop.f32.mrf.mxu3  ;;  %v2579_v17 = vor.u32 %v2578_v35, %v6629_v15  ;;  %v1018_v26 = vshrl.u32 %v672_v44, 16  ;;  %v2575_v19 = vsel %vm6133_vm6, %v2570_v30, %v6629_v15 }
 0x111   : > { %v1227_v50 = vpop.f32.mrf.mxu1  ;;  %v2694_v18 = vunpack.c.l.b16 %v2575_v19  ;;  %v2602_v30 = vrot.slane %v2600_v7, 4  ;;  %v5939_v19 = vld [vmem:[%s6076_s29 + $0xa8] sm:$0xff] }
 0x112   : > { %v2145_v48 = vadd.f32 %v2075_v60, %v1791_v33  ;;  %v6634_v28 = vpop.f32.mrf.mxu0  ;;  %v1295_v41 = vadd.f32 %v1227_v50, %v6270_v39  ;;  %v2580_v43 = vrot.slane %v2579_v17, 4  ;;  %v1031_v33 = vshrl.u32 %v673_v46, 16  ;;  %v674_v17 = vld [vmem:[%s6076_s29 + $0xb0] sm:$0x1] }
 0x113   : > { %v1547_v39 = vsel %vm6137_vm7, %v1545_v4, %v1546_v42  ;;  %v1622_v50 = vunpack.c.l.b16 %v1544_v27  ;;  %v1394_v4 = vld [vmem:[%s6076_s29 + $0xac] sm:$0xf]  ;;  %v2589_v42 = vrot.slane %v2587_v38, 4 }
 0x114   : > { %5352 = vmatmul.msk.bf16.gmra.mxu1 %vm424_vm1, %v1143_v3  ;;  %5385 = vmatmul.msk.bf16.gmra.mxu2 %vm424_vm1, %v1640_v10  ;;  %v6645_v12 = vadd.f32 %v2793_v53, %v2145_v48  ;;  %v2584_v53 = vrot.slane %v2582_v31, 5  ;;  %v1021_v3 = vshll.u32 %v672_v44, 16  ;;  %v1016_v10 = vsel %vm6133_vm6, %v1011_v32, %v1015_v20 }
 0x115   : > { %5498 = vmatmul.msk.bf16.gmra.mxu3 %vm424_vm1, %v5938_v8  ;;  %5563 = vmatmul.msk.bf16.gmra.mxu0 %vm424_vm1, %v2712_v61  ;;  %v2596_v61 = vshll.u32 %v5545_v21, 16  ;;  %v1125_v48 = vunpack.c.l.b16 %v1006_v51  ;;  %v1020_v31 = vrot.slane %v1018_v26, 4  ;;  %v6667_v20 = vrot.slane %v1027_v49, 5  ;;  %v5546_v21 = vld [vmem:[%s6076_s29 + $0xbc] sm:$0x1] }
 0x116   : > { %v2585_v2 = vsel %vm6133_vm6, %v2580_v43, %v2584_v53  ;;  %v1023_v32 = vrot.slane %v1021_v3, 5  ;;  %v1033_v44 = vrot.slane %v1031_v33, 4  ;;  %v1126_v46 = vunpack.c.l.b16 %v1016_v10  ;;  %v1393_v49 = vld [vmem:[%s6076_s29 + $0xa8] sm:$0xe] }
 0x117   : > { %v1724_v35 = vpop.f32.mrf.mxu2  ;;  %v1623_v27 = vunpack.c.l.b16 %v1547_v39  ;;  %v2592_v51 = vrot.slane %v2590_v22, 5  ;;  %v6670_v15 = vrot.slane %v2596_v61, 5  ;;  %v1037_v53 = vshll.u32 %v674_v17, 16  ;;  %v1395_v22 = vld [vmem:[%s6076_s29 + $0xb0] sm:$0x1] }
 0x118   : > { %v1792_v60 = vadd.f32 %v1724_v35, %v1295_v41  ;;  %v2078_v34 = vpop.f32.mrf.mxu3  ;;  %v2695_v41 = vunpack.c.l.b16 %v2585_v2  ;;  %v1024_v26 = vor.u32 %v1023_v32, %v1020_v31  ;;  %v1034_v3 = vor.u32 %v1033_v44, %v6667_v20 }
 0x119   : > { %v1229_v8 = vpop.f32.mrf.mxu1  ;;  %v1550_v33 = vrot.slane %v1394_v4, 5  ;;  %v1144_v10 = vpack.c.b16 %v1126_v46, %v1125_v48  ;;  %v1641_v38 = vpack.c.b16 %v1623_v27, %v1622_v50  ;;  %v2593_v39 = vor.u32 %v2592_v51, %v2589_v42 }
 0x11a   : > { %v2146_v1 = vadd.f32 %v2078_v34, %v1792_v60  ;;  %v2798_v16 = vpop.f32.mrf.mxu0  ;;  %v1296_v43 = vadd.f32 %v1229_v8, %v6299_v6  ;;  %v2713_v7 = vpack.c.b16 %v2695_v41, %v2694_v18  ;;  %v2603_v2 = vor.u32 %v2602_v30, %v6670_v15  ;;  %v675_v18 = vld [vmem:[%s6076_s29 + $0xb4] sm:$0xf]  ;;  %v676_v30 = vld [vmem:[%s6076_s29 + $0xb8] sm:$0xf] }
 0x11b   : > { %v2606_v6 = vshll.u32 %v5546_v21, 16  ;;  %v1039_v31 = vrot.slane %v1037_v53, 5  ;;  %v5370_v32 = vrot.slane %v1393_v49, 9  ;;  %v1025_v44 = vrot.slane %v1024_v26, 4  ;;  %v5547_v53 = vld [vmem:[%s6076_s29 + $0xc0] sm:$0xf] }
 0x11c   : > { %v1035_v4 = vrot.slane %v1034_v3, 4  ;;  %v1553_v48 = vrot.slane %v1395_v22, 5  ;;  %v2594_v50 = vrot.slane %v2593_v39, 4  ;;  %v6682_v46 = vadd.f32 %v6634_v28, %v2146_v1  ;;  %v5548_v26 = vld [vmem:[%s6076_s29 + $0xc4] sm:$0xf] }
 0x11d   : > { %v2604_v42 = vrot.slane %v2603_v2, 4  ;;  %v2608_v51 = vrot.slane %v2606_v6, 5  ;;  %v1551_v1 = vsel %vm6137_vm7, %v5370_v32, %v1550_v33  ;;  %v1055_v22 = vshrl.u32 %v676_v30, 16 }
 0x11e   : > { %v1040_v28 = vsel %vm6133_vm6, %v1035_v4, %v1039_v31  ;;  %v2624_v2 = vshrl.u32 %v5548_v26, 16  ;;  %v677_v4 = vld [vmem:[%s6076_s29 + $0xbc] sm:$0x1] }
 0x11f   : > { %v1726_v35 = vpop.f32.mrf.mxu2 }
 0x120   : > { %v1793_v60 = vadd.f32 %v1726_v35, %v1296_v43  ;;  %v2080_v34 = vpop.f32.mrf.mxu3  ;;  %v1552_v43 = vrot.slane %v1550_v33, 4  ;;  %v1030_v35 = vsel %vm6133_vm6, %v1025_v44, %v6667_v20  ;;  %v2609_v20 = vsel %vm6133_vm6, %v2604_v42, %v2608_v51  ;;  %v1397_v51 = vld [vmem:[%s6076_s29 + $0xb8] sm:$0xf] }
 0x121   : > { %v1232_v61 = vpop.f32.mrf.mxu1  ;;  %v2611_v33 = vshrl.u32 %v5547_v53, 16  ;;  %v1127_v6 = vunpack.c.l.b16 %v1030_v35  ;;  %v2697_v44 = vunpack.c.l.b16 %v2609_v20  ;;  %v1057_v42 = vrot.slane %v1055_v22, 4 }
 0x122   : > { %v2147_v8 = vadd.f32 %v2080_v34, %v1793_v60  ;;  %v2801_v17 = vpop.f32.mrf.mxu0  ;;  %v1297_v41 = vadd.f32 %v1232_v61, %v6316_v40  ;;  %v2599_v40 = vsel %vm6133_vm6, %v2594_v50, %v6670_v15  ;;  %v1042_v60 = vshrl.u32 %v675_v18, 16 }
 0x123   : > { %v1045_v34 = vshll.u32 %v675_v18, 16  ;;  %v1624_v15 = vunpack.c.l.b16 %v1551_v1  ;;  %v2696_v32 = vunpack.c.l.b16 %v2599_v40  ;;  %v2613_v18 = vrot.slane %v2611_v33, 4 }
 0x124   : > { %5353 = vmatmul.msk.bf16.gmra.mxu1 %vm424_vm1, %v1144_v10  ;;  %5386 = vmatmul.msk.bf16.gmra.mxu2 %vm424_vm1, %v1641_v38  ;;  %v6684_v27 = vadd.f32 %v2798_v16, %v2147_v8  ;;  %v1554_v16 = vsel %vm6137_vm7, %v1552_v43, %v1553_v48  ;;  %v1051_v38 = vshll.u32 %v676_v30, 16  ;;  %v1128_v8 = vunpack.c.l.b16 %v1040_v28 }
 0x125   : > { %5499 = vmatmul.msk.bf16.gmra.mxu3 %vm424_vm1, %v5939_v19  ;;  %5564 = vmatmul.msk.bf16.gmra.mxu0 %vm424_vm1, %v2713_v7  ;;  %v2614_v19 = vshll.u32 %v5547_v53, 16  ;;  %v2620_v7 = vshll.u32 %v5548_v26, 16  ;;  %v1625_v31 = vunpack.c.l.b16 %v1554_v16  ;;  %v1044_v43 = vrot.slane %v1042_v60, 4  ;;  %v1396_v53 = vld [vmem:[%s6076_s29 + $0xb4] sm:$0xe] }
 0x126   : > { %v1047_v48 = vrot.slane %v1045_v34, 5  ;;  %v6708_v50 = vrot.slane %v1051_v38, 5  ;;  %v2626_v28 = vrot.slane %v2624_v2, 4  ;;  %v1145_v16 = vpack.c.b16 %v1128_v8, %v1127_v6  ;;  %v5549_v26 = vld [vmem:[%s6076_s29 + $0xc8] sm:$0x1] }
 0x127   : > { %v1729_v21 = vpop.f32.mrf.mxu2  ;;  %v6715_v35 = vrot.slane %v2620_v7, 5  ;;  %v1642_v40 = vpack.c.b16 %v1625_v31, %v1624_v15  ;;  %v2714_v60 = vpack.c.b16 %v2697_v44, %v2696_v32  ;;  %v1061_v34 = vshll.u32 %v677_v4, 16  ;;  %v5761_v31 = vld [vmem:[%s6076_s29 + $0x18] sm:$0xf]  ;;  %v5762_v32 = vld [vmem:[%s6076_s29 + $0x1c] sm:$0xf] }
 0x128   : > { %v1794_v3 = vadd.f32 %v1729_v21, %v1297_v41  ;;  %v2083_v49 = vpop.f32.mrf.mxu3  ;;  %v2616_v21 = vrot.slane %v2614_v19, 5  ;;  %v1048_v38 = vor.u32 %v1047_v48, %v1044_v43  ;;  %v5371_v22 = vrot.slane %v1396_v53, 9 }
 0x129   : > { %v1234_v10 = vpop.f32.mrf.mxu1  ;;  %v1557_v33 = vrot.slane %v1397_v51, 5  ;;  %v2627_v2 = vor.u32 %v2626_v28, %v6715_v35  ;;  %v2630_v6 = vshll.u32 %v5549_v26, 16  ;;  %v1063_v8 = vrot.slane %v1061_v34, 5 }
 0x12a   : > { %v2148_v39 = vadd.f32 %v2083_v49, %v1794_v3  ;;  %v2803_v61 = vpop.f32.mrf.mxu0  ;;  %v1298_v30 = vadd.f32 %v1234_v10, %v6344_v13  ;;  %v1058_v13 = vor.u32 %v1057_v42, %v6708_v50  ;;  %v1398_v10 = vld [vmem:[%s6076_s29 + $0xbc] sm:$0x1]  ;;  %v2617_v7 = vor.u32 %v2616_v21, %v2613_v18 }
 0x12b   : > { %v1560_v15 = vrot.slane %v1398_v10, 5  ;;  %v1049_v4 = vrot.slane %v1048_v38, 4  ;;  %v1558_v48 = vsel %vm6137_vm7, %v5371_v22, %v1557_v33  ;;  %v1559_v42 = vrot.slane %v1557_v33, 4  ;;  %v5568_v10 = vld [vmem:[%s6076_s29 + $0x10] sm:$0xf] }
 0x12c   : > { %v6711_v41 = vadd.f32 %v2801_v17, %v2148_v39  ;;  %v5940_v17 = vld [vmem:[%s6076_s29 + $0xb4] sm:$0xff]  ;;  %v1059_v43 = vrot.slane %v1058_v13, 4  ;;  %v2618_v18 = vrot.slane %v2617_v7, 4  ;;  %v2632_v53 = vrot.slane %v2630_v6, 5 }
 0x12d   : > { %v3817_v28 = vshrl.u32 %v5761_v31, 16 }
 0x12e   : > { %v2623_v38 = vsel %vm6133_vm6, %v2618_v18, %v6715_v35  ;;  %v5827_v35 = vld [vmem:[%s6076_s29 + $0x1c] sm:$0xf] }
 0x12f   : > { %v1731_v1 = vpop.f32.mrf.mxu2 }
 0x130   : > { %v1795_v3 = vadd.f32 %v1731_v1, %v1298_v30  ;;  %v2085_v49 = vpop.f32.mrf.mxu3  ;;  %v2628_v30 = vrot.slane %v2627_v2, 4  ;;  %v3826_v1 = vshll.u32 %v5762_v32, 16 }
 0x131   : > { %v1237_v20 = vpop.f32.mrf.mxu1 }
 0x132   : > { %v2149_v39 = vadd.f32 %v2085_v49, %v1795_v3  ;;  %v2806_v19 = vpop.f32.mrf.mxu0  ;;  %v1299_v51 = vadd.f32 %v1237_v20, %v6367_v54  ;;  %v1064_v54 = vsel %vm6133_vm6, %v1059_v43, %v1063_v8  ;;  %v2633_v13 = vsel %vm6133_vm6, %v2628_v30, %v2632_v53  ;;  %v5763_v8 = vld [vmem:[%s6076_s29 + $0x20] sm:$0x1] }
 0x133   : > { %v6746_v33 = vrot.slane %v3826_v1, 5  ;;  %v1130_v2 = vunpack.c.l.b16 %v1064_v54  ;;  %v3018_v43 = vrot.slane %v5568_v10, 5  ;;  %v3836_v30 = vshll.u32 %v5763_v8, 16  ;;  %v5765_v8 = vld [vmem:[%s6076_s29 + $0x28] sm:$0xf] }
 0x134   : > { %5354 = vmatmul.msk.bf16.gmra.mxu1 %vm424_vm1, %v1145_v16  ;;  %5387 = vmatmul.msk.bf16.gmra.mxu2 %vm424_vm1, %v1642_v40  ;;  %v6726_v44 = vadd.f32 %v2803_v61, %v2149_v39  ;;  %v3820_v61 = vshll.u32 %v5761_v31, 16  ;;  %v3830_v16 = vshrl.u32 %v5762_v32, 16  ;;  %v1054_v40 = vsel %vm6133_vm6, %v1049_v4, %v6708_v50 }
 0x135   : > { %5500 = vmatmul.msk.bf16.gmra.mxu3 %vm424_vm1, %v5940_v17  ;;  %5565 = vmatmul.msk.bf16.gmra.mxu0 %vm424_vm1, %v2714_v60  ;;  %v1561_v60 = vsel %vm6137_vm7, %v1559_v42, %v1560_v15  ;;  %v1626_v17 = vunpack.c.l.b16 %v1558_v48  ;;  %v3819_v50 = vrot.slane %v3817_v28, 4  ;;  %v1129_v7 = vunpack.c.l.b16 %v1054_v40  ;;  %v5567_v42 = vld [vmem:[%s6076_s29 + $0xc] sm:$0xe]  ;;  %v5826_v40 = vld [vmem:[%s6076_s29 + $0x18] sm:$0xe] }
 0x136   : > { %v3822_v22 = vrot.slane %v3820_v61, 5  ;;  %v3832_v39 = vrot.slane %v3830_v16, 4  ;;  %v1627_v6 = vunpack.c.l.b16 %v1561_v60  ;;  %v2698_v31 = vunpack.c.l.b16 %v2623_v38  ;;  %v5569_v61 = vld [vmem:[%s6076_s29 + $0x14] sm:$0x1] }
 0x137   : > { %v1734_v21 = vpop.f32.mrf.mxu2  ;;  %v2699_v32 = vunpack.c.l.b16 %v2633_v13  ;;  %v1146_v28 = vpack.c.b16 %v1130_v2, %v1129_v7  ;;  %v4584_v1 = vrot.slane %v5827_v35, 5  ;;  %v5615_v60 = vrot.slane %v5567_v42, 9 }
 0x138   : > { %v1796_v26 = vadd.f32 %v1734_v21, %v1299_v51  ;;  %v2088_v3 = vpop.f32.mrf.mxu3  ;;  %v3823_v51 = vor.u32 %v3822_v22, %v3819_v50  ;;  %v3833_v18 = vor.u32 %v3832_v39, %v6746_v33  ;;  %v3021_v38 = vrot.slane %v5569_v61, 5 }
 0x139   : > { %v1239_v49 = vpop.f32.mrf.mxu1  ;;  %v3838_v50 = vrot.slane %v3836_v30, 5  ;;  %v4586_v22 = vrot.slane %v4584_v1, 4 }
 0x13a   : > { %v2150_v34 = vadd.f32 %v2088_v3, %v1796_v26  ;;  %v2808_v20 = vpop.f32.mrf.mxu0  ;;  %v1300_v4 = vadd.f32 %v1239_v49, %v6394_v36  ;;  %v5941_v26 = vld [vmem:[%s6076_s29 + $0xc0] sm:$0xff]  ;;  %v2715_v3 = vpack.c.b16 %v2699_v32, %v2698_v31  ;;  %v3824_v13 = vrot.slane %v3823_v51, 4 }
 0x13b   : > { %v5828_v36 = vld [vmem:[%s6076_s29 + $0x20] sm:$0x1]  ;;  %v3834_v10 = vrot.slane %v3833_v18, 4  ;;  %v3019_v32 = vsel %vm6137_vm7, %v5615_v60, %v3018_v43 }
 0x13c   : > { %v6749_v15 = vadd.f32 %v2806_v19, %v2150_v34  ;;  %v1643_v19 = vpack.c.b16 %v1627_v6, %v1626_v17  ;;  %v3020_v34 = vrot.slane %v3018_v43, 4  ;;  %v5874_v17 = vrot.slane %v5826_v40, 9  ;;  %v5764_v6 = vld [vmem:[%s6076_s29 + $0x24] sm:$0xf] }
 0x13d   : > { %v4587_v39 = vrot.slane %v5828_v36, 5  ;;  %v3839_v42 = vsel %vm6133_vm6, %v3834_v10, %v3838_v50  ;;  %v3841_v18 = vshrl.u32 %v5764_v6, 16  ;;  %v3844_v30 = vshll.u32 %v5764_v6, 16  ;;  %v5571_v36 = vld [vmem:[%s6076_s29 + $0x1c] sm:$0xf] }
 0x13e   : > { %v3022_v35 = vsel %vm6137_vm7, %v3020_v34, %v3021_v38  ;;  %v5766_v10 = vld [vmem:[%s6076_s29 + $0x2c] sm:$0x1] }
 0x13f   : > { %v1736_v48 = vpop.f32.mrf.mxu2  ;;  %v4588_v51 = vsel %vm6137_vm7, %v4586_v22, %v4587_v39  ;;  %v3163_v61 = vunpack.c.l.b16 %v3022_v35  ;;  %v3846_v60 = vrot.slane %v3844_v30, 5  ;;  %v5570_v35 = vld [vmem:[%s6076_s29 + $0x18] sm:$0xe] }
 0x140   : > { %v1797_v53 = vadd.f32 %v1736_v48, %v1300_v4  ;;  %v2090_v21 = vpop.f32.mrf.mxu3  ;;  %v5616_v30 = vrot.slane %v5570_v35, 9 }
 0x141   : > { %v1242_v16 = vpop.f32.mrf.mxu1 }
 0x142   : > { %v2151_v49 = vadd.f32 %v2090_v21, %v1797_v53  ;;  %v2811_v54 = vpop.f32.mrf.mxu0  ;;  %v1301_v2 = vadd.f32 %v1242_v16, %v6417_v24  ;;  %v4585_v24 = vsel %vm6137_vm7, %v5874_v17, %v4584_v1  ;;  %v3850_v53 = vshll.u32 %v5765_v8, 16  ;;  %v5830_v17 = vld [vmem:[%s6076_s29 + $0x28] sm:$0xf] }
 0x143   : > { %v3854_v21 = vshrl.u32 %v5765_v8, 16  ;;  %v4729_v1 = vunpack.c.l.b16 %v4588_v51  ;;  %v3025_v8 = vrot.slane %v5571_v36, 5  ;;  %v4591_v51 = vrot.slane %v5830_v17, 5 }
 0x144   : > { %5355 = vmatmul.msk.bf16.gmra.mxu1 %vm424_vm1, %v1146_v28  ;;  %5388 = vmatmul.msk.bf16.gmra.mxu2 %vm424_vm1, %v1643_v19  ;;  %v6761_v7 = vadd.f32 %v2808_v20, %v2151_v49  ;;  %v3829_v20 = vsel %vm6133_vm6, %v3824_v13, %v6746_v33  ;;  %v3162_v19 = vunpack.c.l.b16 %v3019_v32  ;;  %v3843_v49 = vrot.slane %v3841_v18, 4  ;;  %v5831_v18 = vld [vmem:[%s6076_s29 + $0x2c] sm:$0x1] }
 0x145   : > { %5501 = vmatmul.msk.bf16.gmra.mxu3 %vm424_vm1, %v5941_v26  ;;  %5566 = vmatmul.msk.bf16.gmra.mxu0 %vm424_vm1, %v2715_v3  ;;  %v4234_v16 = vunpack.c.l.b16 %v3829_v20  ;;  %v4235_v26 = vunpack.c.l.b16 %v3839_v42  ;;  %v4728_v3 = vunpack.c.l.b16 %v4585_v24  ;;  %v6784_v34 = vrot.slane %v3850_v53, 5  ;;  %v5572_v24 = vld [vmem:[%s6076_s29 + $0x20] sm:$0x1] }
 0x146   : > { %v3856_v38 = vrot.slane %v3854_v21, 4  ;;  %v3847_v20 = vor.u32 %v3846_v60, %v3843_v49  ;;  %v3027_v53 = vrot.slane %v3025_v8, 4  ;;  %v5767_v21 = vld [vmem:[%s6076_s29 + $0x30] sm:$0xf]  ;;  %v4593_v49 = vrot.slane %v4591_v51, 4 }
 0x147   : > { %v1739_v31 = vpop.f32.mrf.mxu2  ;;  %v4266_v6 = vpack.c.b16 %v4235_v26, %v4234_v16  ;;  %v4760_v32 = vpack.c.b16 %v4729_v1, %v4728_v3  ;;  %v4594_v60 = vrot.slane %v5831_v18, 5  ;;  %v5769_v18 = vld [vmem:[%s6076_s29 + $0x38] sm:$0x1] }
 0x148   : > { %v1798_v4 = vadd.f32 %v1739_v31, %v1301_v2  ;;  %v2093_v48 = vpop.f32.mrf.mxu3  ;;  %v3194_v2 = vpack.c.b16 %v3163_v61, %v3162_v19  ;;  %v3028_v61 = vrot.slane %v5572_v24, 5  ;;  %v3848_v16 = vrot.slane %v3847_v20, 4 }
 0x149   : > { %v1244_v43 = vpop.f32.mrf.mxu1  ;;  %v4595_v20 = vsel %vm6137_vm7, %v4593_v49, %v4594_v60  ;;  %v3884_v60 = vshll.u32 %v5769_v18, 16 }
 0x14a   : > { %v2152_v28 = vadd.f32 %v2093_v48, %v1798_v4  ;;  %v2813_v33 = vpop.f32.mrf.mxu0  ;;  %v1302_v13 = vadd.f32 %v1244_v43, %v6449_v14  ;;  %v3857_v14 = vor.u32 %v3856_v38, %v6784_v34  ;;  %v3860_v4 = vshll.u32 %v5766_v10, 16  ;;  %v5829_v43 = vld [vmem:[%s6076_s29 + $0x24] sm:$0xe] }
 0x14b   : > { %v5875_v36 = vrot.slane %v5829_v43, 9  ;;  %v3868_v10 = vshll.u32 %v5767_v21, 16 }
 0x14c   : > { %v6781_v40 = vadd.f32 %v2811_v54, %v2152_v28  ;;  %v5942_v54 = vld [vmem:[%s6076_s29 + $0x18] sm:$0xff]  ;;  %v5768_v28 = vld [vmem:[%s6076_s29 + $0x34] sm:$0xf]  ;;  %v3858_v26 = vrot.slane %v3857_v14, 4  ;;  %v3862_v3 = vrot.slane %v3860_v4, 5 }
 0x14d   : > { %v4592_v35 = vsel %vm6137_vm7, %v5875_v36, %v4591_v51  ;;  %v3870_v4 = vrot.slane %v3868_v10, 5  ;;  %v5943_v10 = vld [vmem:[%s6076_s29 + $0x24] sm:$0xff] }
 0x14e   : > { %v4730_v51 = vunpack.c.l.b16 %v4592_v35 }
 0x14f   : > { %v1741_v50 = vpop.f32.mrf.mxu2 }
 0x150   : > { %v1799_v22 = vadd.f32 %v1741_v50, %v1302_v13  ;;  %v2095_v39 = vpop.f32.mrf.mxu3  ;;  %v3865_v13 = vshrl.u32 %v5767_v21, 16  ;;  %v3874_v50 = vshll.u32 %v5768_v28, 16 }
 0x151   : > { %v1247_v31 = vpop.f32.mrf.mxu1 }
 0x152   : > { %v2153_v48 = vadd.f32 %v2095_v39, %v1799_v22  ;;  %v2816_v42 = vpop.f32.mrf.mxu0  ;;  %v1303_v1 = vadd.f32 %v1247_v31, %v6287_v58  ;;  %v3853_v58 = vsel %vm6133_vm6, %v3848_v16, %v6784_v34  ;;  %v3867_v14 = vrot.slane %v3865_v13, 4 }
 0x154   : > { %5632 = vmatmul.msk.bf16.vlgmr.msra.gmra.mxu1 %vm424_vm1, %v3194_v2  ;;  %5745 = vmatmul.msk.bf16.vlgmr.msra.gmra.mxu2 %vm424_vm1, %v5942_v54  ;;  %v6799_v19 = vadd.f32 %v2813_v33, %v2153_v48  ;;  %v3878_v33 = vshrl.u32 %v5768_v28, 16  ;;  %v3026_v2 = vsel %vm6137_vm7, %v5616_v30, %v3025_v8  ;;  %v3029_v54 = vsel %vm6137_vm7, %v3027_v53, %v3028_v61  ;;  %v5574_v8 = vld [vmem:[%s6076_s29 + $0x28] sm:$0xf]  ;;  %v5833_v61 = vld [vmem:[%s6076_s29 + $0x34] sm:$0xf] }
 0x155   : > { %5810 = vmatmul.msk.bf16.vlgmr.msra.gmra.mxu3 %vm424_vm1, %v4266_v6  ;;  %5891 = vmatmul.msk.bf16.vlgmr.msra.gmra.mxu0 %vm424_vm1, %v4760_v32  ;;  %v3863_v32 = vsel %vm6133_vm6, %v3858_v26, %v3862_v3  ;;  %v6818_v48 = vrot.slane %v3874_v50, 5  ;;  %v3164_v34 = vunpack.c.l.b16 %v3026_v2  ;;  %v3165_v43 = vunpack.c.l.b16 %v3029_v54  ;;  %v5575_v50 = vld [vmem:[%s6076_s29 + $0x2c] sm:$0x1]  ;;  %v5832_v54 = vld [vmem:[%s6076_s29 + $0x30] sm:$0xe] }
 0x156   : > { %v3880_v24 = vrot.slane %v3878_v33, 4  ;;  %v4236_v53 = vunpack.c.l.b16 %v3853_v58  ;;  %v4237_v21 = vunpack.c.l.b16 %v3863_v32  ;;  %v4731_v28 = vunpack.c.l.b16 %v4595_v20 }
 0x157   : > { %v1744_v38 = vpop.f32.mrf.mxu2  ;;  %v3032_v26 = vrot.slane %v5574_v8, 5  ;;  %v3871_v36 = vor.u32 %v3870_v4, %v3867_v14  ;;  %v3195_v13 = vpack.c.b16 %v3165_v43, %v3164_v34  ;;  %v4598_v33 = vrot.slane %v5833_v61, 5 }
 0x158   : > { %v1800_v17 = vadd.f32 %v1744_v38, %v1303_v1  ;;  %v2098_v22 = vpop.f32.mrf.mxu3  ;;  %v5573_v1 = vld [vmem:[%s6076_s29 + $0x24] sm:$0xe]  ;;  %v3881_v49 = vor.u32 %v3880_v24, %v6818_v48  ;;  %v4761_v2 = vpack.c.b16 %v4731_v28, %v4730_v51  ;;  %v3035_v35 = vrot.slane %v5575_v50, 5 }
 0x159   : > { %v1249_v39 = vpop.f32.mrf.mxu1  ;;  %v3034_v32 = vrot.slane %v3032_v26, 4  ;;  %v3872_v20 = vrot.slane %v3871_v36, 4  ;;  %v3886_v14 = vrot.slane %v3884_v60, 5  ;;  %v5876_v4 = vrot.slane %v5832_v54, 9 }
 0x15a   : > { %v2154_v6 = vadd.f32 %v2098_v22, %v1800_v17  ;;  %v2818_v31 = vpop.f32.mrf.mxu0  ;;  %v1304_v16 = vadd.f32 %v1249_v39, %v6310_v29  ;;  %v4267_v22 = vpack.c.b16 %v4237_v21, %v4236_v53  ;;  %v5834_v29 = vld [vmem:[%s6076_s29 + $0x38] sm:$0x1]  ;;  %v3882_v8 = vrot.slane %v3881_v49, 4  ;;  %v5770_v53 = vld [vmem:[%s6076_s29 + $0x3c] sm:$0xf] }
 0x15b   : > { %v4600_v24 = vrot.slane %v4598_v33, 4  ;;  %v4601_v34 = vrot.slane %v5834_v29, 5  ;;  %v5771_v21 = vld [vmem:[%s6076_s29 + $0x40] sm:$0xf]  ;;  %v3036_v61 = vsel %vm6137_vm7, %v3034_v32, %v3035_v35  ;;  %v3889_v49 = vshrl.u32 %v5770_v53, 16 }
 0x15c   : > { %v6821_v30 = vadd.f32 %v2816_v42, %v2154_v6  ;;  %v5617_v6 = vrot.slane %v5573_v1, 9  ;;  %v3887_v1 = vsel %vm6133_vm6, %v3882_v8, %v3886_v14  ;;  %v3892_v60 = vshll.u32 %v5770_v53, 16  ;;  %v5577_v29 = vld [vmem:[%s6076_s29 + $0x34] sm:$0xf]  ;;  %v5772_v8 = vld [vmem:[%s6076_s29 + $0x44] sm:$0x1] }
 0x15d   : > { %v4602_v36 = vsel %vm6137_vm7, %v4600_v24, %v4601_v34  ;;  %v3167_v50 = vunpack.c.l.b16 %v3036_v61  ;;  %v5576_v61 = vld [vmem:[%s6076_s29 + $0x30] sm:$0xe] }
 0x15e   : > { %v3033_v28 = vsel %vm6137_vm7, %v5617_v6, %v3032_v26  ;;  %v3894_v6 = vrot.slane %v3892_v60, 5  ;;  %v5618_v60 = vrot.slane %v5576_v61, 9 }
 0x15f   : > { %v1746_v3 = vpop.f32.mrf.mxu2 }
 0x160   : > { %v1801_v42 = vadd.f32 %v1746_v3, %v1304_v16  ;;  %v2100_v38 = vpop.f32.mrf.mxu3 }
 0x161   : > { %v1252_v17 = vpop.f32.mrf.mxu1 }
 0x162   : > { %v2155_v39 = vadd.f32 %v2100_v38, %v1801_v42  ;;  %v2821_v58 = vpop.f32.mrf.mxu0  ;;  %v1305_v18 = vadd.f32 %v1252_v17, %v6329_v62  ;;  %v4599_v62 = vsel %vm6137_vm7, %v5876_v4, %v4598_v33  ;;  %v3898_v42 = vshll.u32 %v5771_v21, 16  ;;  %v5836_v4 = vld [vmem:[%s6076_s29 + $0x40] sm:$0xf] }
 0x163   : > { %v3902_v38 = vshrl.u32 %v5771_v21, 16  ;;  %v4733_v33 = vunpack.c.l.b16 %v4602_v36  ;;  %v3039_v21 = vrot.slane %v5577_v29, 5  ;;  %v4605_v36 = vrot.slane %v5836_v4, 5 }
 0x164   : > { %5633 = vmatmul.msk.bf16.gmra.mxu1 %vm424_vm1, %v3195_v13  ;;  %5746 = vmatmul.msk.bf16.gmra.mxu2 %vm424_vm1, %v5943_v10  ;;  %v6833_v43 = vadd.f32 %v2818_v31, %v2155_v39  ;;  %v3877_v31 = vsel %vm6133_vm6, %v3872_v20, %v6818_v48  ;;  %v3166_v10 = vunpack.c.l.b16 %v3033_v28  ;;  %v3891_v39 = vrot.slane %v3889_v49, 4  ;;  %v5837_v49 = vld [vmem:[%s6076_s29 + $0x44] sm:$0x1] }
 0x165   : > { %5811 = vmatmul.msk.bf16.gmra.mxu3 %vm424_vm1, %v4267_v22  ;;  %5892 = vmatmul.msk.bf16.gmra.mxu0 %vm424_vm1, %v4761_v2  ;;  %v4238_v17 = vunpack.c.l.b16 %v3877_v31  ;;  %v4239_v22 = vunpack.c.l.b16 %v3887_v1  ;;  %v4732_v2 = vunpack.c.l.b16 %v4599_v62  ;;  %v6856_v32 = vrot.slane %v3898_v42, 5  ;;  %v5578_v62 = vld [vmem:[%s6076_s29 + $0x38] sm:$0x1] }
 0x166   : > { %v3904_v35 = vrot.slane %v3902_v38, 4  ;;  %v3895_v31 = vor.u32 %v3894_v6, %v3891_v39  ;;  %v3041_v42 = vrot.slane %v3039_v21, 4  ;;  %v5773_v38 = vld [vmem:[%s6076_s29 + $0x48] sm:$0xf]  ;;  %v4607_v39 = vrot.slane %v4605_v36, 4 }
 0x167   : > { %v1749_v51 = vpop.f32.mrf.mxu2  ;;  %v4268_v53 = vpack.c.b16 %v4239_v22, %v4238_v17  ;;  %v4762_v28 = vpack.c.b16 %v4733_v33, %v4732_v2  ;;  %v4608_v6 = vrot.slane %v5837_v49, 5  ;;  %v5775_v49 = vld [vmem:[%s6076_s29 + $0x50] sm:$0x1] }
 0x168   : > { %v1802_v16 = vadd.f32 %v1749_v51, %v1305_v18  ;;  %v2103_v3 = vpop.f32.mrf.mxu3  ;;  %v3196_v18 = vpack.c.b16 %v3167_v50, %v3166_v10  ;;  %v3042_v50 = vrot.slane %v5578_v62, 5  ;;  %v3896_v17 = vrot.slane %v3895_v31, 4 }
 0x169   : > { %v1254_v26 = vpop.f32.mrf.mxu1  ;;  %v4609_v31 = vsel %vm6137_vm7, %v4607_v39, %v4608_v6  ;;  %v3932_v6 = vshll.u32 %v5775_v49, 16 }
 0x16a   : > { %v2156_v13 = vadd.f32 %v2103_v3, %v1802_v16  ;;  %v2823_v48 = vpop.f32.mrf.mxu0  ;;  %v1306_v20 = vadd.f32 %v1254_v26, %v6361_v45  ;;  %v3905_v45 = vor.u32 %v3904_v35, %v6856_v32  ;;  %v3908_v16 = vshll.u32 %v5772_v8, 16  ;;  %v5835_v26 = vld [vmem:[%s6076_s29 + $0x3c] sm:$0xe] }
 0x16b   : > { %v5877_v29 = vrot.slane %v5835_v26, 9  ;;  %v3916_v8 = vshll.u32 %v5773_v38, 16 }
 0x16c   : > { %v6853_v54 = vadd.f32 %v2821_v58, %v2156_v13  ;;  %v5944_v58 = vld [vmem:[%s6076_s29 + $0x30] sm:$0xff]  ;;  %v5774_v13 = vld [vmem:[%s6076_s29 + $0x4c] sm:$0xf]  ;;  %v3906_v22 = vrot.slane %v3905_v45, 4  ;;  %v3910_v2 = vrot.slane %v3908_v16, 5 }
 0x16d   : > { %v4606_v61 = vsel %vm6137_vm7, %v5877_v29, %v4605_v36  ;;  %v3918_v16 = vrot.slane %v3916_v8, 5  ;;  %v5945_v8 = vld [vmem:[%s6076_s29 + $0x3c] sm:$0xff] }
 0x16e   : > { %v4734_v36 = vunpack.c.l.b16 %v4606_v61 }
 0x16f   : > { %v1751_v14 = vpop.f32.mrf.mxu2 }
 0x170   : > { %v1803_v24 = vadd.f32 %v1751_v14, %v1306_v20  ;;  %v2105_v34 = vpop.f32.mrf.mxu3  ;;  %v3913_v20 = vshrl.u32 %v5773_v38, 16  ;;  %v3922_v14 = vshll.u32 %v5774_v13, 16 }
 0x171   : > { %v1257_v51 = vpop.f32.mrf.mxu1 }
 0x172   : > { %v2157_v3 = vadd.f32 %v2105_v34, %v1803_v24  ;;  %v2826_v1 = vpop.f32.mrf.mxu0  ;;  %v1307_v33 = vadd.f32 %v1257_v51, %v6386_v25  ;;  %v3901_v25 = vsel %vm6133_vm6, %v3896_v17, %v6856_v32  ;;  %v3915_v45 = vrot.slane %v3913_v20, 4 }
 0x174   : > { %5634 = vmatmul.msk.bf16.gmra.mxu1 %vm424_vm1, %v3196_v18  ;;  %5747 = vmatmul.msk.bf16.gmra.mxu2 %vm424_vm1, %v5944_v58  ;;  %v6871_v10 = vadd.f32 %v2823_v48, %v2157_v3  ;;  %v3926_v48 = vshrl.u32 %v5774_v13, 16  ;;  %v3040_v18 = vsel %vm6137_vm7, %v5618_v60, %v3039_v21  ;;  %v3043_v58 = vsel %vm6137_vm7, %v3041_v42, %v3042_v50  ;;  %v5580_v21 = vld [vmem:[%s6076_s29 + $0x40] sm:$0xf]  ;;  %v5839_v50 = vld [vmem:[%s6076_s29 + $0x4c] sm:$0xf] }
 0x175   : > { %5812 = vmatmul.msk.bf16.gmra.mxu3 %vm424_vm1, %v4268_v53  ;;  %5893 = vmatmul.msk.bf16.gmra.mxu0 %vm424_vm1, %v4762_v28  ;;  %v3911_v28 = vsel %vm6133_vm6, %v3906_v22, %v3910_v2  ;;  %v6890_v3 = vrot.slane %v3922_v14, 5  ;;  %v3168_v32 = vunpack.c.l.b16 %v3040_v18  ;;  %v3169_v26 = vunpack.c.l.b16 %v3043_v58  ;;  %v5581_v14 = vld [vmem:[%s6076_s29 + $0x44] sm:$0x1]  ;;  %v5838_v58 = vld [vmem:[%s6076_s29 + $0x48] sm:$0xe] }
 0x176   : > { %v3928_v62 = vrot.slane %v3926_v48, 4  ;;  %v4240_v42 = vunpack.c.l.b16 %v3901_v25  ;;  %v4241_v38 = vunpack.c.l.b16 %v3911_v28  ;;  %v4735_v13 = vunpack.c.l.b16 %v4609_v31 }
 0x177   : > { %v1754_v35 = vpop.f32.mrf.mxu2  ;;  %v3046_v22 = vrot.slane %v5580_v21, 5  ;;  %v3919_v29 = vor.u32 %v3918_v16, %v3915_v45  ;;  %v3197_v20 = vpack.c.b16 %v3169_v26, %v3168_v32  ;;  %v4612_v48 = vrot.slane %v5839_v50, 5 }
 0x178   : > { %v1804_v4 = vadd.f32 %v1754_v35, %v1307_v33  ;;  %v2108_v24 = vpop.f32.mrf.mxu3  ;;  %v5579_v33 = vld [vmem:[%s6076_s29 + $0x3c] sm:$0xe]  ;;  %v3929_v39 = vor.u32 %v3928_v62, %v6890_v3  ;;  %v4763_v18 = vpack.c.b16 %v4735_v13, %v4734_v36  ;;  %v3049_v61 = vrot.slane %v5581_v14, 5 }
 0x179   : > { %v1259_v34 = vpop.f32.mrf.mxu1  ;;  %v3048_v28 = vrot.slane %v3046_v22, 4  ;;  %v3920_v31 = vrot.slane %v3919_v29, 4  ;;  %v3934_v45 = vrot.slane %v3932_v6, 5  ;;  %v5878_v16 = vrot.slane %v5838_v58, 9 }
 0x17a   : > { %v2158_v53 = vadd.f32 %v2108_v24, %v1804_v4  ;;  %v2828_v51 = vpop.f32.mrf.mxu0  ;;  %v1308_v17 = vadd.f32 %v1259_v34, %v6410_v9  ;;  %v4269_v24 = vpack.c.b16 %v4241_v38, %v4240_v42  ;;  %v5840_v9 = vld [vmem:[%s6076_s29 + $0x50] sm:$0x1]  ;;  %v3930_v21 = vrot.slane %v3929_v39, 4  ;;  %v5776_v42 = vld [vmem:[%s6076_s29 + $0x54] sm:$0xf] }
 0x17b   : > { %v4614_v62 = vrot.slane %v4612_v48, 4  ;;  %v4615_v32 = vrot.slane %v5840_v9, 5  ;;  %v5777_v38 = vld [vmem:[%s6076_s29 + $0x58] sm:$0xf]  ;;  %v3050_v50 = vsel %vm6137_vm7, %v3048_v28, %v3049_v61  ;;  %v3937_v39 = vshrl.u32 %v5776_v42, 16 }
 0x17c   : > { %v6893_v60 = vadd.f32 %v2826_v1, %v2158_v53  ;;  %v5619_v53 = vrot.slane %v5579_v33, 9  ;;  %v3935_v33 = vsel %vm6133_vm6, %v3930_v21, %v3934_v45  ;;  %v3940_v6 = vshll.u32 %v5776_v42, 16  ;;  %v5583_v9 = vld [vmem:[%s6076_s29 + $0x4c] sm:$0xf]  ;;  %v5778_v21 = vld [vmem:[%s6076_s29 + $0x5c] sm:$0x1] }
 0x17d   : > { %v4616_v29 = vsel %vm6137_vm7, %v4614_v62, %v4615_v32  ;;  %v3171_v14 = vunpack.c.l.b16 %v3050_v50  ;;  %v5582_v50 = vld [vmem:[%s6076_s29 + $0x48] sm:$0xe] }
 0x17e   : > { %v3047_v13 = vsel %vm6137_vm7, %v5619_v53, %v3046_v22  ;;  %v3942_v53 = vrot.slane %v3940_v6, 5  ;;  %v5620_v6 = vrot.slane %v5582_v50, 9 }
 0x17f   : > { %v1756_v2 = vpop.f32.mrf.mxu2 }
 0x180   : > { %v1805_v1 = vadd.f32 %v1756_v2, %v1308_v17  ;;  %v2110_v35 = vpop.f32.mrf.mxu3 }
 0x181   : > { %v1262_v4 = vpop.f32.mrf.mxu1 }
 0x182   : > { %v2159_v34 = vadd.f32 %v2110_v35, %v1805_v1  ;;  %v2831_v25 = vpop.f32.mrf.mxu0  ;;  %v1309_v49 = vadd.f32 %v1262_v4, %v6431_v59  ;;  %v4613_v59 = vsel %vm6137_vm7, %v5878_v16, %v4612_v48  ;;  %v3946_v1 = vshll.u32 %v5777_v38, 16  ;;  %v5842_v16 = vld [vmem:[%s6076_s29 + $0x58] sm:$0xf] }
 0x183   : > { %v3950_v35 = vshrl.u32 %v5777_v38, 16  ;;  %v4737_v48 = vunpack.c.l.b16 %v4616_v29  ;;  %v3053_v38 = vrot.slane %v5583_v9, 5  ;;  %v4619_v29 = vrot.slane %v5842_v16, 5 }
 0x184   : > { %5635 = vmatmul.msk.bf16.gmra.mxu1 %vm424_vm1, %v3197_v20  ;;  %5748 = vmatmul.msk.bf16.gmra.mxu2 %vm424_vm1, %v5945_v8  ;;  %v6905_v26 = vadd.f32 %v2828_v51, %v2159_v34  ;;  %v3925_v51 = vsel %vm6133_vm6, %v3920_v31, %v6890_v3  ;;  %v3170_v8 = vunpack.c.l.b16 %v3047_v13  ;;  %v3939_v34 = vrot.slane %v3937_v39, 4  ;;  %v5843_v39 = vld [vmem:[%s6076_s29 + $0x5c] sm:$0x1] }
 0x185   : > { %5813 = vmatmul.msk.bf16.gmra.mxu3 %vm424_vm1, %v4269_v24  ;;  %5894 = vmatmul.msk.bf16.gmra.mxu0 %vm424_vm1, %v4763_v18  ;;  %v4242_v4 = vunpack.c.l.b16 %v3925_v51  ;;  %v4243_v24 = vunpack.c.l.b16 %v3935_v33  ;;  %v4736_v18 = vunpack.c.l.b16 %v4613_v59  ;;  %v6928_v28 = vrot.slane %v3946_v1, 5  ;;  %v5584_v59 = vld [vmem:[%s6076_s29 + $0x50] sm:$0x1] }
 0x186   : > { %v3952_v61 = vrot.slane %v3950_v35, 4  ;;  %v3943_v51 = vor.u32 %v3942_v53, %v3939_v34  ;;  %v3055_v1 = vrot.slane %v3053_v38, 4  ;;  %v5779_v35 = vld [vmem:[%s6076_s29 + $0x60] sm:$0xf]  ;;  %v4621_v34 = vrot.slane %v4619_v29, 4 }
 0x187   : > { %v1759_v36 = vpop.f32.mrf.mxu2  ;;  %v4270_v42 = vpack.c.b16 %v4243_v24, %v4242_v4  ;;  %v4764_v13 = vpack.c.b16 %v4737_v48, %v4736_v18  ;;  %v4622_v53 = vrot.slane %v5843_v39, 5  ;;  %v5781_v39 = vld [vmem:[%s6076_s29 + $0x68] sm:$0x1] }
 0x188   : > { %v1806_v17 = vadd.f32 %v1759_v36, %v1309_v49  ;;  %v2113_v2 = vpop.f32.mrf.mxu3  ;;  %v3198_v49 = vpack.c.b16 %v3171_v14, %v3170_v8  ;;  %v3056_v14 = vrot.slane %v5584_v59, 5  ;;  %v3944_v4 = vrot.slane %v3943_v51, 4 }
 0x189   : > { %v1264_v22 = vpop.f32.mrf.mxu1  ;;  %v4623_v51 = vsel %vm6137_vm7, %v4621_v34, %v4622_v53 }
 0x18a   : > { %v2160_v20 = vadd.f32 %v2113_v2, %v1806_v17  ;;  %v2833_v3 = vpop.f32.mrf.mxu0  ;;  %v1310_v31 = vadd.f32 %v1264_v22, %v6460_v56  ;;  %v3953_v56 = vor.u32 %v3952_v61, %v6928_v28  ;;  %v3956_v17 = vshll.u32 %v5778_v21, 16  ;;  %v5841_v22 = vld [vmem:[%s6076_s29 + $0x54] sm:$0xe] }
 0x18b   : > { %v5879_v9 = vrot.slane %v5841_v22, 9  ;;  %v3964_v21 = vshll.u32 %v5779_v35, 16 }
 0x18c   : > { %v6925_v58 = vadd.f32 %v2831_v25, %v2160_v20  ;;  %v5946_v25 = vld [vmem:[%s6076_s29 + $0x48] sm:$0xff]  ;;  %v5780_v20 = vld [vmem:[%s6076_s29 + $0x64] sm:$0xf]  ;;  %v3954_v24 = vrot.slane %v3953_v56, 4  ;;  %v3958_v18 = vrot.slane %v3956_v17, 5 }
 0x18d   : > { %v4620_v50 = vsel %vm6137_vm7, %v5879_v9, %v4619_v29  ;;  %v3966_v17 = vrot.slane %v3964_v21, 5  ;;  %v5585_v9 = vld [vmem:[%s6076_s29 + $0x54] sm:$0xe] }
 0x18e   : > { %v4738_v29 = vunpack.c.l.b16 %v4620_v50  ;;  %v5621_v50 = vrot.slane %v5585_v9, 9 }
 0x18f   : > { %v1761_v45 = vpop.f32.mrf.mxu2 }
 0x190   : > { %v1807_v62 = vadd.f32 %v1761_v45, %v1310_v31  ;;  %v2115_v32 = vpop.f32.mrf.mxu3  ;;  %v3961_v31 = vshrl.u32 %v5779_v35, 16  ;;  %v3970_v45 = vshll.u32 %v5780_v20, 16 }
 0x191   : > { %v1267_v36 = vpop.f32.mrf.mxu1 }
 0x192   : > { %v2161_v2 = vadd.f32 %v2115_v32, %v1807_v62  ;;  %v2836_v33 = vpop.f32.mrf.mxu0  ;;  %v1311_v48 = vadd.f32 %v1267_v36, %v6293_v63  ;;  %v3949_v63 = vsel %vm6133_vm6, %v3944_v4, %v6928_v28  ;;  %v3963_v56 = vrot.slane %v3961_v31, 4  ;;  %v7419_v4 = vld [vmem:[#allocation3_spill] sm:$0xff] }
 0x194   : > { %5636 = vmatmul.msk.bf16.gmra.mxu1 %vm424_vm1, %v3198_v49  ;;  %5749 = vmatmul.msk.bf16.gmra.mxu2 %vm424_vm1, %v5946_v25  ;;  %v6943_v8 = vadd.f32 %v2833_v3, %v2161_v2  ;;  %v3974_v3 = vshrl.u32 %v5780_v20, 16  ;;  %v3054_v49 = vsel %vm6137_vm7, %v5620_v6, %v3053_v38  ;;  %v3057_v25 = vsel %vm6137_vm7, %v3055_v1, %v3056_v14  ;;  %v5586_v38 = vld [vmem:[%s6076_s29 + $0x58] sm:$0xf]  ;;  %v5845_v14 = vld [vmem:[%s6076_s29 + $0x64] sm:$0xf] }
 0x195   : > { %5814 = vmatmul.msk.bf16.gmra.mxu3 %vm424_vm1, %v4270_v42  ;;  %5895 = vmatmul.msk.bf16.gmra.mxu0 %vm424_vm1, %v4764_v13  ;;  %v3959_v13 = vsel %vm6133_vm6, %v3954_v24, %v3958_v18  ;;  %v6962_v2 = vrot.slane %v3970_v45, 5  ;;  %v3172_v28 = vunpack.c.l.b16 %v3054_v49  ;;  %v3173_v22 = vunpack.c.l.b16 %v3057_v25  ;;  %v5947_v45 = vld [vmem:[%s6076_s29 + $0x54] sm:$0xff] }
 0x196   : > { %v3976_v59 = vrot.slane %v3974_v3, 4  ;;  %v4244_v1 = vunpack.c.l.b16 %v3949_v63  ;;  %v4245_v35 = vunpack.c.l.b16 %v3959_v13  ;;  %v4739_v20 = vunpack.c.l.b16 %v4623_v51  ;;  %v5587_v3 = vld [vmem:[%s6076_s29 + $0x5c] sm:$0x1]  ;;  %v5844_v63 = vld [vmem:[%s6076_s29 + $0x60] sm:$0xe] }
 0x197   : > { %v1764_v61 = vpop.f32.mrf.mxu2  ;;  %v3060_v18 = vrot.slane %v5586_v38, 5  ;;  %v3967_v34 = vor.u32 %v3966_v17, %v3963_v56  ;;  %v3199_v21 = vpack.c.b16 %v3173_v22, %v3172_v28  ;;  %v3063_v38 = vrot.slane %v5587_v3, 5 }
 0x198   : > { %v1808_v16 = vadd.f32 %v1764_v61, %v1311_v48  ;;  %v2118_v62 = vpop.f32.mrf.mxu3  ;;  %v3977_v53 = vor.u32 %v3976_v59, %v6962_v2  ;;  %v3980_v61 = vshll.u32 %v5781_v39, 16  ;;  %v4271_v49 = vpack.c.b16 %v4245_v35, %v4244_v1  ;;  %v7420_v35 = vld [vmem:[#allocation4_spill] sm:$0xff] }
 0x199   : > { %v1269_v32 = vpop.f32.mrf.mxu1  ;;  %v4765_v25 = vpack.c.b16 %v4739_v20, %v4738_v29  ;;  %v3062_v51 = vrot.slane %v3060_v18, 4  ;;  %v3968_v56 = vrot.slane %v3967_v34, 4  ;;  %v5880_v28 = vrot.slane %v5844_v63, 9  ;;  %v5782_v20 = vld [vmem:[%s6076_s29 + $0x6c] sm:$0xf] }
 0x19a   : > { %v2162_v42 = vadd.f32 %v2118_v62, %v1808_v16  ;;  %v2838_v36 = vpop.f32.mrf.mxu0  ;;  %v1312_v24 = vadd.f32 %v1269_v32, %v7419_v4  ;;  %v4626_v16 = vrot.slane %v5845_v14, 5  ;;  %v5846_v32 = vld [vmem:[%s6076_s29 + $0x68] sm:$0x1]  ;;  %v3978_v17 = vrot.slane %v3977_v53, 4  ;;  %v5783_v14 = vld [vmem:[%s6076_s29 + $0x70] sm:$0xf] }
 0x19b   : > { %v3982_v59 = vrot.slane %v3980_v61, 5  ;;  %v4629_v39 = vrot.slane %v5846_v32, 5  ;;  %v3998_v3 = vshrl.u32 %v5783_v14, 16 }
 0x19c   : > { %v6965_v6 = vadd.f32 %v2836_v33, %v2162_v42  ;;  %v4628_v22 = vrot.slane %v4626_v16, 4  ;;  %v4627_v61 = vsel %vm6137_vm7, %v5880_v28, %v4626_v16  ;;  %v7421_v28 = vld [vmem:[#allocation5_spill] sm:$0xff] }
 0x19d   : > { %v3983_v53 = vsel %vm6133_vm6, %v3978_v17, %v3982_v59  ;;  %v4000_v59 = vrot.slane %v3998_v3, 4  ;;  %v5847_v3 = vld [vmem:[%s6076_s29 + $0x6c] sm:$0xe] }
 0x19e   : > { %v4247_v32 = vunpack.c.l.b16 %v3983_v53 }
 0x19f   : > { %v1766_v48 = vpop.f32.mrf.mxu2 }
 0x1a0   : > { %v1809_v33 = vadd.f32 %v1766_v48, %v1312_v24  ;;  %v2120_v31 = vpop.f32.mrf.mxu3  ;;  %v3061_v24 = vsel %vm6137_vm7, %v5621_v50, %v3060_v18  ;;  %v3064_v48 = vsel %vm6137_vm7, %v3062_v51, %v3063_v38  ;;  %v5589_v51 = vld [vmem:[%s6076_s29 + $0x64] sm:$0xf] }
 0x1a1   : > { %v1272_v62 = vpop.f32.mrf.mxu1 }
 0x1a2   : > { %v2163_v42 = vadd.f32 %v2120_v31, %v1809_v33  ;;  %v2841_v13 = vpop.f32.mrf.mxu0  ;;  %v1313_v29 = vadd.f32 %v1272_v62, %v7420_v35  ;;  %v4630_v33 = vsel %vm6137_vm7, %v4628_v22, %v4629_v39  ;;  %v3985_v31 = vshrl.u32 %v5782_v20, 16  ;;  %v5784_v39 = vld [vmem:[%s6076_s29 + $0x74] sm:$0x1] }
 0x1a3   : > { %v4741_v16 = vunpack.c.l.b16 %v4630_v33  ;;  %v4004_v33 = vshll.u32 %v5784_v39, 16 }
 0x1a4   : > { %5637 = vmatmul.msk.bf16.gmra.mxu1 %vm424_vm1, %v3199_v21  ;;  %5750 = vmatmul.msk.bf16.gmra.mxu2 %vm424_vm1, %v5947_v45  ;;  %v6977_v1 = vadd.f32 %v2838_v36, %v2163_v42  ;;  %v3973_v36 = vsel %vm6133_vm6, %v3968_v56, %v6962_v2  ;;  %v3988_v21 = vshll.u32 %v5782_v20, 16  ;;  %v3994_v45 = vshll.u32 %v5783_v14, 16 }
 0x1a5   : > { %5815 = vmatmul.msk.bf16.gmra.mxu3 %vm424_vm1, %v4271_v49  ;;  %5896 = vmatmul.msk.bf16.gmra.mxu0 %vm424_vm1, %v4765_v25  ;;  %v3174_v49 = vunpack.c.l.b16 %v3061_v24  ;;  %v3175_v25 = vunpack.c.l.b16 %v3064_v48  ;;  %v4246_v63 = vunpack.c.l.b16 %v3973_v36  ;;  %v4740_v42 = vunpack.c.l.b16 %v4627_v61 }
 0x1a6   : > { %v3987_v38 = vrot.slane %v3985_v31, 4  ;;  %v3990_v56 = vrot.slane %v3988_v21, 5  ;;  %v7000_v17 = vrot.slane %v3994_v45, 5  ;;  %v3067_v48 = vrot.slane %v5589_v51, 5  ;;  %v5590_v21 = vld [vmem:[%s6076_s29 + $0x68] sm:$0x1] }
 0x1a7   : > { %v1769_v4 = vpop.f32.mrf.mxu2  ;;  %v4272_v24 = vpack.c.b16 %v4247_v32, %v4246_v63  ;;  %v5785_v63 = vld [vmem:[%s6076_s29 + $0x78] sm:$0xf]  ;;  %v5786_v32 = vld [vmem:[%s6076_s29 + $0x7c] sm:$0xf] }
 0x1a8   : > { %v1810_v9 = vadd.f32 %v1769_v4, %v1313_v29  ;;  %v2123_v34 = vpop.f32.mrf.mxu3  ;;  %v5848_v29 = vld [vmem:[%s6076_s29 + $0x70] sm:$0xf]  ;;  %v3200_v4 = vpack.c.b16 %v3175_v25, %v3174_v49  ;;  %v3991_v53 = vor.u32 %v3990_v56, %v3987_v38  ;;  %v4001_v61 = vor.u32 %v4000_v59, %v7000_v17  ;;  %v7423_v59 = vld [vmem:[#allocation6_spill] sm:$0xff] }
 0x1a9   : > { %v1274_v18 = vpop.f32.mrf.mxu1  ;;  %v4633_v45 = vrot.slane %v5848_v29, 5  ;;  %v3069_v25 = vrot.slane %v3067_v48, 4  ;;  %v4006_v56 = vrot.slane %v4004_v33, 5 }
 0x1aa   : > { %v2164_v62 = vadd.f32 %v2123_v34, %v1810_v9  ;;  %v2843_v2 = vpop.f32.mrf.mxu0  ;;  %v1314_v22 = vadd.f32 %v1274_v18, %v7421_v28  ;;  %v4766_v9 = vpack.c.b16 %v4741_v16, %v4740_v42  ;;  %v5588_v34 = vld [vmem:[%s6076_s29 + $0x60] sm:$0xe]  ;;  %v3070_v16 = vrot.slane %v5590_v21, 5 }
 0x1ab   : > { %v5622_v49 = vrot.slane %v5588_v34, 9  ;;  %v3992_v51 = vrot.slane %v3991_v53, 4  ;;  %v4002_v38 = vrot.slane %v4001_v61, 4  ;;  %v4635_v39 = vrot.slane %v4633_v45, 4 }
 0x1ac   : > { %v6997_v50 = vadd.f32 %v2841_v13, %v2164_v62  ;;  %v5948_v13 = vld [vmem:[%s6076_s29 + $0x60] sm:$0xff]  ;;  %v5849_v62 = vld [vmem:[%s6076_s29 + $0x74] sm:$0x1]  ;;  %v3071_v53 = vsel %vm6137_vm7, %v3069_v25, %v3070_v16 }
 0x1ad   : > { %v5787_v16 = vld [vmem:[%s6076_s29 + $0x80] sm:$0x1] }
 0x1af   : > { %v1771_v35 = vpop.f32.mrf.mxu2 }
 0x1b0   : > { %v1811_v20 = vadd.f32 %v1771_v35, %v1314_v22  ;;  %v2125_v14 = vpop.f32.mrf.mxu3  ;;  %v5881_v22 = vrot.slane %v5847_v3, 9  ;;  %v4636_v35 = vrot.slane %v5849_v62, 5 }
 0x1b1   : > { %v1277_v36 = vpop.f32.mrf.mxu1 }
 0x1b2   : > { %v2165_v18 = vadd.f32 %v2125_v14, %v1811_v20  ;;  %v2846_v31 = vpop.f32.mrf.mxu0  ;;  %v1315_v28 = vadd.f32 %v1277_v36, %v7423_v59  ;;  %v4009_v20 = vshrl.u32 %v5785_v63, 16  ;;  %v4012_v14 = vshll.u32 %v5785_v63, 16 }
 0x1b3   : > { %v3997_v36 = vsel %vm6133_vm6, %v3992_v51, %v7000_v17  ;;  %v4634_v21 = vsel %vm6137_vm7, %v5881_v22, %v4633_v45  ;;  %v4637_v3 = vsel %vm6137_vm7, %v4635_v39, %v4636_v35  ;;  %v3177_v63 = vunpack.c.l.b16 %v3071_v53  ;;  %v7425_v22 = vld [vmem:[#allocation7_spill] sm:$0xff]  ;;  %v5949_v53 = vld [vmem:[%s6076_s29 + $0x6c] sm:$0xff] }
 0x1b4   : > { %5638 = vmatmul.msk.bf16.gmra.mxu1 %vm424_vm1, %v3200_v4  ;;  %5751 = vmatmul.msk.bf16.gmra.mxu2 %vm424_vm1, %v5948_v13  ;;  %v7015_v42 = vadd.f32 %v2843_v2, %v2165_v18  ;;  %v4018_v4 = vshll.u32 %v5786_v32, 16  ;;  %v4022_v13 = vshrl.u32 %v5786_v32, 16  ;;  %v4007_v18 = vsel %vm6133_vm6, %v4002_v38, %v4006_v56  ;;  %v5592_v32 = vld [vmem:[%s6076_s29 + $0x70] sm:$0xf] }
 0x1b5   : > { %5816 = vmatmul.msk.bf16.gmra.mxu3 %vm424_vm1, %v4272_v24  ;;  %5897 = vmatmul.msk.bf16.gmra.mxu0 %vm424_vm1, %v4766_v9  ;;  %v3068_v9 = vsel %vm6137_vm7, %v5622_v49, %v3067_v48  ;;  %v4011_v48 = vrot.slane %v4009_v20, 4  ;;  %v4014_v62 = vrot.slane %v4012_v14, 5  ;;  %v4248_v38 = vunpack.c.l.b16 %v3997_v36  ;;  %v5593_v20 = vld [vmem:[%s6076_s29 + $0x74] sm:$0x1] }
 0x1b6   : > { %7422 = vst [vmem:[#allocation3_spill] sm:$0xff] %v7015_v42  ;;  %v7033_v49 = vrot.slane %v4018_v4, 5  ;;  %v4024_v25 = vrot.slane %v4022_v13, 4  ;;  %v3176_v17 = vunpack.c.l.b16 %v3068_v9  ;;  %v4249_v56 = vunpack.c.l.b16 %v4007_v18 }
 0x1b7   : > { %v1774_v29 = vpop.f32.mrf.mxu2  ;;  %v4742_v45 = vunpack.c.l.b16 %v4634_v21  ;;  %v4743_v59 = vunpack.c.l.b16 %v4637_v3  ;;  %v3074_v14 = vrot.slane %v5592_v32, 5  ;;  %v4015_v4 = vor.u32 %v4014_v62, %v4011_v48  ;;  %v5850_v3 = vld [vmem:[%s6076_s29 + $0x78] sm:$0xe] }
 0x1b8   : > { %v1812_v2 = vadd.f32 %v1774_v29, %v1315_v28  ;;  %v2128_v34 = vpop.f32.mrf.mxu3  ;;  %v5851_v28 = vld [vmem:[%s6076_s29 + $0x7c] sm:$0xf]  ;;  %v5591_v29 = vld [vmem:[%s6076_s29 + $0x6c] sm:$0xe]  ;;  %v4025_v13 = vor.u32 %v4024_v25, %v7033_v49  ;;  %v3201_v9 = vpack.c.b16 %v3177_v63, %v3176_v17  ;;  %v4273_v18 = vpack.c.b16 %v4249_v56, %v4248_v38 }
 0x1b9   : > { %v1279_v24 = vpop.f32.mrf.mxu1  ;;  %v4640_v36 = vrot.slane %v5851_v28, 5  ;;  %v4767_v21 = vpack.c.b16 %v4743_v59, %v4742_v45  ;;  %v5623_v42 = vrot.slane %v5591_v29, 9  ;;  %v3077_v32 = vrot.slane %v5593_v20, 5  ;;  %v7427_v45 = vld [vmem:[#allocation8_spill] sm:$0xff]  ;;  %v5788_v28 = vld [vmem:[%s6076_s29 + $0x84] sm:$0xf] }
 0x1ba   : > { %v2166_v61 = vadd.f32 %v2128_v34, %v1812_v2  ;;  %v2848_v33 = vpop.f32.mrf.mxu0  ;;  %v1316_v39 = vadd.f32 %v1279_v24, %v7425_v22  ;;  %v4028_v2 = vshll.u32 %v5787_v16, 16  ;;  %v5852_v24 = vld [vmem:[%s6076_s29 + $0x80] sm:$0x1]  ;;  %v3076_v48 = vrot.slane %v3074_v14, 4 }
 0x1bb   : > { %v4016_v62 = vrot.slane %v4015_v4, 4  ;;  %v4026_v25 = vrot.slane %v4025_v13, 4  ;;  %v5882_v17 = vrot.slane %v5850_v3, 9  ;;  %v4642_v63 = vrot.slane %v4640_v36, 4 }
 0x1bc   : > { %v7037_v51 = vadd.f32 %v2846_v31, %v2166_v61  ;;  %v4030_v16 = vrot.slane %v4028_v2, 5  ;;  %v4643_v38 = vrot.slane %v5852_v24, 5  ;;  %v3075_v29 = vsel %vm6137_vm7, %v5623_v42, %v3074_v14 }
 0x1bd   : > { %v3078_v20 = vsel %vm6137_vm7, %v3076_v48, %v3077_v32  ;;  %v4033_v14 = vshrl.u32 %v5788_v28, 16 }
 0x1be   : > { %7424 = vst [vmem:[#allocation4_spill] sm:$0xff] %v7037_v51  ;;  %v4031_v2 = vsel %vm6133_vm6, %v4026_v25, %v4030_v16  ;;  %v3179_v3 = vunpack.c.l.b16 %v3078_v20 }
 0x1bf   : > { %v1776_v35 = vpop.f32.mrf.mxu2  ;;  %v4035_v25 = vrot.slane %v4033_v14, 4 }
 0x1c0   : > { %v1813_v31 = vadd.f32 %v1776_v35, %v1316_v39  ;;  %v2130_v34 = vpop.f32.mrf.mxu3  ;;  %v5789_v39 = vld [vmem:[%s6076_s29 + $0x88] sm:$0xf] }
 0x1c1   : > { %v1282_v61 = vpop.f32.mrf.mxu1 }
 0x1c2   : > { %v2167_v22 = vadd.f32 %v2130_v34, %v1813_v31  ;;  %v2851_v51 = vpop.f32.mrf.mxu0  ;;  %v1317_v59 = vadd.f32 %v1282_v61, %v7427_v45  ;;  %v4641_v31 = vsel %vm6137_vm7, %v5882_v17, %v4640_v36  ;;  %v4644_v34 = vsel %vm6137_vm7, %v4642_v63, %v4643_v38  ;;  %v7429_v38 = vld [vmem:[#allocation9_spill] sm:$0xff] }
 0x1c3   : > { %v4046_v61 = vshrl.u32 %v5789_v39, 16  ;;  %v4744_v32 = vunpack.c.l.b16 %v4641_v31  ;;  %v4745_v36 = vunpack.c.l.b16 %v4644_v34  ;;  %v5594_v31 = vld [vmem:[%s6076_s29 + $0x78] sm:$0xe] }
 0x1c4   : > { %5639 = vmatmul.msk.bf16.gmra.mxu1 %vm424_vm1, %v3201_v9  ;;  %5752 = vmatmul.msk.bf16.gmra.mxu2 %vm424_vm1, %v5949_v53  ;;  %v7049_v56 = vadd.f32 %v2848_v33, %v2167_v22  ;;  %v4021_v33 = vsel %vm6133_vm6, %v4016_v62, %v7033_v49  ;;  %v4036_v9 = vshll.u32 %v5788_v28, 16  ;;  %v4042_v53 = vshll.u32 %v5789_v39, 16  ;;  %v5595_v62 = vld [vmem:[%s6076_s29 + $0x7c] sm:$0xf]  ;;  %v5854_v39 = vld [vmem:[%s6076_s29 + $0x88] sm:$0xf] }
 0x1c5   : > { %5817 = vmatmul.msk.bf16.gmra.mxu3 %vm424_vm1, %v4273_v18  ;;  %5898 = vmatmul.msk.bf16.gmra.mxu0 %vm424_vm1, %v4767_v21  ;;  %v3178_v21 = vunpack.c.l.b16 %v3075_v29  ;;  %v4250_v24 = vunpack.c.l.b16 %v4021_v33  ;;  %v4251_v22 = vunpack.c.l.b16 %v4031_v2  ;;  %v4048_v63 = vrot.slane %v4046_v61, 4  ;;  %v5596_v61 = vld [vmem:[%s6076_s29 + $0x80] sm:$0x1] }
 0x1c6   : > { %7426 = vst [vmem:[#allocation5_spill] sm:$0xff] %v7049_v56  ;;  %v4038_v16 = vrot.slane %v4036_v9, 5  ;;  %v7072_v17 = vrot.slane %v4042_v53, 5  ;;  %v4768_v2 = vpack.c.b16 %v4745_v36, %v4744_v32  ;;  %v3084_v36 = vrot.slane %v5596_v61, 5 }
 0x1c7   : > { %v1779_v35 = vpop.f32.mrf.mxu2  ;;  %v3202_v20 = vpack.c.b16 %v3179_v3, %v3178_v21  ;;  %v4274_v33 = vpack.c.b16 %v4251_v22, %v4250_v24  ;;  %v5624_v21 = vrot.slane %v5594_v31, 9  ;;  %v5791_v24 = vld [vmem:[%s6076_s29 + $0x90] sm:$0xf]  ;;  %v5792_v22 = vld [vmem:[%s6076_s29 + $0x94] sm:$0xf] }
 0x1c8   : > { %v1814_v4 = vadd.f32 %v1779_v35, %v1317_v59  ;;  %v2133_v13 = vpop.f32.mrf.mxu3  ;;  %v5790_v59 = vld [vmem:[%s6076_s29 + $0x8c] sm:$0x1]  ;;  %v4039_v34 = vor.u32 %v4038_v16, %v4035_v25 }
 0x1c9   : > { %v1284_v42 = vpop.f32.mrf.mxu1  ;;  %v4052_v14 = vshll.u32 %v5790_v59, 16 }
 0x1ca   : > { %v2168_v18 = vadd.f32 %v2133_v13, %v1814_v4  ;;  %v2853_v49 = vpop.f32.mrf.mxu0  ;;  %v1318_v45 = vadd.f32 %v1284_v42, %v7429_v38  ;;  %v3081_v4 = vrot.slane %v5595_v62, 5  ;;  %v4049_v42 = vor.u32 %v4048_v63, %v7072_v17  ;;  %v5853_v38 = vld [vmem:[%s6076_s29 + $0x84] sm:$0xe] }
 0x1cb   : > { %v4040_v62 = vrot.slane %v4039_v34, 4  ;;  %v4054_v16 = vrot.slane %v4052_v14, 5  ;;  %v5883_v59 = vrot.slane %v5853_v38, 9 }
 0x1cc   : > { %v7069_v48 = vadd.f32 %v2851_v51, %v2168_v18  ;;  %v5950_v51 = vld [vmem:[%s6076_s29 + $0x78] sm:$0xff]  ;;  %v4647_v18 = vrot.slane %v5854_v39, 5  ;;  %v3083_v3 = vrot.slane %v3081_v4, 4  ;;  %v4050_v25 = vrot.slane %v4049_v42, 4  ;;  %v7102_v42 = vld [vmem:[%s7406_s2] ss:$0 sm:$0xff] }
 0x1ce   : > { %7428 = vst [vmem:[#allocation6_spill] sm:$0xff] %v7069_v48  ;;  %v3085_v34 = vsel %vm6137_vm7, %v3083_v3, %v3084_v36  ;;  %v4055_v61 = vsel %vm6133_vm6, %v4050_v25, %v4054_v16 }
 0x1cf   : > { %v1781_v28 = vpop.f32.mrf.mxu2  ;;  %v4253_v16 = vunpack.c.l.b16 %v4055_v61 }
 0x1d0   : > { %v1815_v35 = vadd.f32 %v1781_v28, %v1318_v45  ;;  %v2135_v29 = vpop.f32.mrf.mxu3  ;;  %v5855_v45 = vld [vmem:[%s6076_s29 + $0x8c] sm:$0x1]  ;;  %v4649_v28 = vrot.slane %v4647_v18, 4 }
 0x1d1   : > { %v3270_v13 = vpop.f32.mrf.mxu1  ;;  %v4650_v39 = vrot.slane %v5855_v45, 5  ;;  %v5598_v45 = vld [vmem:[%s6076_s29 + $0x88] sm:$0xf] }
 0x1d2   : > { %v2169_v9 = vadd.f32 %v2135_v29, %v1815_v35  ;;  %v4836_v53 = vpop.f32.mrf.mxu0  ;;  %v3350_v63 = vadd.f32 %v3270_v13, %v6515_v11  ;;  %v4057_v29 = vshrl.u32 %v5791_v24, 16  ;;  %v4045_v11 = vsel %vm6133_vm6, %v4040_v62, %v7072_v17 }
 0x1d3   : > { %v4651_v38 = vsel %vm6137_vm7, %v4649_v28, %v4650_v39  ;;  %v3181_v62 = vunpack.c.l.b16 %v3085_v34  ;;  %v4252_v25 = vunpack.c.l.b16 %v4045_v11 }
 0x1d4   : > { %5640 = vmatmul.msk.bf16.gmra.mxu1 %vm424_vm1, %v3202_v20  ;;  %5753 = vmatmul.msk.bf16.gmra.mxu2 %vm424_vm1, %v5950_v51  ;;  %v7087_v32 = vadd.f32 %v2853_v49, %v2169_v9  ;;  %v4060_v20 = vshll.u32 %v5791_v24, 16  ;;  %v4066_v51 = vshll.u32 %v5792_v22, 16  ;;  %v4070_v49 = vshrl.u32 %v5792_v22, 16 }
 0x1d5   : > { %5818 = vmatmul.msk.bf16.gmra.mxu3 %vm424_vm1, %v4274_v33  ;;  %5899 = vmatmul.msk.bf16.gmra.mxu0 %vm424_vm1, %v4768_v2  ;;  %v3082_v2 = vsel %vm6137_vm7, %v5624_v21, %v3081_v4  ;;  %v4648_v4 = vsel %vm6137_vm7, %v5883_v59, %v4647_v18  ;;  %v4059_v17 = vrot.slane %v4057_v29, 4  ;;  %v4747_v18 = vunpack.c.l.b16 %v4651_v38  ;;  %v5857_v59 = vld [vmem:[%s6076_s29 + $0x94] sm:$0xf] }
 0x1d6   : > { %7430 = vst [vmem:[#allocation7_spill] sm:$0xff] %v7087_v32  ;;  %v4062_v21 = vrot.slane %v4060_v20, 5  ;;  %v7111_v3 = vrot.slane %v4066_v51, 5  ;;  %v4072_v24 = vrot.slane %v4070_v49, 4  ;;  %v3180_v36 = vunpack.c.l.b16 %v3082_v2  ;;  %v5597_v20 = vld [vmem:[%s6076_s29 + $0x84] sm:$0xe] }
 0x1d7   : > { %v3624_v35 = vpop.f32.mrf.mxu2  ;;  %v3088_v29 = vrot.slane %v5598_v45, 5  ;;  %v5856_v45 = vld [vmem:[%s6076_s29 + $0x90] sm:$0xe]  ;;  %v5625_v56 = vrot.slane %v5597_v20, 9 }
 0x1d8   : > { %v3704_v31 = vadd.f32 %v3624_v35, %v3350_v63  ;;  %v4342_v9 = vpop.f32.mrf.mxu3  ;;  %v5793_v63 = vld [vmem:[%s6076_s29 + $0x98] sm:$0x1]  ;;  %v4746_v35 = vunpack.c.l.b16 %v4648_v4  ;;  %v4063_v51 = vor.u32 %v4062_v21, %v4059_v17  ;;  %v4073_v49 = vor.u32 %v4072_v24, %v7111_v3 }
 0x1d9   : > { %v3272_v33 = vpop.f32.mrf.mxu1  ;;  %v3203_v11 = vpack.c.b16 %v3181_v62, %v3180_v36  ;;  %v4275_v4 = vpack.c.b16 %v4253_v16, %v4252_v25  ;;  %v3090_v17 = vrot.slane %v3088_v29, 4  ;;  %v5884_v62 = vrot.slane %v5856_v45, 9 }
 0x1da   : > { %v4422_v13 = vadd.f32 %v4342_v9, %v3704_v31  ;;  %v4838_v14 = vpop.f32.mrf.mxu0  ;;  %v3351_v39 = vadd.f32 %v3272_v33, %v6517_v47  ;;  %v4076_v31 = vshll.u32 %v5793_v63, 16  ;;  %v5951_v47 = vld [vmem:[%s6076_s29 + $0x84] sm:$0xff]  ;;  %v5599_v33 = vld [vmem:[%s6076_s29 + $0x8c] sm:$0x1]  ;;  %v4769_v38 = vpack.c.b16 %v4747_v18, %v4746_v35 }
 0x1db   : > { %v3091_v21 = vrot.slane %v5599_v33, 5  ;;  %v4064_v24 = vrot.slane %v4063_v51, 4  ;;  %v4074_v63 = vrot.slane %v4073_v49, 4 }
 0x1dc   : > { %v4916_v22 = vadd.f32 %v4836_v53, %v4422_v13  ;;  %v4654_v13 = vrot.slane %v5857_v59, 5  ;;  %v5794_v59 = vld [vmem:[%s6076_s29 + $0x9c] sm:$0xf] }
 0x1dd   : > { %v4069_v20 = vsel %vm6133_vm6, %v4064_v24, %v7111_v3 }
 0x1de   : > { %v5016_v28 = vadd.f32 %v7102_v42, %v4916_v22  ;;  %v5858_v22 = vld [vmem:[%s6076_s29 + $0x98] sm:$0x1]  ;;  %v4656_v25 = vrot.slane %v4654_v13, 4 }
 0x1df   : > { %v3626_v53 = vpop.f32.mrf.mxu2  ;;  %v4657_v16 = vrot.slane %v5858_v22, 5 }
 0x1e0   : > { %v5048_v9 = vmax.f32 %v5016_v28, 0.0  ;;  %v3705_v2 = vadd.f32 %v3626_v53, %v3351_v39  ;;  %v4344_v34 = vpop.f32.mrf.mxu3  ;;  %v4078_v28 = vrot.slane %v4076_v31, 5  ;;  %v5795_v39 = vld [vmem:[%s6076_s29 + $0xa0] sm:$0xf] }
 0x1e1   : > { %v3275_v61 = vpop.f32.mrf.mxu1 }
 0x1e2   : > { %5080 = vst [vmem:[%s7121_s12] sm:$0xff] %v5048_v9  ;;  %v4423_v32 = vadd.f32 %v4344_v34, %v3705_v2  ;;  %v4841_v48 = vpop.f32.mrf.mxu0  ;;  %v3352_v18 = vadd.f32 %v3275_v61, %v6559_v37  ;;  %v4079_v51 = vsel %vm6133_vm6, %v4074_v63, %v4078_v28  ;;  %v4655_v9 = vsel %vm6137_vm7, %v5884_v62, %v4654_v13 }
 0x1e3   : > { %v4658_v2 = vsel %vm6137_vm7, %v4656_v25, %v4657_v16  ;;  %v4084_v34 = vshll.u32 %v5794_v59, 16  ;;  %v4255_v22 = vunpack.c.l.b16 %v4079_v51  ;;  %v4748_v13 = vunpack.c.l.b16 %v4655_v9  ;;  %v5796_v16 = vld [vmem:[%s6076_s29 + $0xa4] sm:$0x1] }
 0x1e4   : > { %v4917_v36 = vadd.f32 %v4838_v14, %v4423_v32  ;;  %5641 = vmatmul.msk.bf16.gmra.mxu1 %vm424_vm1, %v3203_v11  ;;  %5754 = vmatmul.msk.bf16.gmra.mxu2 %vm424_vm1, %v5951_v47  ;;  %v3089_v32 = vsel %vm6137_vm7, %v5625_v56, %v3088_v29  ;;  %v3092_v14 = vsel %vm6137_vm7, %v3090_v17, %v3091_v21  ;;  %v4081_v29 = vshrl.u32 %v5794_v59, 16  ;;  %v5601_v21 = vld [vmem:[%s6076_s29 + $0x94] sm:$0xf] }
 0x1e5   : > { %5819 = vmatmul.msk.bf16.gmra.mxu3 %vm424_vm1, %v4275_v4  ;;  %5900 = vmatmul.msk.bf16.gmra.mxu0 %vm424_vm1, %v4769_v38  ;;  %v4090_v11 = vshll.u32 %v5795_v39, 16  ;;  %v4094_v47 = vshrl.u32 %v5795_v39, 16  ;;  %v3182_v61 = vunpack.c.l.b16 %v3089_v32  ;;  %v3183_v4 = vunpack.c.l.b16 %v3092_v14  ;;  %v5952_v32 = vld [vmem:[%s6076_s29 + $0x90] sm:$0xff] }
 0x1e6   : > { %v5017_v35 = vadd.f32 %v7102_v42, %v4917_v36  ;;  %v4254_v38 = vunpack.c.l.b16 %v4069_v20  ;;  %v4749_v17 = vunpack.c.l.b16 %v4658_v2  ;;  %v4083_v24 = vrot.slane %v4081_v29, 4  ;;  %v5600_v20 = vld [vmem:[%s6076_s29 + $0x90] sm:$0xe] }
 0x1e7   : > { %v3629_v53 = vpop.f32.mrf.mxu2  ;;  %v4086_v63 = vrot.slane %v4084_v34, 5  ;;  %v7153_v28 = vrot.slane %v4090_v11, 5  ;;  %v4096_v36 = vrot.slane %v4094_v47, 4  ;;  %v3095_v51 = vrot.slane %v5601_v21, 5  ;;  %v5859_v34 = vld [vmem:[%s6076_s29 + $0x9c] sm:$0xe] }
 0x1e8   : > { %v5049_v49 = vmax.f32 %v5017_v35, 0.0  ;;  %v3706_v31 = vadd.f32 %v3629_v53, %v3352_v18  ;;  %v4347_v37 = vpop.f32.mrf.mxu3  ;;  %v5860_v18 = vld [vmem:[%s6076_s29 + $0xa0] sm:$0xf]  ;;  %v4276_v14 = vpack.c.b16 %v4255_v22, %v4254_v38  ;;  %v4100_v2 = vshll.u32 %v5796_v16, 16  ;;  %v5798_v22 = vld [vmem:[%s6076_s29 + $0xac] sm:$0xf] }
 0x1e9   : > { %v3277_v56 = vpop.f32.mrf.mxu1  ;;  %v4087_v9 = vor.u32 %v4086_v63, %v4083_v24  ;;  %v4661_v11 = vrot.slane %v5860_v18, 5  ;;  %v5626_v47 = vrot.slane %v5600_v20, 9  ;;  %v5885_v24 = vrot.slane %v5859_v34, 9 }
 0x1ea   : > { %5081 = vst [vmem:[%s7121_s12 + $0x8] sm:$0xff] %v5049_v49  ;;  %v4424_v3 = vadd.f32 %v4347_v37, %v3706_v31  ;;  %v4843_v33 = vpop.f32.mrf.mxu0  ;;  %v3353_v25 = vadd.f32 %v3277_v56, %v6561_v52  ;;  %v4770_v31 = vpack.c.b16 %v4749_v17, %v4748_v13  ;;  %v5602_v37 = vld [vmem:[%s6076_s29 + $0x98] sm:$0x1]  ;;  %v4097_v52 = vor.u32 %v4096_v36, %v7153_v28 }
 0x1eb   : > { %v3098_v38 = vrot.slane %v5602_v37, 5  ;;  %v4088_v13 = vrot.slane %v4087_v9, 4  ;;  %v4102_v21 = vrot.slane %v4100_v2, 5  ;;  %v4663_v36 = vrot.slane %v4661_v11, 4 }
 0x1ec   : > { %v4918_v45 = vadd.f32 %v4841_v48, %v4424_v3  ;;  %v3204_v48 = vpack.c.b16 %v3183_v4, %v3182_v61  ;;  %v5861_v3 = vld [vmem:[%s6076_s29 + $0xa4] sm:$0x1]  ;;  %v3097_v4 = vrot.slane %v3095_v51, 4  ;;  %v4098_v17 = vrot.slane %v4097_v52, 4  ;;  %v5604_v52 = vld [vmem:[%s6076_s29 + $0xa0] sm:$0xf] }
 0x1ed   : > { %v4118_v18 = vshrl.u32 %v5798_v22, 16  ;;  %v4662_v9 = vsel %vm6137_vm7, %v5885_v24, %v4661_v11  ;;  %v3102_v24 = vrot.slane %v5604_v52, 5 }
 0x1ee   : > { %v5018_v62 = vadd.f32 %v7102_v42, %v4918_v45  ;;  %v5797_v45 = vld [vmem:[%s6076_s29 + $0xa8] sm:$0xf]  ;;  %v3099_v20 = vsel %vm6137_vm7, %v3097_v4, %v3098_v38  ;;  %v4103_v37 = vsel %vm6133_vm6, %v4098_v17, %v4102_v21  ;;  %v5799_v4 = vld [vmem:[%s6076_s29 + $0xb0] sm:$0x1] }
 0x1ef   : > { %v3631_v35 = vpop.f32.mrf.mxu2  ;;  %v4105_v16 = vshrl.u32 %v5797_v45, 16 }
 0x1f0   : > { %v5050_v59 = vmax.f32 %v5018_v62, 0.0  ;;  %v3707_v39 = vadd.f32 %v3631_v35, %v3353_v25  ;;  %v4349_v53 = vpop.f32.mrf.mxu3  ;;  %v4664_v62 = vrot.slane %v5861_v3, 5  ;;  %v4108_v35 = vshll.u32 %v5797_v45, 16 }
 0x1f1   : > { %v3280_v49 = vpop.f32.mrf.mxu1  ;;  %v4107_v2 = vrot.slane %v4105_v16, 4  ;;  %v4257_v45 = vunpack.c.l.b16 %v4103_v37 }
 0x1f2   : > { %5082 = vst [vmem:[%s7121_s12 + $0x10] sm:$0xff] %v5050_v59  ;;  %v4425_v56 = vadd.f32 %v4349_v53, %v3707_v39  ;;  %v4846_v29 = vpop.f32.mrf.mxu0 }
 0x1f4   : > { %v4919_v61 = vadd.f32 %v4843_v33, %v4425_v56  ;;  %5642 = vmatmul.msk.bf16.gmra.mxu1 %vm424_vm1, %v3204_v48  ;;  %5755 = vmatmul.msk.bf16.gmra.mxu2 %vm424_vm1, %v5952_v32  ;;  %v3354_v33 = vadd.f32 %v3280_v49, %v6600_v23  ;;  %v4114_v48 = vshll.u32 %v5798_v22, 16  ;;  %v4093_v23 = vsel %vm6133_vm6, %v4088_v13, %v7153_v28  ;;  %v5863_v13 = vld [vmem:[%s6076_s29 + $0xac] sm:$0xf] }
 0x1f5   : > { %5820 = vmatmul.msk.bf16.gmra.mxu3 %vm424_vm1, %v4276_v14  ;;  %5901 = vmatmul.msk.bf16.gmra.mxu0 %vm424_vm1, %v4770_v31  ;;  %v3096_v14 = vsel %vm6137_vm7, %v5626_v47, %v3095_v51  ;;  %v4665_v51 = vsel %vm6137_vm7, %v4663_v36, %v4664_v62  ;;  %v4110_v56 = vrot.slane %v4108_v35, 5  ;;  %v4120_v28 = vrot.slane %v4118_v18, 4  ;;  %v5953_v18 = vld [vmem:[%s6076_s29 + $0x9c] sm:$0xff] }
 0x1f6   : > { %v5019_v63 = vadd.f32 %v7102_v42, %v4919_v61  ;;  %v7189_v34 = vrot.slane %v4114_v48, 5  ;;  %v3184_v3 = vunpack.c.l.b16 %v3096_v14  ;;  %v3185_v61 = vunpack.c.l.b16 %v3099_v20  ;;  %v5864_v20 = vld [vmem:[%s6076_s29 + $0xb0] sm:$0x1] }
 0x1f7   : > { %v3634_v25 = vpop.f32.mrf.mxu2  ;;  %v4256_v38 = vunpack.c.l.b16 %v4093_v23  ;;  %v4750_v22 = vunpack.c.l.b16 %v4662_v9  ;;  %v4751_v11 = vunpack.c.l.b16 %v4665_v51  ;;  %v4124_v62 = vshll.u32 %v5799_v4, 16 }
 0x1f8   : > { %v5051_v59 = vmax.f32 %v5019_v63, 0.0  ;;  %v3708_v39 = vadd.f32 %v3634_v25, %v3354_v33  ;;  %v4352_v53 = vpop.f32.mrf.mxu3  ;;  %v5603_v33 = vld [vmem:[%s6076_s29 + $0x9c] sm:$0xe]  ;;  %v4121_v36 = vor.u32 %v4120_v28, %v7189_v34  ;;  %v3205_v48 = vpack.c.b16 %v3185_v61, %v3184_v3 }
 0x1f9   : > { %v3282_v32 = vpop.f32.mrf.mxu1  ;;  %v4277_v14 = vpack.c.b16 %v4257_v45, %v4256_v38  ;;  %v5627_v37 = vrot.slane %v5603_v33, 9  ;;  %v3104_v9 = vrot.slane %v3102_v24, 4  ;;  %v4671_v61 = vrot.slane %v5864_v20, 5  ;;  %v5800_v45 = vld [vmem:[%s6076_s29 + $0xb4] sm:$0xf] }
 0x1fa   : > { %5083 = vst [vmem:[%s7121_s12 + $0x18] sm:$0xff] %v5051_v59  ;;  %v4426_v49 = vadd.f32 %v4352_v53, %v3708_v39  ;;  %v4848_v31 = vpop.f32.mrf.mxu0  ;;  %v3355_v21 = vadd.f32 %v3282_v32, %v6602_v57  ;;  %v5605_v59 = vld [vmem:[%s6076_s29 + $0xa4] sm:$0x1]  ;;  %v4668_v39 = vrot.slane %v5863_v13, 5  ;;  %v4771_v57 = vpack.c.b16 %v4751_v11, %v4750_v22  ;;  %v5862_v32 = vld [vmem:[%s6076_s29 + $0xa8] sm:$0xe] }
 0x1fb   : > { %v3105_v51 = vrot.slane %v5605_v59, 5  ;;  %v5801_v22 = vld [vmem:[%s6076_s29 + $0xb8] sm:$0xf]  ;;  %v5607_v20 = vld [vmem:[%s6076_s29 + $0xac] sm:$0xf] }
 0x1fc   : > { %v4920_v47 = vadd.f32 %v4846_v29, %v4426_v49  ;;  %v4111_v29 = vor.u32 %v4110_v56, %v4107_v2  ;;  %v4122_v2 = vrot.slane %v4121_v36, 4  ;;  %v4126_v56 = vrot.slane %v4124_v62, 5 }
 0x1fd   : > { %v4670_v3 = vrot.slane %v4668_v39, 4  ;;  %v3106_v13 = vsel %vm6137_vm7, %v3104_v9, %v3105_v51  ;;  %v4129_v62 = vshrl.u32 %v5800_v45, 16 }
 0x1fe   : > { %v5020_v17 = vadd.f32 %v7102_v42, %v4920_v47  ;;  %v4112_v52 = vrot.slane %v4111_v29, 4  ;;  %v5886_v47 = vrot.slane %v5862_v32, 9  ;;  %v3187_v59 = vunpack.c.l.b16 %v3106_v13 }
 0x1ff   : > { %v3636_v63 = vpop.f32.mrf.mxu2  ;;  %v4672_v36 = vsel %vm6137_vm7, %v4670_v3, %v4671_v61 }
 0x200   : > { %v5052_v25 = vmax.f32 %v5020_v17, 0.0  ;;  %v3709_v16 = vadd.f32 %v3636_v63, %v3355_v21  ;;  %v4354_v35 = vpop.f32.mrf.mxu3  ;;  %v4117_v17 = vsel %vm6133_vm6, %v4112_v52, %v7189_v34  ;;  %v4127_v21 = vsel %vm6133_vm6, %v4122_v2, %v4126_v56  ;;  %v5802_v56 = vld [vmem:[%s6076_s29 + $0xbc] sm:$0x1] }
 0x201   : > { %v3285_v53 = vpop.f32.mrf.mxu1  ;;  %v4669_v29 = vsel %vm6137_vm7, %v5886_v47, %v4668_v39  ;;  %v4753_v32 = vunpack.c.l.b16 %v4672_v36  ;;  %v5866_v47 = vld [vmem:[%s6076_s29 + $0xb8] sm:$0xf] }
 0x202   : > { %5084 = vst [vmem:[%s7121_s12 + $0x20] sm:$0xff] %v5052_v25  ;;  %v4427_v23 = vadd.f32 %v4354_v35, %v3709_v16  ;;  %v4851_v49 = vpop.f32.mrf.mxu0  ;;  %v3356_v38 = vadd.f32 %v3285_v53, %v6643_v55  ;;  %v4132_v25 = vshll.u32 %v5800_v45, 16  ;;  %v4138_v16 = vshll.u32 %v5801_v22, 16 }
 0x203   : > { %v4142_v35 = vshrl.u32 %v5801_v22, 16  ;;  %v4258_v53 = vunpack.c.l.b16 %v4117_v17  ;;  %v4752_v39 = vunpack.c.l.b16 %v4669_v29  ;;  %v5606_v22 = vld [vmem:[%s6076_s29 + $0xa8] sm:$0xe]  ;;  %v5608_v17 = vld [vmem:[%s6076_s29 + $0xb0] sm:$0x1]  ;;  %v4675_v36 = vrot.slane %v5866_v47, 5 }
 0x204   : > { %v4921_v28 = vadd.f32 %v4848_v31, %v4427_v23  ;;  %5643 = vmatmul.msk.bf16.gmra.mxu1 %vm424_vm1, %v3205_v48  ;;  %5756 = vmatmul.msk.bf16.gmra.mxu2 %vm424_vm1, %v5953_v18  ;;  %v3103_v31 = vsel %vm6137_vm7, %v5627_v37, %v3102_v24  ;;  %v4131_v23 = vrot.slane %v4129_v62, 4  ;;  %v4134_v37 = vrot.slane %v4132_v25, 5  ;;  %v5865_v29 = vld [vmem:[%s6076_s29 + $0xb4] sm:$0xe]  ;;  %v5867_v62 = vld [vmem:[%s6076_s29 + $0xbc] sm:$0x1] }
 0x205   : > { %5821 = vmatmul.msk.bf16.gmra.mxu3 %vm424_vm1, %v4277_v14  ;;  %5902 = vmatmul.msk.bf16.gmra.mxu0 %vm424_vm1, %v4771_v57  ;;  %v3186_v18 = vunpack.c.l.b16 %v3103_v31  ;;  %v4259_v57 = vunpack.c.l.b16 %v4127_v21  ;;  %v7225_v9 = vrot.slane %v4138_v16, 5  ;;  %v4144_v51 = vrot.slane %v4142_v35, 4 }
 0x206   : > { %v5021_v4 = vadd.f32 %v7102_v42, %v4921_v28  ;;  %v4772_v13 = vpack.c.b16 %v4753_v32, %v4752_v39  ;;  %v4135_v21 = vor.u32 %v4134_v37, %v4131_v23  ;;  %v3112_v35 = vrot.slane %v5608_v17, 5 }
 0x207   : > { %v3639_v11 = vpop.f32.mrf.mxu2  ;;  %v4278_v45 = vpack.c.b16 %v4259_v57, %v4258_v53  ;;  %v5887_v57 = vrot.slane %v5865_v29, 9  ;;  %v4677_v32 = vrot.slane %v4675_v36, 4  ;;  %v5805_v29 = vld [vmem:[%s6076_s29 + $0xc8] sm:$0x1] }
 0x208   : > { %v5053_v63 = vmax.f32 %v5021_v4, 0.0  ;;  %v3710_v33 = vadd.f32 %v3639_v11, %v3356_v38  ;;  %v4357_v55 = vpop.f32.mrf.mxu3  ;;  %v5954_v38 = vld [vmem:[%s6076_s29 + $0xa8] sm:$0xff]  ;;  %v3109_v11 = vrot.slane %v5607_v20, 5  ;;  %v4678_v20 = vrot.slane %v5867_v62, 5 }
 0x209   : > { %v3287_v24 = vpop.f32.mrf.mxu1 }
 0x20a   : > { %5085 = vst [vmem:[%s7121_s12 + $0x28] sm:$0xff] %v5053_v63  ;;  %v4428_v34 = vadd.f32 %v4357_v55, %v3710_v33  ;;  %v4853_v48 = vpop.f32.mrf.mxu0  ;;  %v3357_v2 = vadd.f32 %v3287_v24, %v6645_v12  ;;  %v4145_v12 = vor.u32 %v4144_v51, %v7225_v9  ;;  %v4148_v63 = vshll.u32 %v5802_v56, 16 }
 0x20b   : > { %v5628_v24 = vrot.slane %v5606_v22, 9  ;;  %v3111_v16 = vrot.slane %v3109_v11, 4  ;;  %v4676_v22 = vsel %vm6137_vm7, %v5887_v57, %v4675_v36  ;;  %v4172_v57 = vshll.u32 %v5805_v29, 16 }
 0x20c   : > { %v4922_v14 = vadd.f32 %v4851_v49, %v4428_v34  ;;  %v3206_v49 = vpack.c.b16 %v3187_v59, %v3186_v18  ;;  %v5803_v34 = vld [vmem:[%s6076_s29 + $0xc0] sm:$0xf]  ;;  %v5804_v18 = vld [vmem:[%s6076_s29 + $0xc4] sm:$0xf]  ;;  %v4136_v59 = vrot.slane %v4135_v21, 4  ;;  %v4146_v53 = vrot.slane %v4145_v12, 4 }
 0x20d   : > { %v4153_v37 = vshrl.u32 %v5803_v34, 16  ;;  %v4156_v51 = vshll.u32 %v5803_v34, 16 }
 0x20e   : > { %v5022_v52 = vadd.f32 %v7102_v42, %v4922_v14  ;;  %v4150_v14 = vrot.slane %v4148_v63, 5 }
 0x20f   : > { %v3641_v28 = vpop.f32.mrf.mxu2  ;;  %v4158_v17 = vrot.slane %v4156_v51, 5 }
 0x210   : > { %v5054_v3 = vmax.f32 %v5022_v52, 0.0  ;;  %v3711_v61 = vadd.f32 %v3641_v28, %v3357_v2  ;;  %v4359_v4 = vpop.f32.mrf.mxu3  ;;  %v4162_v52 = vshll.u32 %v5804_v18, 16  ;;  %v4166_v2 = vshrl.u32 %v5804_v18, 16 }
 0x211   : > { %v3290_v31 = vpop.f32.mrf.mxu1 }
 0x212   : > { %5086 = vst [vmem:[%s7121_s12 + $0x30] sm:$0xff] %v5054_v3  ;;  %v4429_v33 = vadd.f32 %v4359_v4, %v3711_v61  ;;  %v4856_v55 = vpop.f32.mrf.mxu0  ;;  %v3110_v3 = vsel %vm6137_vm7, %v5628_v24, %v3109_v11  ;;  %v3113_v61 = vsel %vm6137_vm7, %v3111_v16, %v3112_v35  ;;  %v4679_v11 = vsel %vm6137_vm7, %v4677_v32, %v4678_v20  ;;  %v5869_v16 = vld [vmem:[%s6076_s29 + $0xc4] sm:$0xf] }
 0x213   : > { %v7261_v21 = vrot.slane %v4162_v52, 5  ;;  %v3188_v63 = vunpack.c.l.b16 %v3110_v3  ;;  %v4755_v36 = vunpack.c.l.b16 %v4679_v11  ;;  %v4682_v51 = vrot.slane %v5869_v16, 5 }
 0x214   : > { %v4923_v25 = vadd.f32 %v4853_v48, %v4429_v33  ;;  %5644 = vmatmul.msk.bf16.gmra.mxu1 %vm424_vm1, %v3206_v49  ;;  %5757 = vmatmul.msk.bf16.gmra.mxu2 %vm424_vm1, %v5954_v38  ;;  %v3358_v48 = vadd.f32 %v3290_v31, %v6682_v46  ;;  %v4141_v46 = vsel %vm6133_vm6, %v4136_v59, %v7225_v9  ;;  %v5610_v31 = vld [vmem:[%s6076_s29 + $0xb8] sm:$0xf]  ;;  %v4168_v9 = vrot.slane %v4166_v2, 4 }
 0x215   : > { %5822 = vmatmul.msk.bf16.gmra.mxu3 %vm424_vm1, %v4278_v45  ;;  %5903 = vmatmul.msk.bf16.gmra.mxu0 %vm424_vm1, %v4772_v13  ;;  %v4151_v45 = vsel %vm6133_vm6, %v4146_v53, %v4150_v14  ;;  %v4155_v13 = vrot.slane %v4153_v37, 4  ;;  %v3189_v33 = vunpack.c.l.b16 %v3113_v61  ;;  %v4260_v24 = vunpack.c.l.b16 %v4141_v46  ;;  %v5609_v53 = vld [vmem:[%s6076_s29 + $0xb4] sm:$0xe]  ;;  %v5611_v37 = vld [vmem:[%s6076_s29 + $0xbc] sm:$0x1] }
 0x216   : > { %v5023_v39 = vadd.f32 %v7102_v42, %v4923_v25  ;;  %v4261_v62 = vunpack.c.l.b16 %v4151_v45  ;;  %v4754_v25 = vunpack.c.l.b16 %v4676_v22  ;;  %v3116_v18 = vrot.slane %v5610_v31, 5 }
 0x217   : > { %v3644_v23 = vpop.f32.mrf.mxu2  ;;  %v4169_v14 = vor.u32 %v4168_v9, %v7261_v21  ;;  %v3207_v20 = vpack.c.b16 %v3189_v33, %v3188_v63  ;;  %v5629_v3 = vrot.slane %v5609_v53, 9  ;;  %v3119_v46 = vrot.slane %v5611_v37, 5  ;;  %v5806_v63 = vld [vmem:[%s6076_s29 + $0xcc] sm:$0xf]  ;;  %v5807_v33 = vld [vmem:[%s6076_s29 + $0xd0] sm:$0xf] }
 0x218   : > { %v5055_v56 = vmax.f32 %v5023_v39, 0.0  ;;  %v3712_v28 = vadd.f32 %v3644_v23, %v3358_v48  ;;  %v4362_v49 = vpop.f32.mrf.mxu3  ;;  %v5955_v23 = vld [vmem:[%s6076_s29 + $0xb4] sm:$0xff]  ;;  %v4279_v2 = vpack.c.b16 %v4261_v62, %v4260_v24  ;;  %v3118_v61 = vrot.slane %v3116_v18, 4 }
 0x219   : > { %v3292_v47 = vpop.f32.mrf.mxu1  ;;  %v4170_v45 = vrot.slane %v4169_v14, 4  ;;  %v4174_v22 = vrot.slane %v4172_v57, 5  ;;  %v4180_v53 = vshll.u32 %v5806_v63, 16  ;;  %v4190_v14 = vshrl.u32 %v5807_v33, 16 }
 0x21a   : > { %5087 = vst [vmem:[%s7121_s12 + $0x38] sm:$0xff] %v5055_v56  ;;  %v4430_v4 = vadd.f32 %v4362_v49, %v3712_v28  ;;  %v4858_v38 = vpop.f32.mrf.mxu0  ;;  %v3359_v34 = vadd.f32 %v3292_v47, %v6684_v27  ;;  %v4773_v27 = vpack.c.b16 %v4755_v36, %v4754_v25  ;;  %v5868_v56 = vld [vmem:[%s6076_s29 + $0xc0] sm:$0xe]  ;;  %v5870_v28 = vld [vmem:[%s6076_s29 + $0xc8] sm:$0x1]  ;;  %v3120_v24 = vsel %vm6137_vm7, %v3118_v61, %v3119_v46 }
 0x21b   : > { %v5888_v31 = vrot.slane %v5868_v56, 9  ;;  %v4175_v25 = vsel %vm6133_vm6, %v4170_v45, %v4174_v22  ;;  %v5808_v61 = vld [vmem:[%s6076_s29 + $0xd4] sm:$0x1] }
 0x21c   : > { %v4924_v12 = vadd.f32 %v4856_v55, %v4430_v4  ;;  %v4159_v55 = vor.u32 %v4158_v17, %v4155_v13  ;;  %v4684_v13 = vrot.slane %v4682_v51, 4  ;;  %v4685_v17 = vrot.slane %v5870_v28, 5 }
 0x21d   : > { %v4192_v28 = vrot.slane %v4190_v14, 4 }
 0x21e   : > { %v5024_v35 = vadd.f32 %v7102_v42, %v4924_v12  ;;  %v4160_v4 = vrot.slane %v4159_v55, 4  ;;  %v4186_v55 = vshll.u32 %v5807_v33, 16  ;;  %v5614_v33 = vld [vmem:[%s6076_s29 + $0xc8] sm:$0x1] }
 0x21f   : > { %v3646_v59 = vpop.f32.mrf.mxu2 }
 0x220   : > { %v5056_v39 = vmax.f32 %v5024_v35, 0.0  ;;  %v3713_v48 = vadd.f32 %v3646_v59, %v3359_v34  ;;  %v4364_v32 = vpop.f32.mrf.mxu3  ;;  %v4165_v62 = vsel %vm6133_vm6, %v4160_v4, %v7261_v21  ;;  %v4683_v35 = vsel %vm6137_vm7, %v5888_v31, %v4682_v51  ;;  %v5956_v31 = vld [vmem:[%s6076_s29 + $0xc0] sm:$0xff] }
 0x221   : > { %v3295_v52 = vpop.f32.mrf.mxu1  ;;  %v4686_v34 = vsel %vm6137_vm7, %v4684_v13, %v4685_v17  ;;  %v4177_v59 = vshrl.u32 %v5806_v63, 16  ;;  %v4756_v37 = vunpack.c.l.b16 %v4683_v35  ;;  %v4188_v56 = vrot.slane %v4186_v55, 5  ;;  %v5612_v63 = vld [vmem:[%s6076_s29 + $0xc0] sm:$0xe] }
 0x222   : > { %5088 = vst [vmem:[%s7121_s12 + $0x40] sm:$0xff] %v5056_v39  ;;  %v4431_v49 = vadd.f32 %v4364_v32, %v3713_v48  ;;  %v4861_v47 = vpop.f32.mrf.mxu0  ;;  %v3360_v12 = vadd.f32 %v3295_v52, %v6711_v41  ;;  %v3191_v48 = vunpack.c.l.b16 %v3120_v24  ;;  %v4262_v32 = vunpack.c.l.b16 %v4165_v62  ;;  %v5613_v52 = vld [vmem:[%s6076_s29 + $0xc4] sm:$0xf] }
 0x223   : > { %v4757_v51 = vunpack.c.l.b16 %v4686_v34  ;;  %v3123_v17 = vrot.slane %v5613_v52, 5  ;;  %v5630_v35 = vrot.slane %v5612_v63, 9 }
 0x224   : > { %v4925_v11 = vadd.f32 %v4858_v38, %v4431_v49  ;;  %5645 = vmatmul.msk.bf16.gmra.mxu1 %vm424_vm1, %v3207_v20  ;;  %5758 = vmatmul.msk.bf16.gmra.mxu2 %vm424_vm1, %v5955_v23  ;;  %v3117_v38 = vsel %vm6137_vm7, %v5629_v3, %v3116_v18  ;;  %v4263_v23 = vunpack.c.l.b16 %v4175_v25  ;;  %v5871_v25 = vld [vmem:[%s6076_s29 + $0xcc] sm:$0xe] }
 0x225   : > { %5823 = vmatmul.msk.bf16.gmra.mxu3 %vm424_vm1, %v4279_v2  ;;  %5904 = vmatmul.msk.bf16.gmra.mxu0 %vm424_vm1, %v4773_v27  ;;  %v3190_v39 = vunpack.c.l.b16 %v3117_v38  ;;  %v4179_v2 = vrot.slane %v4177_v59, 4  ;;  %v4182_v27 = vrot.slane %v4180_v53, 5  ;;  %v4193_v38 = vor.u32 %v4192_v28, %v4188_v56 }
 0x226   : > { %v5025_v9 = vadd.f32 %v7102_v42, %v4925_v11  ;;  %v4280_v13 = vpack.c.b16 %v4263_v23, %v4262_v32  ;;  %v3125_v34 = vrot.slane %v3123_v17, 4  ;;  %v5889_v14 = vrot.slane %v5871_v25, 9 }
 0x227   : > { %v3649_v29 = vpop.f32.mrf.mxu2  ;;  %v3208_v4 = vpack.c.b16 %v3191_v48, %v3190_v39  ;;  %v4194_v53 = vrot.slane %v4193_v38, 4  ;;  %v3124_v52 = vsel %vm6137_vm7, %v5630_v35, %v3123_v17 }
 0x228   : > { %v5057_v36 = vmax.f32 %v5025_v9, 0.0  ;;  %v3714_v16 = vadd.f32 %v3649_v29, %v3360_v12  ;;  %v4367_v41 = vpop.f32.mrf.mxu3  ;;  %v4774_v12 = vpack.c.b16 %v4757_v51, %v4756_v37  ;;  %v4183_v29 = vor.u32 %v4182_v27, %v4179_v2 }
 0x229   : > { %v3297_v18 = vpop.f32.mrf.mxu1 }
 0x22a   : > { %5089 = vst [vmem:[%s7121_s12 + $0x48] sm:$0xff] %v5057_v36  ;;  %v4432_v21 = vadd.f32 %v4367_v41, %v3714_v16  ;;  %v4863_v57 = vpop.f32.mrf.mxu0  ;;  %v3361_v3 = vadd.f32 %v3297_v18, %v6726_v44  ;;  %v4196_v44 = vshll.u32 %v5808_v61, 16  ;;  %v5873_v16 = vld [vmem:[%s6076_s29 + $0xd4] sm:$0x1]  ;;  %v3126_v18 = vrot.slane %v5614_v33, 5 }
 0x22b   : > { %v4184_v59 = vrot.slane %v4183_v29, 4  ;;  %v4692_v48 = vrot.slane %v5873_v16, 5 }
 0x22c   : > { %v4926_v20 = vadd.f32 %v4861_v47, %v4432_v21  ;;  %v5872_v47 = vld [vmem:[%s6076_s29 + $0xd0] sm:$0xf]  ;;  %v4198_v55 = vrot.slane %v4196_v44, 5  ;;  %v3127_v2 = vsel %vm6137_vm7, %v3125_v34, %v3126_v18 }
 0x22d   : > { %v4689_v36 = vrot.slane %v5872_v47, 5  ;;  %v4189_v27 = vsel %vm6133_vm6, %v4184_v59, %v4188_v56  ;;  %v3193_v47 = vunpack.c.l.b16 %v3127_v2 }
 0x22e   : > { %v5026_v49 = vadd.f32 %v7102_v42, %v4926_v20 }
 0x22f   : > { %v3651_v46 = vpop.f32.mrf.mxu2  ;;  %v4691_v39 = vrot.slane %v4689_v36, 4 }
 0x230   : > { %v5058_v45 = vmax.f32 %v5026_v49, 0.0  ;;  %v3715_v22 = vadd.f32 %v3651_v46, %v3361_v3  ;;  %v4369_v11 = vpop.f32.mrf.mxu3  ;;  %v4690_v3 = vsel %vm6137_vm7, %v5889_v14, %v4689_v36 }
 0x231   : > { %v3300_v9 = vpop.f32.mrf.mxu1  ;;  %v4693_v61 = vsel %vm6137_vm7, %v4691_v39, %v4692_v48  ;;  %v4758_v56 = vunpack.c.l.b16 %v4690_v3 }
 0x232   : > { %5090 = vst [vmem:[%s7121_s12 + $0x50] sm:$0xff] %v5058_v45  ;;  %v4433_v24 = vadd.f32 %v4369_v11, %v3715_v22  ;;  %v4866_v62 = vpop.f32.mrf.mxu0  ;;  %v4264_v45 = vunpack.c.l.b16 %v4189_v27  ;;  %v4759_v11 = vunpack.c.l.b16 %v4693_v61 }
 0x234   : > { %v4927_v41 = vadd.f32 %v4863_v57, %v4433_v24  ;;  %5646 = vmatmul.msk.bf16.gmra.mxu1 %vm424_vm1, %v3208_v4  ;;  %5759 = vmatmul.msk.bf16.gmra.mxu2 %vm424_vm1, %v5956_v31  ;;  %v3362_v57 = vadd.f32 %v3300_v9, %v6749_v15  ;;  %v4199_v15 = vsel %vm6133_vm6, %v4194_v53, %v4198_v55  ;;  %v3192_v4 = vunpack.c.l.b16 %v3124_v52 }
 0x235   : > { %5824 = vmatmul.msk.bf16.gmra.mxu3 %vm424_vm1, %v4280_v13  ;;  %5905 = vmatmul.msk.bf16.gmra.mxu0 %vm424_vm1, %v4774_v12  ;;  %v4265_v22 = vunpack.c.l.b16 %v4199_v15  ;;  %v4775_v38 = vpack.c.b16 %v4759_v11, %v4758_v56 }
 0x236   : > { %v5027_v21 = vadd.f32 %v7102_v42, %v4927_v41  ;;  %v3209_v63 = vpack.c.b16 %v3193_v47, %v3192_v4 }
 0x237   : > { %v3654_v32 = vpop.f32.mrf.mxu2  ;;  %v4281_v29 = vpack.c.b16 %v4265_v22, %v4264_v45 }
 0x238   : > { %v5059_v20 = vmax.f32 %v5027_v21, 0.0  ;;  %v3716_v23 = vadd.f32 %v3654_v32, %v3362_v57  ;;  %v4372_v37 = vpop.f32.mrf.mxu3 }
 0x239   : > { %v3302_v51 = vpop.f32.mrf.mxu1 }
 0x23a   : > { %5091 = vst [vmem:[%s7121_s12 + $0x58] sm:$0xff] %v5059_v20  ;;  %v4434_v28 = vadd.f32 %v4372_v37, %v3716_v23  ;;  %v4868_v49 = vpop.f32.mrf.mxu0  ;;  %v3363_v0 = vadd.f32 %v3302_v51, %v6761_v7 }
 0x23c   : > { %v4928_v46 = vadd.f32 %v4866_v62, %v4434_v28 }
 0x23e   : > { %v5028_v31 = vadd.f32 %v7102_v42, %v4928_v46 }
 0x23f   : > { %v3656_v13 = vpop.f32.mrf.mxu2 }
 0x240   : > { %v5060_v17 = vmax.f32 %v5028_v31, 0.0  ;;  %v3717_v9 = vadd.f32 %v3656_v13, %v3363_v0  ;;  %v4374_v12 = vpop.f32.mrf.mxu3 }
 0x241   : > { %v3305_v33 = vpop.f32.mrf.mxu1 }
 0x242   : > { %5092 = vst [vmem:[%s7121_s12 + $0x60] sm:$0xff] %v5060_v17  ;;  %v4435_v44 = vadd.f32 %v4374_v12, %v3717_v9  ;;  %v4871_v24 = vpop.f32.mrf.mxu0  ;;  %v3364_v25 = vadd.f32 %v3305_v33, %v6781_v40 }
 0x244   : > { %v4929_v62 = vadd.f32 %v4868_v49, %v4435_v44  ;;  %5647 = vmatmul.msk.bf16.gmra.mxu1 %vm424_vm1, %v3209_v63  ;;  %5760 = vmatmul.msk.bf16.gmra.mxu2 %vm424_vm1, %v5957_v5 }
 0x245   : > { %5825 = vmatmul.msk.bf16.gmra.mxu3 %vm424_vm1, %v4281_v29  ;;  %5906 = vmatmul.msk.bf16.gmra.mxu0 %vm424_vm1, %v4775_v38  ;;  %v7352_v38 = vld [vmem:[%s7406_s2] ss:$0 sm:$0xff] }
 0x246   : > { %v5029_v7 = vadd.f32 %v7102_v42, %v4929_v62 }
 0x247   : > { %v3659_v36 = vpop.f32.mrf.mxu2 }
 0x248   : > { %v5061_v16 = vmax.f32 %v5029_v7, 0.0  ;;  %v3718_v41 = vadd.f32 %v3659_v36, %v3364_v25  ;;  %v4377_v35 = vpop.f32.mrf.mxu3 }
 0x249   : > { %v3307_v34 = vpop.f32.mrf.mxu1 }
 0x24a   : > { %5093 = vst [vmem:[%s7121_s12 + $0x68] sm:$0xff] %v5061_v16  ;;  %v4436_v18 = vadd.f32 %v4377_v35, %v3718_v41  ;;  %v4873_v59 = vpop.f32.mrf.mxu0  ;;  %v3365_v14 = vadd.f32 %v3307_v34, %v6799_v19 }
 0x24c   : > { %v4930_v53 = vadd.f32 %v4871_v24, %v4436_v18 }
 0x24e   : > { %v5030_v55 = vadd.f32 %v7102_v42, %v4930_v53 }
 0x24f   : > { %v3661_v21 = vpop.f32.mrf.mxu2 }
 0x250   : > { %v5062_v57 = vmax.f32 %v5030_v55, 0.0  ;;  %v3719_v39 = vadd.f32 %v3661_v21, %v3365_v14  ;;  %v4379_v48 = vpop.f32.mrf.mxu3 }
 0x251   : > { %v3310_v40 = vpop.f32.mrf.mxu1 }
 0x252   : > { %5094 = vst [vmem:[%s7121_s12 + $0x70] sm:$0xff] %v5062_v57  ;;  %v4437_v32 = vadd.f32 %v4379_v48, %v3719_v39  ;;  %v4876_v20 = vpop.f32.mrf.mxu0  ;;  %v3366_v51 = vadd.f32 %v3310_v40, %v6821_v30 }
 0x254   : > { %v4931_v23 = vadd.f32 %v4873_v59, %v4437_v32 }
 0x256   : > { %v5031_v37 = vadd.f32 %v7102_v42, %v4931_v23 }
 0x257   : > { %v3664_v52 = vpop.f32.mrf.mxu2 }
 0x258   : > { %v5063_v2 = vmax.f32 %v5031_v37, 0.0  ;;  %v3720_v27 = vadd.f32 %v3664_v52, %v3366_v51  ;;  %v4382_v28 = vpop.f32.mrf.mxu3 }
 0x259   : > { %v3312_v19 = vpop.f32.mrf.mxu1 }
 0x25a   : > { %5095 = vst [vmem:[%s7121_s12 + $0x78] sm:$0xff] %v5063_v2  ;;  %v4438_v49 = vadd.f32 %v4382_v28, %v3720_v27  ;;  %v4878_v15 = vpop.f32.mrf.mxu0  ;;  %v3367_v46 = vadd.f32 %v3312_v19, %v6833_v43 }
 0x25c   : > { %v4932_v3 = vadd.f32 %v4876_v20, %v4438_v49 }
 0x25e   : > { %v5032_v61 = vadd.f32 %v7102_v42, %v4932_v3 }
 0x25f   : > { %v3666_v4 = vpop.f32.mrf.mxu2 }
 0x260   : > { %v5064_v47 = vmax.f32 %v5032_v61, 0.0  ;;  %v3721_v45 = vadd.f32 %v3666_v4, %v3367_v46  ;;  %v4384_v22 = vpop.f32.mrf.mxu3 }
 0x261   : > { %v3315_v30 = vpop.f32.mrf.mxu1 }
 0x262   : > { %5096 = vst [vmem:[%s7121_s12 + $0x80] sm:$0xff] %v5064_v47  ;;  %v4439_v56 = vadd.f32 %v4384_v22, %v3721_v45  ;;  %v4881_v11 = vpop.f32.mrf.mxu0  ;;  %v3368_v13 = vadd.f32 %v3315_v30, %v6853_v54 }
 0x264   : > { %v4933_v31 = vadd.f32 %v4878_v15, %v4439_v56 }
 0x266   : > { %v5033_v0 = vadd.f32 %v7102_v42, %v4933_v31 }
 0x267   : > { %v3669_v17 = vpop.f32.mrf.mxu2 }
 0x268   : > { %v5065_v9 = vmax.f32 %v5033_v0, 0.0  ;;  %v3722_v12 = vadd.f32 %v3669_v17, %v3368_v13  ;;  %v4387_v63 = vpop.f32.mrf.mxu3 }
 0x269   : > { %v3317_v43 = vpop.f32.mrf.mxu1 }
 0x26a   : > { %5097 = vst [vmem:[%s7121_s12 + $0x88] sm:$0xff] %v5065_v9  ;;  %v4440_v5 = vadd.f32 %v4387_v63, %v3722_v12  ;;  %v4883_v33 = vpop.f32.mrf.mxu0  ;;  %v3369_v42 = vadd.f32 %v3317_v43, %v6871_v10 }
 0x26c   : > { %v4934_v29 = vadd.f32 %v4881_v11, %v4440_v5 }
 0x26e   : > { %v5034_v44 = vadd.f32 %v7352_v38, %v4934_v29 }
 0x26f   : > { %v3671_v54 = vpop.f32.mrf.mxu2 }
 0x270   : > { %v5066_v24 = vmax.f32 %v5034_v44, 0.0  ;;  %v3723_v62 = vadd.f32 %v3671_v54, %v3369_v42  ;;  %v4389_v7 = vpop.f32.mrf.mxu3 }
 0x271   : > { %v3320_v25 = vpop.f32.mrf.mxu1 }
 0x272   : > { %5098 = vst [vmem:[%s7121_s12 + $0x90] sm:$0xff] %v5066_v24  ;;  %v4441_v36 = vadd.f32 %v4389_v7, %v3723_v62  ;;  %v4886_v16 = vpop.f32.mrf.mxu0  ;;  %v3370_v34 = vadd.f32 %v3320_v25, %v6893_v60 }
 0x274   : > { %v4935_v41 = vadd.f32 %v4883_v33, %v4441_v36 }
 0x276   : > { %v5035_v35 = vadd.f32 %v7352_v38, %v4935_v41 }
 0x277   : > { %v3674_v18 = vpop.f32.mrf.mxu2 }
 0x278   : > { %v5067_v59 = vmax.f32 %v5035_v35, 0.0  ;;  %v3724_v53 = vadd.f32 %v3674_v18, %v3370_v34  ;;  %v4392_v55 = vpop.f32.mrf.mxu3 }
 0x279   : > { %v3322_v10 = vpop.f32.mrf.mxu1 }
 0x27a   : > { %5099 = vst [vmem:[%s7121_s12 + $0x98] sm:$0xff] %v5067_v59  ;;  %v4442_v14 = vadd.f32 %v4392_v55, %v3724_v53  ;;  %v4888_v21 = vpop.f32.mrf.mxu0  ;;  %v3371_v48 = vadd.f32 %v3322_v10, %v6905_v26 }
 0x27c   : > { %v4936_v57 = vadd.f32 %v4886_v16, %v4442_v14 }
 0x27e   : > { %v5036_v39 = vadd.f32 %v7352_v38, %v4936_v57  ;;  %v7431_v57 = vld [vmem:[#allocation3_spill] sm:$0xff] }
 0x27f   : > { %v3676_v40 = vpop.f32.mrf.mxu2 }
 0x280   : > { %v5068_v32 = vmax.f32 %v5036_v39, 0.0  ;;  %v3725_v20 = vadd.f32 %v3676_v40, %v3371_v48  ;;  %v4394_v23 = vpop.f32.mrf.mxu3 }
 0x281   : > { %v3325_v60 = vpop.f32.mrf.mxu1 }
 0x282   : > { %5100 = vst [vmem:[%s7121_s12 + $0xa0] sm:$0xff] %v5068_v32  ;;  %v4443_v37 = vadd.f32 %v4394_v23, %v3725_v20  ;;  %v4891_v51 = vpop.f32.mrf.mxu0  ;;  %v3372_v27 = vadd.f32 %v3325_v60, %v6925_v58 }
 0x284   : > { %v4937_v52 = vadd.f32 %v4888_v21, %v4443_v37 }
 0x286   : > { %v5037_v2 = vadd.f32 %v7352_v38, %v4937_v52  ;;  %v7432_v52 = vld [vmem:[#allocation4_spill] sm:$0xff] }
 0x287   : > { %v3679_v28 = vpop.f32.mrf.mxu2 }
 0x288   : > { %v5069_v19 = vmax.f32 %v5037_v2, 0.0  ;;  %v3726_v49 = vadd.f32 %v3679_v28, %v3372_v27  ;;  %v4397_v15 = vpop.f32.mrf.mxu3 }
 0x289   : > { %v3327_v26 = vpop.f32.mrf.mxu1 }
 0x28a   : > { %5101 = vst [vmem:[%s7121_s12 + $0xa8] sm:$0xff] %v5069_v19  ;;  %v4444_v3 = vadd.f32 %v4397_v15, %v3726_v49  ;;  %v4893_v61 = vpop.f32.mrf.mxu0  ;;  %v3373_v47 = vadd.f32 %v3327_v26, %v6943_v8 }
 0x28c   : > { %v4938_v46 = vadd.f32 %v4891_v51, %v4444_v3 }
 0x28e   : > { %v5038_v4 = vadd.f32 %v7352_v38, %v4938_v46  ;;  %v7433_v46 = vld [vmem:[#allocation5_spill] sm:$0xff] }
 0x28f   : > { %v3681_v45 = vpop.f32.mrf.mxu2 }
 0x290   : > { %v5070_v22 = vmax.f32 %v5038_v4, 0.0  ;;  %v3727_v30 = vadd.f32 %v3681_v45, %v3373_v47  ;;  %v4399_v56 = vpop.f32.mrf.mxu3 }
 0x291   : > { %v3330_v58 = vpop.f32.mrf.mxu1 }
 0x292   : > { %5102 = vst [vmem:[%s7121_s12 + $0xb0] sm:$0xff] %v5070_v22  ;;  %v4445_v11 = vadd.f32 %v4399_v56, %v3727_v30  ;;  %v4896_v31 = vpop.f32.mrf.mxu0  ;;  %v3374_v17 = vadd.f32 %v3330_v58, %v6965_v6 }
 0x294   : > { %v4939_v0 = vadd.f32 %v4893_v61, %v4445_v11 }
 0x296   : > { %v5039_v13 = vadd.f32 %v7352_v38, %v4939_v0 }
 0x297   : > { %v3684_v9 = vpop.f32.mrf.mxu2 }
 0x298   : > { %v5071_v12 = vmax.f32 %v5039_v13, 0.0  ;;  %v3728_v63 = vadd.f32 %v3684_v9, %v3374_v17  ;;  %v4402_v43 = vpop.f32.mrf.mxu3  ;;  %v7434_v13 = vld [vmem:[#allocation6_spill] sm:$0xff] }
 0x299   : > { %v3332_v8 = vpop.f32.mrf.mxu1 }
 0x29a   : > { %5103 = vst [vmem:[%s7121_s12 + $0xb8] sm:$0xff] %v5071_v12  ;;  %v4446_v5 = vadd.f32 %v4402_v43, %v3728_v63  ;;  %v4898_v33 = vpop.f32.mrf.mxu0  ;;  %v3375_v42 = vadd.f32 %v3332_v8, %v6977_v1 }
 0x29c   : > { %v4940_v29 = vadd.f32 %v4896_v31, %v4446_v5 }
 0x29e   : > { %v5040_v44 = vadd.f32 %v7352_v38, %v4940_v29 }
 0x29f   : > { %v3686_v54 = vpop.f32.mrf.mxu2 }
 0x2a0   : > { %v5072_v24 = vmax.f32 %v5040_v44, 0.0  ;;  %v3729_v62 = vadd.f32 %v3686_v54, %v3375_v42  ;;  %v4404_v7 = vpop.f32.mrf.mxu3  ;;  %v7435_v42 = vld [vmem:[#allocation7_spill] sm:$0xff] }
 0x2a1   : > { %v3335_v6 = vpop.f32.mrf.mxu1 }
 0x2a2   : > { %5104 = vst [vmem:[%s7121_s12 + $0xc0] sm:$0xff] %v5072_v24  ;;  %v4447_v25 = vadd.f32 %v4404_v7, %v3729_v62  ;;  %v4901_v36 = vpop.f32.mrf.mxu0  ;;  %v3376_v35 = vadd.f32 %v3335_v6, %v6997_v50 }
 0x2a4   : > { %v4941_v16 = vadd.f32 %v4898_v33, %v4447_v25 }
 0x2a6   : > { %v5041_v41 = vadd.f32 %v7352_v38, %v4941_v16 }
 0x2a7   : > { %v3689_v34 = vpop.f32.mrf.mxu2 }
 0x2a8   : > { %v5073_v18 = vmax.f32 %v5041_v41, 0.0  ;;  %v3730_v59 = vadd.f32 %v3689_v34, %v3376_v35  ;;  %v4407_v53 = vpop.f32.mrf.mxu3 }
 0x2a9   : > { %v3337_v1 = vpop.f32.mrf.mxu1 }
 0x2aa   : > { %5105 = vst [vmem:[%s7121_s12 + $0xc8] sm:$0xff] %v5073_v18  ;;  %v4448_v55 = vadd.f32 %v4407_v53, %v3730_v59  ;;  %v4903_v10 = vpop.f32.mrf.mxu0  ;;  %v3377_v39 = vadd.f32 %v3337_v1, %v7431_v57 }
 0x2ac   : > { %v4942_v14 = vadd.f32 %v4901_v36, %v4448_v55 }
 0x2ae   : > { %v5042_v21 = vadd.f32 %v7352_v38, %v4942_v14 }
 0x2af   : > { %v3691_v48 = vpop.f32.mrf.mxu2 }
 0x2b0   : > { %v5074_v40 = vmax.f32 %v5042_v21, 0.0  ;;  %v3731_v32 = vadd.f32 %v3691_v48, %v3377_v39  ;;  %v4409_v20 = vpop.f32.mrf.mxu3 }
 0x2b1   : > { %v3340_v50 = vpop.f32.mrf.mxu1 }
 0x2b2   : > { %5106 = vst [vmem:[%s7121_s12 + $0xd0] sm:$0xff] %v5074_v40  ;;  %v4449_v23 = vadd.f32 %v4409_v20, %v3731_v32  ;;  %v4906_v37 = vpop.f32.mrf.mxu0  ;;  %v3378_v2 = vadd.f32 %v3340_v50, %v7432_v52 }
 0x2b4   : > { %v4943_v60 = vadd.f32 %v4903_v10, %v4449_v23 }
 0x2b6   : > { %v5043_v51 = vadd.f32 %v7352_v38, %v4943_v60 }
 0x2b7   : > { %v3694_v27 = vpop.f32.mrf.mxu2 }
 0x2b8   : > { %v5075_v28 = vmax.f32 %v5043_v51, 0.0  ;;  %v3732_v19 = vadd.f32 %v3694_v27, %v3378_v2  ;;  %v4412_v49 = vpop.f32.mrf.mxu3 }
 0x2b9   : > { %v3342_v15 = vpop.f32.mrf.mxu1 }
 0x2ba   : > { %5107 = vst [vmem:[%s7121_s12 + $0xd8] sm:$0xff] %v5075_v28  ;;  %v4450_v26 = vadd.f32 %v4412_v49, %v3732_v19  ;;  %v3379_v4 = vadd.f32 %v3342_v15, %v7433_v46  ;;  %v4908_v47 = vpop.f32.mrf.mxu0 }
 0x2bc   : > { %v4944_v3 = vadd.f32 %v4906_v37, %v4450_v26 }
 0x2be   : > { %v5044_v61 = vadd.f32 %v7352_v38, %v4944_v3 }
 0x2bf   : > { %v3696_v45 = vpop.f32.mrf.mxu2 }
 0x2c0   : > { %v5076_v22 = vmax.f32 %v5044_v61, 0.0  ;;  %v3733_v30 = vadd.f32 %v3696_v45, %v3379_v4  ;;  %v4414_v56 = vpop.f32.mrf.mxu3 }
 0x2c1   : > { %v3345_v58 = vpop.f32.mrf.mxu1 }
 0x2c2   : > { %5108 = vst [vmem:[%s7121_s12 + $0xe0] sm:$0xff] %v5076_v22  ;;  %v4451_v11 = vadd.f32 %v4414_v56, %v3733_v30  ;;  %v3380_v17 = vadd.f32 %v3345_v58, %v7434_v13  ;;  %v4911_v8 = vpop.f32.mrf.mxu0 }
 0x2c4   : > { %v4945_v31 = vadd.f32 %v4908_v47, %v4451_v11 }
 0x2c6   : > { %v5045_v0 = vadd.f32 %v7352_v38, %v4945_v31 }
 0x2c7   : > { %v3699_v9 = vpop.f32.mrf.mxu2 }
 0x2c8   : > { %v5077_v12 = vmax.f32 %v5045_v0, 0.0  ;;  %v3734_v63 = vadd.f32 %v3699_v9, %v3380_v17  ;;  %v4417_v43 = vpop.f32.mrf.mxu3 }
 0x2c9   : > { %v3347_v33 = vpop.f32.mrf.mxu1 }
 0x2ca   : > { %5109 = vst [vmem:[%s7121_s12 + $0xe8] sm:$0xff] %v5077_v12  ;;  %v4452_v5 = vadd.f32 %v4417_v43, %v3734_v63  ;;  %v3381_v54 = vadd.f32 %v3347_v33, %v7435_v42  ;;  %v4913_v36 = vpop.f32.mrf.mxu0 }
 0x2cc   : > { %v4946_v29 = vadd.f32 %v4911_v8, %v4452_v5 }
 0x2ce   : > { %v5046_v44 = vadd.f32 %v7352_v38, %v4946_v29 }
 0x2cf   : > { %v3701_v24 = vpop.f32.mrf.mxu2 }
 0x2d0   : > { %v5078_v62 = vmax.f32 %v5046_v44, 0.0  ;;  %v3735_v7 = vadd.f32 %v3701_v24, %v3381_v54  ;;  %v4419_v6 = vpop.f32.mrf.mxu3 }
 0x2d2   : > { %5110 = vst [vmem:[%s7121_s12 + $0xf0] sm:$0xff] %v5078_v62  ;;  %v4453_v25 = vadd.f32 %v4419_v6, %v3735_v7 }
 0x2d4   : > { %v4947_v16 = vadd.f32 %v4913_v36, %v4453_v25 }
 0x2d6   : > { %v5047_v41 = vadd.f32 %v7352_v38, %v4947_v16 }
 0x2d8   : > { %v5079_v35 = vmax.f32 %v5047_v41, 0.0 }
 0x2da   : > { %5111 = vst [vmem:[%s7121_s12 + $0xf8] sm:$0xff] %v5079_v35 }
 0x2db PF: > { %s13_s14 = sadd.s32 1, %s6010_s14   ;;  %s7436_s12 = smov %s6006_s13 }
 0x2dc   : > { %p10_p5 = scmp.ge.s32.totalorder %s13_s14, 4   ;;  %s7437_s13 = smov %s7439_s15 }
 0x2de   :  { %12 = sbr.rel (!%p10_p5) target bundleno = 2 (0x2), region = 79 }

</bundles_post_ra>
